<compile_context>
chip_gen: v7x
topology: tpu7x:2x2x1
jax: 0.10.0
libtpu: 0.0.40
codegen_flags: <defaults>
</compile_context>

<pallas_src>
import functools

import numpy as np
import jax
import jax.numpy as jnp
from jax import lax
from jax.experimental import pallas as pl
from jax.experimental.pallas import tpu as pltpu


def _mm(a, b):
    """2-D matmul with f32 accumulation (MXU)."""
    return lax.dot_general(a, b, (((1,), (0,)), ((), ())),
                           preferred_element_type=jnp.float32)


# --------------------------------------------------------------------------
# Kernel A: ConvTranspose2d(k=2,s=2) upsample + concat + zero-pad + conv1
#           (pre-BN output) + per-image channel sum / sum-of-squares.
# --------------------------------------------------------------------------
def _up_cat_conv_kernel(x1_ref, x2_ref, wup_ref, bup_ref, sup_ref, pc_ref,
                        w1_ref, vmask_ref, z_ref, ssum_ref, ssq_ref, *,
                        wp, l_len):
    x1 = x1_ref[0]                        # [C1, H2*W2]
    x2 = x2_ref[0]                        # [Ch, H*W]
    ch = x2.shape[0]
    hw = sup_ref.shape[2]

    # Transposed conv: 4 taps, each tap = small matmul + constant scatter.
    u = jnp.zeros((ch, hw), jnp.float32)
    for k in range(4):
        yk = _mm(wup_ref[k], x1)          # [Ch, H2*W2]
        u = u + _mm(yk, sup_ref[k])       # scatter to full-res [Ch, H*W]
    u = u + bup_ref[...]                  # transposed-conv bias (NOT cancelled)

    cat = jnp.concatenate([x2, u], axis=0)          # torch.cat([x2, x1], dim=1)
    xp = _mm(cat, pc_ref[...])                      # zero-padded [Cin, HP*WP]

    cout = w1_ref.shape[1]
    acc = jnp.zeros((cout, l_len), jnp.float32)
    for kh in range(3):                   # 9 taps; RHS is lane-dense [Cin, L]
        for kw in range(3):
            off = kh * wp + kw
            acc = acc + _mm(w1_ref[kh * 3 + kw], xp[:, off:off + l_len])

    z_ref[0] = acc                                   # pre-BN conv1 output
    vm = vmask_ref[...]                              # mask out garbage columns
    accm = acc * vm
    ssum_ref[0] = jnp.sum(accm, axis=1, keepdims=True)
    ssq_ref[0] = jnp.sum(accm * acc, axis=1, keepdims=True)


# --------------------------------------------------------------------------
# Kernel B: fused BN1 (scale/shift) + LeakyReLU + re-pad + conv2 + stats.
# --------------------------------------------------------------------------
def _bn_lrelu_conv_kernel(z_ref, sc_ref, sh_ref, pu_ref, w_ref, vmask_ref,
                          zo_ref, ssum_ref, ssq_ref, *, wp, l_len, slope):
    z = z_ref[0]                                     # [Cin, L]
    y = z * sc_ref[...] + sh_ref[...]                # fused BatchNorm
    y = jnp.maximum(y, slope * y)                    # LeakyReLU(0.01)
    xp = _mm(y, pu_ref[...])                         # re-pad -> [Cin, HP*WP]

    cout = w_ref.shape[1]
    acc = jnp.zeros((cout, l_len), jnp.float32)
    for kh in range(3):
        for kw in range(3):
            off = kh * wp + kw
            acc = acc + _mm(w_ref[kh * 3 + kw], xp[:, off:off + l_len])

    zo_ref[0] = acc
    vm = vmask_ref[...]
    accm = acc * vm
    ssum_ref[0] = jnp.sum(accm, axis=1, keepdims=True)
    ssq_ref[0] = jnp.sum(accm * acc, axis=1, keepdims=True)


# --------------------------------------------------------------------------
# Kernel C: fused BN2 (scale/shift) + LeakyReLU -> lane-dense [C, H*W] output.
# --------------------------------------------------------------------------
def _bn_lrelu_out_kernel(z_ref, sc_ref, sh_ref, sel_ref, o_ref, *, slope):
    z = z_ref[0]
    y = z * sc_ref[...] + sh_ref[...]
    y = jnp.maximum(y, slope * y)
    o_ref[0] = _mm(y, sel_ref[...])                  # crop garbage columns


# --------------------------------------------------------------------------
# Wrapper: NCHW in, NCHW out (matches the PyTorch module's forward).
# --------------------------------------------------------------------------
def expansion_forward(x1, x2, wt, bt, w1, b1, g1, be1, w2, b2, g2, be2,
                      *, eps=1e-5, slope=0.01):
    del b1, b2  # cancelled exactly by the train-mode BatchNorm mean subtraction
    x1 = x1.astype(jnp.float32)
    x2 = x2.astype(jnp.float32)
    N, C1, H2, W2 = x1.shape
    _, Ch, H, W = x2.shape
    assert H == 2 * H2 and W == 2 * W2 and Ch == C1 // 2
    Cin = Ch * 2
    Cm = w1.shape[0]
    Co = w2.shape[0]
    HP, WP = H + 2, W + 2
    HW, HPWP = H * W, HP * WP
    L = (H - 1) * WP + W          # un-cropped conv-output length (flat H x WP)

    # ---- constant 0/1 structure matrices (trace-time, tiny) ----------------
    sup = np.zeros((4, H2 * W2, HW), np.float32)      # 2x2 upsample scatter
    for dh in range(2):
        for dw in range(2):
            k = dh * 2 + dw
            for h in range(H2):
                for w in range(W2):
                    sup[k, h * W2 + w, (2 * h + dh) * W + (2 * w + dw)] = 1.0
    pc = np.zeros((HW, HPWP), np.float32)             # compact -> padded flat
    for h in range(H):
        for w in range(W):
            pc[h * W + w, (h + 1) * WP + (w + 1)] = 1.0
    pu = np.zeros((L, HPWP), np.float32)              # un-cropped -> padded
    sel = np.zeros((L, HW), np.float32)               # un-cropped -> compact
    vmask = np.zeros((1, L), np.float32)              # valid-column mask
    for c in range(L):
        h, w = divmod(c, WP)
        if w < W:
            pu[c, (h + 1) * WP + (w + 1)] = 1.0
            sel[c, h * W + w] = 1.0
            vmask[0, c] = 1.0
    sup, pc, pu = jnp.asarray(sup), jnp.asarray(pc), jnp.asarray(pu)
    sel, vmask = jnp.asarray(sel), jnp.asarray(vmask)

    # ---- weights in kernel-friendly tap layouts ----------------------------
    wup = jnp.transpose(wt.astype(jnp.float32), (2, 3, 1, 0)).reshape(4, Ch, C1)
    bup = bt.astype(jnp.float32).reshape(Ch, 1)
    w1t = jnp.transpose(w1.astype(jnp.float32), (2, 3, 0, 1)).reshape(9, Cm, Cin)
    w2t = jnp.transpose(w2.astype(jnp.float32), (2, 3, 0, 1)).reshape(9, Co, Cm)

    x1f = x1.reshape(N, C1, H2 * W2)      # contiguous reshapes only (no copies)
    x2f = x2.reshape(N, Ch, HW)

    cparams = pltpu.CompilerParams(
        dimension_semantics=("parallel",),
        vmem_limit_bytes=32 * 1024 * 1024)

    def full(shape):
        return pl.BlockSpec(shape, lambda n: (0,) * len(shape))

    def per_n(shape):
        return pl.BlockSpec((1,) + shape, lambda n: (n,) + (0,) * len(shape))

    # ---- stage 1: upsample + concat + pad + conv1 + stats ------------------
    z1, ss1, sq1 = pl.pallas_call(
        functools.partial(_up_cat_conv_kernel, wp=WP, l_len=L),
        grid=(N,),
        in_specs=[per_n((C1, H2 * W2)), per_n((Ch, HW)),
                  full((4, Ch, C1)), full((Ch, 1)),
                  full((4, H2 * W2, HW)), full((HW, HPWP)),
                  full((9, Cm, Cin)), full((1, L))],
        out_specs=(per_n((Cm, L)), per_n((Cm, 1)), per_n((Cm, 1))),
        out_shape=(jax.ShapeDtypeStruct((N, Cm, L), jnp.float32),
                   jax.ShapeDtypeStruct((N, Cm, 1), jnp.float32),
                   jax.ShapeDtypeStruct((N, Cm, 1), jnp.float32)),
        compiler_params=cparams,
    )(x1f, x2f, wup, bup, sup, pc, w1t, vmask)

    def bn_scale_shift(ssum, ssq, gamma, beta):
        cnt = float(N * H * W)
        mean = jnp.sum(ssum, axis=(0, 2)) / cnt
        ex2 = jnp.sum(ssq, axis=(0, 2)) / cnt
        var = jnp.maximum(ex2 - mean * mean, 0.0)
        scale = gamma.astype(jnp.float32) * lax.rsqrt(var + eps)
        shift = beta.astype(jnp.float32) - mean * scale
        return scale.reshape(-1, 1), shift.reshape(-1, 1)

    sc1, sh1 = bn_scale_shift(ss1, sq1, g1, be1)

    # ---- stage 2: BN1 + LeakyReLU + re-pad + conv2 + stats -----------------
    z2, ss2, sq2 = pl.pallas_call(
        functools.partial(_bn_lrelu_conv_kernel, wp=WP, l_len=L, slope=slope),
        grid=(N,),
        in_specs=[per_n((Cm, L)), full((Cm, 1)), full((Cm, 1)),
                  full((L, HPWP)), full((9, Co, Cm)), full((1, L))],
        out_specs=(per_n((Co, L)), per_n((Co, 1)), per_n((Co, 1))),
        out_shape=(jax.ShapeDtypeStruct((N, Co, L), jnp.float32),
                   jax.ShapeDtypeStruct((N, Co, 1), jnp.float32),
                   jax.ShapeDtypeStruct((N, Co, 1), jnp.float32)),
        compiler_params=cparams,
    )(z1, sc1, sh1, pu, w2t, vmask)

    sc2, sh2 = bn_scale_shift(ss2, sq2, g2, be2)

    # ---- stage 3: BN2 + LeakyReLU -> final lane-dense output ---------------
    out = pl.pallas_call(
        functools.partial(_bn_lrelu_out_kernel, slope=slope),
        grid=(N,),
        in_specs=[per_n((Co, L)), full((Co, 1)), full((Co, 1)), full((L, HW))],
        out_specs=per_n((Co, HW)),
        out_shape=jax.ShapeDtypeStruct((N, Co, HW), jnp.float32),
        compiler_params=cparams,
    )(z2, sc2, sh2, sel)

    return out.reshape(N, Co, H, W)       # already NCHW; free reshape


# --------------------------------------------------------------------------
# Pure-JAX reference (mirrors the PyTorch module, incl. the conv biases).
# --------------------------------------------------------------------------
def _reference(x1, x2, wt, bt, w1, b1, g1, be1, w2, b2, g2, be2,
               eps=1e-5, slope=0.01):
    x1 = x1.astype(jnp.float32)
    x2 = x2.astype(jnp.float32)
    u = jnp.einsum('nihw,iopq->nohpwq', x1, wt.astype(jnp.float32),
                   precision=lax.Precision.HIGHEST)
    N, Ch, H2, _, W2, _ = u.shape
    u = u.reshape(N, Ch, 2 * H2, 2 * W2) + bt[None, :, None, None]
    x = jnp.concatenate([x2, u], axis=1)

    def block(x, w, b, g, be):
        y = lax.conv_general_dilated(
            x, w.astype(jnp.float32), (1, 1), [(1, 1), (1, 1)],
            dimension_numbers=("NCHW", "OIHW", "NCHW"),
            precision=lax.Precision.HIGHEST)
        y = y + b[None, :, None, None]
        m = y.mean(axis=(0, 2, 3), keepdims=True)
        v = ((y - m) ** 2).mean(axis=(0, 2, 3), keepdims=True)
        y = (y - m) * lax.rsqrt(v + eps) * g[None, :, None, None] \
            + be[None, :, None, None]
        return jnp.where(y >= 0, y, slope * y)

    x = block(x, w1, b1, g1, be1)
    x = block(x, w2, b2, g2, be2)
    return x


if __name__ == "__main__":
    # Expansion(in_channels=4, out_channels=8):
    #   x1: [N, 4, 8, 8]  (low-res),  x2: [N, 2, 16, 16]  (skip connection)
    N = 2
    in_ch, out_ch = 4, 8
    H, W = 16, 16
    H2, W2 = H // 2, W // 2
    Ch = in_ch // 2

    key = jax.random.PRNGKey(0)
    ks = jax.random.split(key, 12)
    x1 = jax.random.normal(ks[0], (N, in_ch, H2, W2), jnp.float32)
    x2 = jax.random.normal(ks[1], (N, Ch, H, W), jnp.float32)
    wt = 0.2 * jax.random.normal(ks[2], (in_ch, Ch, 2, 2), jnp.float32)
    bt = 0.1 * jax.random.normal(ks[3], (Ch,), jnp.float32)
    w1 = 0.2 * jax.random.normal(ks[4], (out_ch, in_ch, 3, 3), jnp.float32)
    b1 = 0.1 * jax.random.normal(ks[5], (out_ch,), jnp.float32)
    g1 = 1.0 + 0.1 * jax.random.normal(ks[6], (out_ch,), jnp.float32)
    be1 = 0.1 * jax.random.normal(ks[7], (out_ch,), jnp.float32)
    w2 = 0.2 * jax.random.normal(ks[8], (out_ch, out_ch, 3, 3), jnp.float32)
    b2 = 0.1 * jax.random.normal(ks[9], (out_ch,), jnp.float32)
    g2 = 1.0 + 0.1 * jax.random.normal(ks[10], (out_ch,), jnp.float32)
    be2 = 0.1 * jax.random.normal(ks[11], (out_ch,), jnp.float32)

    fwd = jax.jit(expansion_forward)
    out = jax.block_until_ready(
        fwd(x1, x2, wt, bt, w1, b1, g1, be1, w2, b2, g2, be2))

    ref = jax.block_until_ready(
        _reference(x1, x2, wt, bt, w1, b1, g1, be1, w2, b2, g2, be2))

    assert out.shape == (N, out_ch, H, W), out.shape
    np.testing.assert_allclose(np.asarray(out), np.asarray(ref),
                               rtol=1e-2, atol=1e-2)
    print("KERNEL_OK")
</pallas_src>

<mosaic_0001>
module attributes {stable_mosaic.version = 11 : i64} {
  func.func @_up_cat_conv_kernel(%arg0: i32, %arg1: memref<1x4x64xf32, #tpu.memory_space<vmem>>, %arg2: memref<1x2x256xf32, #tpu.memory_space<vmem>>, %arg3: memref<4x2x4xf32, #tpu.memory_space<vmem>>, %arg4: memref<2x1xf32, #tpu.memory_space<vmem>>, %arg5: memref<4x64x256xf32, #tpu.memory_space<vmem>>, %arg6: memref<256x324xf32, #tpu.memory_space<vmem>>, %arg7: memref<9x8x4xf32, #tpu.memory_space<vmem>>, %arg8: memref<1x286xf32, #tpu.memory_space<vmem>>, %arg9: memref<1x8x286xf32, #tpu.memory_space<vmem>>, %arg10: memref<1x8x1xf32, #tpu.memory_space<vmem>>, %arg11: memref<1x8x1xf32, #tpu.memory_space<vmem>>) attributes {dimension_semantics = [#tpu.dimension_semantics<parallel>], iteration_bounds = array<i64: 2>, scalar_prefetch = 0 : i64, scratch_operands = 0 : i64, tpu.core_type = #tpu.core_type<tc>, window_params = [{transform_indices = @transform_0, window_bounds = array<i64: 1, 4, 64>}, {transform_indices = @transform_1, window_bounds = array<i64: 1, 2, 256>}, {pipeline_mode = #tpu.pipeline_mode<synchronous>, transform_indices = @transform_2, window_bounds = array<i64: 4, 2, 4>}, {pipeline_mode = #tpu.pipeline_mode<synchronous>, transform_indices = @transform_3, window_bounds = array<i64: 2, 1>}, {pipeline_mode = #tpu.pipeline_mode<synchronous>, transform_indices = @transform_4, window_bounds = array<i64: 4, 64, 256>}, {pipeline_mode = #tpu.pipeline_mode<synchronous>, transform_indices = @transform_5, window_bounds = array<i64: 256, 324>}, {pipeline_mode = #tpu.pipeline_mode<synchronous>, transform_indices = @transform_6, window_bounds = array<i64: 9, 8, 4>}, {pipeline_mode = #tpu.pipeline_mode<synchronous>, transform_indices = @transform_7, window_bounds = array<i64: 1, 286>}, {transform_indices = @transform_8, window_bounds = array<i64: 1, 8, 286>}, {transform_indices = @transform_9, window_bounds = array<i64: 1, 8, 1>}, {transform_indices = @transform_10, window_bounds = array<i64: 1, 8, 1>}]} {
    %c0 = arith.constant 0 : index
    %c0_0 = arith.constant 0 : index
    %c0_1 = arith.constant 0 : index
    %0 = vector.load %arg1[%c0, %c0_0, %c0_1] : memref<1x4x64xf32, #tpu.memory_space<vmem>>, vector<1x4x64xf32>
    %1 = vector.shape_cast %0 : vector<1x4x64xf32> to vector<4x64xf32>
    %c0_2 = arith.constant 0 : index
    %c0_3 = arith.constant 0 : index
    %c0_4 = arith.constant 0 : index
    %2 = vector.load %arg2[%c0_2, %c0_3, %c0_4] : memref<1x2x256xf32, #tpu.memory_space<vmem>>, vector<1x2x256xf32>
    %3 = vector.shape_cast %2 : vector<1x2x256xf32> to vector<2x256xf32>
    %cst = arith.constant 0.000000e+00 : f32
    %4 = vector.broadcast %cst : f32 to vector<2x256xf32>
    %c0_5 = arith.constant 0 : index
    %c0_6 = arith.constant 0 : index
    %c0_7 = arith.constant 0 : index
    %5 = vector.load %arg3[%c0_5, %c0_6, %c0_7] : memref<4x2x4xf32, #tpu.memory_space<vmem>>, vector<1x2x4xf32>
    %6 = vector.shape_cast %5 : vector<1x2x4xf32> to vector<2x4xf32>
    %cst_8 = arith.constant dense<0.000000e+00> : vector<2x64xf32>
    %7 = tpu.matmul %6, %1, %cst_8 {dimension_numbers = #tpu.dot_dimension_numbers<[1], [0], [0], [1], [0, 0, 1, 1], [], []>} : vector<2x4xf32>, vector<4x64xf32>, vector<2x64xf32> -> vector<2x64xf32>
    %c0_9 = arith.constant 0 : index
    %c0_10 = arith.constant 0 : index
    %c0_11 = arith.constant 0 : index
    %8 = vector.load %arg5[%c0_9, %c0_10, %c0_11] : memref<4x64x256xf32, #tpu.memory_space<vmem>>, vector<1x64x256xf32>
    %9 = vector.shape_cast %8 : vector<1x64x256xf32> to vector<64x256xf32>
    %cst_12 = arith.constant dense<0.000000e+00> : vector<2x256xf32>
    %10 = tpu.matmul %7, %9, %cst_12 {dimension_numbers = #tpu.dot_dimension_numbers<[1], [0], [0], [1], [0, 0, 1, 1], [], []>} : vector<2x64xf32>, vector<64x256xf32>, vector<2x256xf32> -> vector<2x256xf32>
    %11 = arith.addf %4, %10 : vector<2x256xf32>
    %c1 = arith.constant 1 : index
    %c0_13 = arith.constant 0 : index
    %c0_14 = arith.constant 0 : index
    %12 = vector.load %arg3[%c1, %c0_13, %c0_14] : memref<4x2x4xf32, #tpu.memory_space<vmem>>, vector<1x2x4xf32>
    %13 = vector.shape_cast %12 : vector<1x2x4xf32> to vector<2x4xf32>
    %cst_15 = arith.constant dense<0.000000e+00> : vector<2x64xf32>
    %14 = tpu.matmul %13, %1, %cst_15 {dimension_numbers = #tpu.dot_dimension_numbers<[1], [0], [0], [1], [0, 0, 1, 1], [], []>} : vector<2x4xf32>, vector<4x64xf32>, vector<2x64xf32> -> vector<2x64xf32>
    %c1_16 = arith.constant 1 : index
    %c0_17 = arith.constant 0 : index
    %c0_18 = arith.constant 0 : index
    %15 = vector.load %arg5[%c1_16, %c0_17, %c0_18] : memref<4x64x256xf32, #tpu.memory_space<vmem>>, vector<1x64x256xf32>
    %16 = vector.shape_cast %15 : vector<1x64x256xf32> to vector<64x256xf32>
    %cst_19 = arith.constant dense<0.000000e+00> : vector<2x256xf32>
    %17 = tpu.matmul %14, %16, %cst_19 {dimension_numbers = #tpu.dot_dimension_numbers<[1], [0], [0], [1], [0, 0, 1, 1], [], []>} : vector<2x64xf32>, vector<64x256xf32>, vector<2x256xf32> -> vector<2x256xf32>
    %18 = arith.addf %11, %17 : vector<2x256xf32>
    %c2 = arith.constant 2 : index
    %c0_20 = arith.constant 0 : index
    %c0_21 = arith.constant 0 : index
    %19 = vector.load %arg3[%c2, %c0_20, %c0_21] : memref<4x2x4xf32, #tpu.memory_space<vmem>>, vector<1x2x4xf32>
    %20 = vector.shape_cast %19 : vector<1x2x4xf32> to vector<2x4xf32>
    %cst_22 = arith.constant dense<0.000000e+00> : vector<2x64xf32>
    %21 = tpu.matmul %20, %1, %cst_22 {dimension_numbers = #tpu.dot_dimension_numbers<[1], [0], [0], [1], [0, 0, 1, 1], [], []>} : vector<2x4xf32>, vector<4x64xf32>, vector<2x64xf32> -> vector<2x64xf32>
    %c2_23 = arith.constant 2 : index
    %c0_24 = arith.constant 0 : index
    %c0_25 = arith.constant 0 : index
    %22 = vector.load %arg5[%c2_23, %c0_24, %c0_25] : memref<4x64x256xf32, #tpu.memory_space<vmem>>, vector<1x64x256xf32>
    %23 = vector.shape_cast %22 : vector<1x64x256xf32> to vector<64x256xf32>
    %cst_26 = arith.constant dense<0.000000e+00> : vector<2x256xf32>
    %24 = tpu.matmul %21, %23, %cst_26 {dimension_numbers = #tpu.dot_dimension_numbers<[1], [0], [0], [1], [0, 0, 1, 1], [], []>} : vector<2x64xf32>, vector<64x256xf32>, vector<2x256xf32> -> vector<2x256xf32>
    %25 = arith.addf %18, %24 : vector<2x256xf32>
    %c3 = arith.constant 3 : index
    %c0_27 = arith.constant 0 : index
    %c0_28 = arith.constant 0 : index
    %26 = vector.load %arg3[%c3, %c0_27, %c0_28] : memref<4x2x4xf32, #tpu.memory_space<vmem>>, vector<1x2x4xf32>
    %27 = vector.shape_cast %26 : vector<1x2x4xf32> to vector<2x4xf32>
    %cst_29 = arith.constant dense<0.000000e+00> : vector<2x64xf32>
    %28 = tpu.matmul %27, %1, %cst_29 {dimension_numbers = #tpu.dot_dimension_numbers<[1], [0], [0], [1], [0, 0, 1, 1], [], []>} : vector<2x4xf32>, vector<4x64xf32>, vector<2x64xf32> -> vector<2x64xf32>
    %c3_30 = arith.constant 3 : index
    %c0_31 = arith.constant 0 : index
    %c0_32 = arith.constant 0 : index
    %29 = vector.load %arg5[%c3_30, %c0_31, %c0_32] : memref<4x64x256xf32, #tpu.memory_space<vmem>>, vector<1x64x256xf32>
    %30 = vector.shape_cast %29 : vector<1x64x256xf32> to vector<64x256xf32>
    %cst_33 = arith.constant dense<0.000000e+00> : vector<2x256xf32>
    %31 = tpu.matmul %28, %30, %cst_33 {dimension_numbers = #tpu.dot_dimension_numbers<[1], [0], [0], [1], [0, 0, 1, 1], [], []>} : vector<2x64xf32>, vector<64x256xf32>, vector<2x256xf32> -> vector<2x256xf32>
    %32 = arith.addf %25, %31 : vector<2x256xf32>
    %c0_34 = arith.constant 0 : index
    %c0_35 = arith.constant 0 : index
    %33 = vector.load %arg4[%c0_34, %c0_35] : memref<2x1xf32, #tpu.memory_space<vmem>>, vector<2x1xf32>
    %34 = vector.broadcast %33 : vector<2x1xf32> to vector<2x256xf32>
    %35 = arith.addf %32, %34 : vector<2x256xf32>
    %36 = tpu.concatenate %3, %35 in 0 : vector<2x256xf32>, vector<2x256xf32> -> vector<4x256xf32>
    %c0_36 = arith.constant 0 : index
    %c0_37 = arith.constant 0 : index
    %37 = vector.load %arg6[%c0_36, %c0_37] : memref<256x324xf32, #tpu.memory_space<vmem>>, vector<256x324xf32>
    %cst_38 = arith.constant dense<0.000000e+00> : vector<4x324xf32>
    %38 = tpu.matmul %36, %37, %cst_38 {dimension_numbers = #tpu.dot_dimension_numbers<[1], [0], [0], [1], [0, 0, 1, 1], [], []>} : vector<4x256xf32>, vector<256x324xf32>, vector<4x324xf32> -> vector<4x324xf32>
    %cst_39 = arith.constant 0.000000e+00 : f32
    %39 = vector.broadcast %cst_39 : f32 to vector<8x286xf32>
    %c0_40 = arith.constant 0 : index
    %c0_41 = arith.constant 0 : index
    %c0_42 = arith.constant 0 : index
    %40 = vector.load %arg7[%c0_40, %c0_41, %c0_42] : memref<9x8x4xf32, #tpu.memory_space<vmem>>, vector<1x8x4xf32>
    %41 = vector.shape_cast %40 : vector<1x8x4xf32> to vector<8x4xf32>
    %42 = vector.extract_strided_slice %38 {offsets = [0, 0], sizes = [4, 286], strides = [1, 1]} : vector<4x324xf32> to vector<4x286xf32>
    %cst_43 = arith.constant dense<0.000000e+00> : vector<8x286xf32>
    %43 = tpu.matmul %41, %42, %cst_43 {dimension_numbers = #tpu.dot_dimension_numbers<[1], [0], [0], [1], [0, 0, 1, 1], [], []>} : vector<8x4xf32>, vector<4x286xf32>, vector<8x286xf32> -> vector<8x286xf32>
    %44 = arith.addf %39, %43 : vector<8x286xf32>
    %c1_44 = arith.constant 1 : index
    %c0_45 = arith.constant 0 : index
    %c0_46 = arith.constant 0 : index
    %45 = vector.load %arg7[%c1_44, %c0_45, %c0_46] : memref<9x8x4xf32, #tpu.memory_space<vmem>>, vector<1x8x4xf32>
    %46 = vector.shape_cast %45 : vector<1x8x4xf32> to vector<8x4xf32>
    %47 = vector.extract_strided_slice %38 {offsets = [0, 1], sizes = [4, 286], strides = [1, 1]} : vector<4x324xf32> to vector<4x286xf32>
    %cst_47 = arith.constant dense<0.000000e+00> : vector<8x286xf32>
    %48 = tpu.matmul %46, %47, %cst_47 {dimension_numbers = #tpu.dot_dimension_numbers<[1], [0], [0], [1], [0, 0, 1, 1], [], []>} : vector<8x4xf32>, vector<4x286xf32>, vector<8x286xf32> -> vector<8x286xf32>
    %49 = arith.addf %44, %48 : vector<8x286xf32>
    %c2_48 = arith.constant 2 : index
    %c0_49 = arith.constant 0 : index
    %c0_50 = arith.constant 0 : index
    %50 = vector.load %arg7[%c2_48, %c0_49, %c0_50] : memref<9x8x4xf32, #tpu.memory_space<vmem>>, vector<1x8x4xf32>
    %51 = vector.shape_cast %50 : vector<1x8x4xf32> to vector<8x4xf32>
    %52 = vector.extract_strided_slice %38 {offsets = [0, 2], sizes = [4, 286], strides = [1, 1]} : vector<4x324xf32> to vector<4x286xf32>
    %cst_51 = arith.constant dense<0.000000e+00> : vector<8x286xf32>
    %53 = tpu.matmul %51, %52, %cst_51 {dimension_numbers = #tpu.dot_dimension_numbers<[1], [0], [0], [1], [0, 0, 1, 1], [], []>} : vector<8x4xf32>, vector<4x286xf32>, vector<8x286xf32> -> vector<8x286xf32>
    %54 = arith.addf %49, %53 : vector<8x286xf32>
    %c3_52 = arith.constant 3 : index
    %c0_53 = arith.constant 0 : index
    %c0_54 = arith.constant 0 : index
    %55 = vector.load %arg7[%c3_52, %c0_53, %c0_54] : memref<9x8x4xf32, #tpu.memory_space<vmem>>, vector<1x8x4xf32>
    %56 = vector.shape_cast %55 : vector<1x8x4xf32> to vector<8x4xf32>
    %57 = vector.extract_strided_slice %38 {offsets = [0, 18], sizes = [4, 286], strides = [1, 1]} : vector<4x324xf32> to vector<4x286xf32>
    %cst_55 = arith.constant dense<0.000000e+00> : vector<8x286xf32>
    %58 = tpu.matmul %56, %57, %cst_55 {dimension_numbers = #tpu.dot_dimension_numbers<[1], [0], [0], [1], [0, 0, 1, 1], [], []>} : vector<8x4xf32>, vector<4x286xf32>, vector<8x286xf32> -> vector<8x286xf32>
    %59 = arith.addf %54, %58 : vector<8x286xf32>
    %c4 = arith.constant 4 : index
    %c0_56 = arith.constant 0 : index
    %c0_57 = arith.constant 0 : index
    %60 = vector.load %arg7[%c4, %c0_56, %c0_57] : memref<9x8x4xf32, #tpu.memory_space<vmem>>, vector<1x8x4xf32>
    %61 = vector.shape_cast %60 : vector<1x8x4xf32> to vector<8x4xf32>
    %62 = vector.extract_strided_slice %38 {offsets = [0, 19], sizes = [4, 286], strides = [1, 1]} : vector<4x324xf32> to vector<4x286xf32>
    %cst_58 = arith.constant dense<0.000000e+00> : vector<8x286xf32>
    %63 = tpu.matmul %61, %62, %cst_58 {dimension_numbers = #tpu.dot_dimension_numbers<[1], [0], [0], [1], [0, 0, 1, 1], [], []>} : vector<8x4xf32>, vector<4x286xf32>, vector<8x286xf32> -> vector<8x286xf32>
    %64 = arith.addf %59, %63 : vector<8x286xf32>
    %c5 = arith.constant 5 : index
    %c0_59 = arith.constant 0 : index
    %c0_60 = arith.constant 0 : index
    %65 = vector.load %arg7[%c5, %c0_59, %c0_60] : memref<9x8x4xf32, #tpu.memory_space<vmem>>, vector<1x8x4xf32>
    %66 = vector.shape_cast %65 : vector<1x8x4xf32> to vector<8x4xf32>
    %67 = vector.extract_strided_slice %38 {offsets = [0, 20], sizes = [4, 286], strides = [1, 1]} : vector<4x324xf32> to vector<4x286xf32>
    %cst_61 = arith.constant dense<0.000000e+00> : vector<8x286xf32>
    %68 = tpu.matmul %66, %67, %cst_61 {dimension_numbers = #tpu.dot_dimension_numbers<[1], [0], [0], [1], [0, 0, 1, 1], [], []>} : vector<8x4xf32>, vector<4x286xf32>, vector<8x286xf32> -> vector<8x286xf32>
    %69 = arith.addf %64, %68 : vector<8x286xf32>
    %c6 = arith.constant 6 : index
    %c0_62 = arith.constant 0 : index
    %c0_63 = arith.constant 0 : index
    %70 = vector.load %arg7[%c6, %c0_62, %c0_63] : memref<9x8x4xf32, #tpu.memory_space<vmem>>, vector<1x8x4xf32>
    %71 = vector.shape_cast %70 : vector<1x8x4xf32> to vector<8x4xf32>
    %72 = vector.extract_strided_slice %38 {offsets = [0, 36], sizes = [4, 286], strides = [1, 1]} : vector<4x324xf32> to vector<4x286xf32>
    %cst_64 = arith.constant dense<0.000000e+00> : vector<8x286xf32>
    %73 = tpu.matmul %71, %72, %cst_64 {dimension_numbers = #tpu.dot_dimension_numbers<[1], [0], [0], [1], [0, 0, 1, 1], [], []>} : vector<8x4xf32>, vector<4x286xf32>, vector<8x286xf32> -> vector<8x286xf32>
    %74 = arith.addf %69, %73 : vector<8x286xf32>
    %c7 = arith.constant 7 : index
    %c0_65 = arith.constant 0 : index
    %c0_66 = arith.constant 0 : index
    %75 = vector.load %arg7[%c7, %c0_65, %c0_66] : memref<9x8x4xf32, #tpu.memory_space<vmem>>, vector<1x8x4xf32>
    %76 = vector.shape_cast %75 : vector<1x8x4xf32> to vector<8x4xf32>
    %77 = vector.extract_strided_slice %38 {offsets = [0, 37], sizes = [4, 286], strides = [1, 1]} : vector<4x324xf32> to vector<4x286xf32>
    %cst_67 = arith.constant dense<0.000000e+00> : vector<8x286xf32>
    %78 = tpu.matmul %76, %77, %cst_67 {dimension_numbers = #tpu.dot_dimension_numbers<[1], [0], [0], [1], [0, 0, 1, 1], [], []>} : vector<8x4xf32>, vector<4x286xf32>, vector<8x286xf32> -> vector<8x286xf32>
    %79 = arith.addf %74, %78 : vector<8x286xf32>
    %c8 = arith.constant 8 : index
    %c0_68 = arith.constant 0 : index
    %c0_69 = arith.constant 0 : index
    %80 = vector.load %arg7[%c8, %c0_68, %c0_69] : memref<9x8x4xf32, #tpu.memory_space<vmem>>, vector<1x8x4xf32>
    %81 = vector.shape_cast %80 : vector<1x8x4xf32> to vector<8x4xf32>
    %82 = vector.extract_strided_slice %38 {offsets = [0, 38], sizes = [4, 286], strides = [1, 1]} : vector<4x324xf32> to vector<4x286xf32>
    %cst_70 = arith.constant dense<0.000000e+00> : vector<8x286xf32>
    %83 = tpu.matmul %81, %82, %cst_70 {dimension_numbers = #tpu.dot_dimension_numbers<[1], [0], [0], [1], [0, 0, 1, 1], [], []>} : vector<8x4xf32>, vector<4x286xf32>, vector<8x286xf32> -> vector<8x286xf32>
    %84 = arith.addf %79, %83 : vector<8x286xf32>
    %c0_71 = arith.constant 0 : index
    %c0_72 = arith.constant 0 : index
    %c0_73 = arith.constant 0 : index
    %85 = vector.load %arg9[%c0_71, %c0_72, %c0_73] : memref<1x8x286xf32, #tpu.memory_space<vmem>>, vector<1x8x286xf32>
    %86 = vector.shape_cast %85 : vector<1x8x286xf32> to vector<8x286xf32>
    %87 = vector.shape_cast %84 : vector<8x286xf32> to vector<1x8x286xf32>
    tpu.vector_store %arg9[%c0_71, %c0_72, %c0_73], %87 {strides = array<i32>} : memref<1x8x286xf32, #tpu.memory_space<vmem>>, vector<1x8x286xf32>,
    %c0_74 = arith.constant 0 : index
    %c0_75 = arith.constant 0 : index
    %88 = vector.load %arg8[%c0_74, %c0_75] : memref<1x286xf32, #tpu.memory_space<vmem>>, vector<1x286xf32>
    %89 = vector.broadcast %88 : vector<1x286xf32> to vector<8x286xf32>
    %90 = arith.mulf %84, %89 : vector<8x286xf32>
    %cst_76 = arith.constant dense<0.000000e+00> : vector<8xf32>
    %91 = vector.multi_reduction <add>, %90, %cst_76 [1] : vector<8x286xf32> to vector<8xf32>
    %92 = vector.shape_cast %91 : vector<8xf32> to vector<8x1xf32>
    %c0_77 = arith.constant 0 : index
    %c0_78 = arith.constant 0 : index
    %c0_79 = arith.constant 0 : index
    %93 = vector.load %arg10[%c0_77, %c0_78, %c0_79] : memref<1x8x1xf32, #tpu.memory_space<vmem>>, vector<1x8x1xf32>
    %94 = vector.shape_cast %93 : vector<1x8x1xf32> to vector<8x1xf32>
    %95 = vector.shape_cast %92 : vector<8x1xf32> to vector<1x8x1xf32>
    tpu.vector_store %arg10[%c0_77, %c0_78, %c0_79], %95 {strides = array<i32>} : memref<1x8x1xf32, #tpu.memory_space<vmem>>, vector<1x8x1xf32>,
    %96 = arith.mulf %90, %84 : vector<8x286xf32>
    %cst_80 = arith.constant dense<0.000000e+00> : vector<8xf32>
    %97 = vector.multi_reduction <add>, %96, %cst_80 [1] : vector<8x286xf32> to vector<8xf32>
    %98 = vector.shape_cast %97 : vector<8xf32> to vector<8x1xf32>
    %c0_81 = arith.constant 0 : index
    %c0_82 = arith.constant 0 : index
    %c0_83 = arith.constant 0 : index
    %99 = vector.load %arg11[%c0_81, %c0_82, %c0_83] : memref<1x8x1xf32, #tpu.memory_space<vmem>>, vector<1x8x1xf32>
    %100 = vector.shape_cast %99 : vector<1x8x1xf32> to vector<8x1xf32>
    %101 = vector.shape_cast %98 : vector<8x1xf32> to vector<1x8x1xf32>
    tpu.vector_store %arg11[%c0_81, %c0_82, %c0_83], %101 {strides = array<i32>} : memref<1x8x1xf32, #tpu.memory_space<vmem>>, vector<1x8x1xf32>,
    return
  }
  func.func @transform_0(%arg0: i32) -> (i32, i32, i32) {
    %c0_i32 = arith.constant 0 : i32
    %c0_i32_0 = arith.constant 0 : i32
    %c0_i32_1 = arith.constant 0 : i32
    return %arg0, %c0_i32, %c0_i32_0 : i32, i32, i32
  }
  func.func @transform_1(%arg0: i32) -> (i32, i32, i32) {
    %c0_i32 = arith.constant 0 : i32
    %c0_i32_0 = arith.constant 0 : i32
    %c0_i32_1 = arith.constant 0 : i32
    return %arg0, %c0_i32, %c0_i32_0 : i32, i32, i32
  }
  func.func @transform_2(%arg0: i32) -> (i32, i32, i32) {
    %c0_i32 = arith.constant 0 : i32
    %c0_i32_0 = arith.constant 0 : i32
    %c0_i32_1 = arith.constant 0 : i32
    %c0_i32_2 = arith.constant 0 : i32
    return %c0_i32, %c0_i32_0, %c0_i32_1 : i32, i32, i32
  }
  func.func @transform_3(%arg0: i32) -> (i32, i32) {
    %c0_i32 = arith.constant 0 : i32
    %c0_i32_0 = arith.constant 0 : i32
    %c0_i32_1 = arith.constant 0 : i32
    return %c0_i32, %c0_i32_0 : i32, i32
  }
  func.func @transform_4(%arg0: i32) -> (i32, i32, i32) {
    %c0_i32 = arith.constant 0 : i32
    %c0_i32_0 = arith.constant 0 : i32
    %c0_i32_1 = arith.constant 0 : i32
    %c0_i32_2 = arith.constant 0 : i32
    return %c0_i32, %c0_i32_0, %c0_i32_1 : i32, i32, i32
  }
  func.func @transform_5(%arg0: i32) -> (i32, i32) {
    %c0_i32 = arith.constant 0 : i32
    %c0_i32_0 = arith.constant 0 : i32
    %c0_i32_1 = arith.constant 0 : i32
    return %c0_i32, %c0_i32_0 : i32, i32
  }
  func.func @transform_6(%arg0: i32) -> (i32, i32, i32) {
    %c0_i32 = arith.constant 0 : i32
    %c0_i32_0 = arith.constant 0 : i32
    %c0_i32_1 = arith.constant 0 : i32
    %c0_i32_2 = arith.constant 0 : i32
    return %c0_i32, %c0_i32_0, %c0_i32_1 : i32, i32, i32
  }
  func.func @transform_7(%arg0: i32) -> (i32, i32) {
    %c0_i32 = arith.constant 0 : i32
    %c0_i32_0 = arith.constant 0 : i32
    %c0_i32_1 = arith.constant 0 : i32
    return %c0_i32, %c0_i32_0 : i32, i32
  }
  func.func @transform_8(%arg0: i32) -> (i32, i32, i32) {
    %c0_i32 = arith.constant 0 : i32
    %c0_i32_0 = arith.constant 0 : i32
    %c0_i32_1 = arith.constant 0 : i32
    return %arg0, %c0_i32, %c0_i32_0 : i32, i32, i32
  }
  func.func @transform_9(%arg0: i32) -> (i32, i32, i32) {
    %c0_i32 = arith.constant 0 : i32
    %c0_i32_0 = arith.constant 0 : i32
    %c0_i32_1 = arith.constant 0 : i32
    return %arg0, %c0_i32, %c0_i32_0 : i32, i32, i32
  }
  func.func @transform_10(%arg0: i32) -> (i32, i32, i32) {
    %c0_i32 = arith.constant 0 : i32
    %c0_i32_0 = arith.constant 0 : i32
    %c0_i32_1 = arith.constant 0 : i32
    return %arg0, %c0_i32, %c0_i32_0 : i32, i32, i32
  }
}

module attributes {stable_mosaic.version = 11 : i64} {
  func.func @_bn_lrelu_out_kernel(%arg0: i32, %arg1: memref<1x8x286xf32, #tpu.memory_space<vmem>>, %arg2: memref<8x1xf32, #tpu.memory_space<vmem>>, %arg3: memref<8x1xf32, #tpu.memory_space<vmem>>, %arg4: memref<286x256xf32, #tpu.memory_space<vmem>>, %arg5: memref<1x8x256xf32, #tpu.memory_space<vmem>>) attributes {dimension_semantics = [#tpu.dimension_semantics<parallel>], iteration_bounds = array<i64: 2>, scalar_prefetch = 0 : i64, scratch_operands = 0 : i64, tpu.core_type = #tpu.core_type<tc>, window_params = [{transform_indices = @transform_0, window_bounds = array<i64: 1, 8, 286>}, {pipeline_mode = #tpu.pipeline_mode<synchronous>, transform_indices = @transform_1, window_bounds = array<i64: 8, 1>}, {pipeline_mode = #tpu.pipeline_mode<synchronous>, transform_indices = @transform_2, window_bounds = array<i64: 8, 1>}, {pipeline_mode = #tpu.pipeline_mode<synchronous>, transform_indices = @transform_3, window_bounds = array<i64: 286, 256>}, {transform_indices = @transform_4, window_bounds = array<i64: 1, 8, 256>}]} {
    %c0 = arith.constant 0 : index
    %c0_0 = arith.constant 0 : index
    %c0_1 = arith.constant 0 : index
    %0 = vector.load %arg1[%c0, %c0_0, %c0_1] : memref<1x8x286xf32, #tpu.memory_space<vmem>>, vector<1x8x286xf32>
    %1 = vector.shape_cast %0 : vector<1x8x286xf32> to vector<8x286xf32>
    %c0_2 = arith.constant 0 : index
    %c0_3 = arith.constant 0 : index
    %2 = vector.load %arg2[%c0_2, %c0_3] : memref<8x1xf32, #tpu.memory_space<vmem>>, vector<8x1xf32>
    %3 = vector.broadcast %2 : vector<8x1xf32> to vector<8x286xf32>
    %4 = arith.mulf %1, %3 : vector<8x286xf32>
    %c0_4 = arith.constant 0 : index
    %c0_5 = arith.constant 0 : index
    %5 = vector.load %arg3[%c0_4, %c0_5] : memref<8x1xf32, #tpu.memory_space<vmem>>, vector<8x1xf32>
    %6 = vector.broadcast %5 : vector<8x1xf32> to vector<8x286xf32>
    %7 = arith.addf %4, %6 : vector<8x286xf32>
    %cst = arith.constant 0.00999999977 : f32
    %8 = vector.broadcast %cst : f32 to vector<8x286xf32>
    %9 = arith.mulf %8, %7 : vector<8x286xf32>
    %10 = arith.maximumf %7, %9 : vector<8x286xf32>
    %c0_6 = arith.constant 0 : index
    %c0_7 = arith.constant 0 : index
    %11 = vector.load %arg4[%c0_6, %c0_7] : memref<286x256xf32, #tpu.memory_space<vmem>>, vector<286x256xf32>
    %cst_8 = arith.constant dense<0.000000e+00> : vector<8x256xf32>
    %12 = tpu.matmul %10, %11, %cst_8 {dimension_numbers = #tpu.dot_dimension_numbers<[1], [0], [0], [1], [0, 0, 1, 1], [], []>} : vector<8x286xf32>, vector<286x256xf32>, vector<8x256xf32> -> vector<8x256xf32>
    %c0_9 = arith.constant 0 : index
    %c0_10 = arith.constant 0 : index
    %c0_11 = arith.constant 0 : index
    %13 = vector.load %arg5[%c0_9, %c0_10, %c0_11] : memref<1x8x256xf32, #tpu.memory_space<vmem>>, vector<1x8x256xf32>
    %14 = vector.shape_cast %13 : vector<1x8x256xf32> to vector<8x256xf32>
    %15 = vector.shape_cast %12 : vector<8x256xf32> to vector<1x8x256xf32>
    tpu.vector_store %arg5[%c0_9, %c0_10, %c0_11], %15 {strides = array<i32>} : memref<1x8x256xf32, #tpu.memory_space<vmem>>, vector<1x8x256xf32>,
    return
  }
  func.func @transform_0(%arg0: i32) -> (i32, i32, i32) {
    %c0_i32 = arith.constant 0 : i32
    %c0_i32_0 = arith.constant 0 : i32
    %c0_i32_1 = arith.constant 0 : i32
    return %arg0, %c0_i32, %c0_i32_0 : i32, i32, i32
  }
  func.func @transform_1(%arg0: i32) -> (i32, i32) {
    %c0_i32 = arith.constant 0 : i32
    %c0_i32_0 = arith.constant 0 : i32
    %c0_i32_1 = arith.constant 0 : i32
    return %c0_i32, %c0_i32_0 : i32, i32
  }
  func.func @transform_2(%arg0: i32) -> (i32, i32) {
    %c0_i32 = arith.constant 0 : i32
    %c0_i32_0 = arith.constant 0 : i32
    %c0_i32_1 = arith.constant 0 : i32
    return %c0_i32, %c0_i32_0 : i32, i32
  }
  func.func @transform_3(%arg0: i32) -> (i32, i32) {
    %c0_i32 = arith.constant 0 : i32
    %c0_i32_0 = arith.constant 0 : i32
    %c0_i32_1 = arith.constant 0 : i32
    return %c0_i32, %c0_i32_0 : i32, i32
  }
  func.func @transform_4(%arg0: i32) -> (i32, i32, i32) {
    %c0_i32 = arith.constant 0 : i32
    %c0_i32_0 = arith.constant 0 : i32
    %c0_i32_1 = arith.constant 0 : i32
    return %arg0, %c0_i32, %c0_i32_0 : i32, i32, i32
  }
}

module attributes {stable_mosaic.version = 11 : i64} {
  func.func @_bn_lrelu_conv_kernel(%arg0: i32, %arg1: memref<1x8x286xf32, #tpu.memory_space<vmem>>, %arg2: memref<8x1xf32, #tpu.memory_space<vmem>>, %arg3: memref<8x1xf32, #tpu.memory_space<vmem>>, %arg4: memref<286x324xf32, #tpu.memory_space<vmem>>, %arg5: memref<9x8x8xf32, #tpu.memory_space<vmem>>, %arg6: memref<1x286xf32, #tpu.memory_space<vmem>>, %arg7: memref<1x8x286xf32, #tpu.memory_space<vmem>>, %arg8: memref<1x8x1xf32, #tpu.memory_space<vmem>>, %arg9: memref<1x8x1xf32, #tpu.memory_space<vmem>>) attributes {dimension_semantics = [#tpu.dimension_semantics<parallel>], iteration_bounds = array<i64: 2>, scalar_prefetch = 0 : i64, scratch_operands = 0 : i64, tpu.core_type = #tpu.core_type<tc>, window_params = [{transform_indices = @transform_0, window_bounds = array<i64: 1, 8, 286>}, {pipeline_mode = #tpu.pipeline_mode<synchronous>, transform_indices = @transform_1, window_bounds = array<i64: 8, 1>}, {pipeline_mode = #tpu.pipeline_mode<synchronous>, transform_indices = @transform_2, window_bounds = array<i64: 8, 1>}, {pipeline_mode = #tpu.pipeline_mode<synchronous>, transform_indices = @transform_3, window_bounds = array<i64: 286, 324>}, {pipeline_mode = #tpu.pipeline_mode<synchronous>, transform_indices = @transform_4, window_bounds = array<i64: 9, 8, 8>}, {pipeline_mode = #tpu.pipeline_mode<synchronous>, transform_indices = @transform_5, window_bounds = array<i64: 1, 286>}, {transform_indices = @transform_6, window_bounds = array<i64: 1, 8, 286>}, {transform_indices = @transform_7, window_bounds = array<i64: 1, 8, 1>}, {transform_indices = @transform_8, window_bounds = array<i64: 1, 8, 1>}]} {
    %c0 = arith.constant 0 : index
    %c0_0 = arith.constant 0 : index
    %c0_1 = arith.constant 0 : index
    %0 = vector.load %arg1[%c0, %c0_0, %c0_1] : memref<1x8x286xf32, #tpu.memory_space<vmem>>, vector<1x8x286xf32>
    %1 = vector.shape_cast %0 : vector<1x8x286xf32> to vector<8x286xf32>
    %c0_2 = arith.constant 0 : index
    %c0_3 = arith.constant 0 : index
    %2 = vector.load %arg2[%c0_2, %c0_3] : memref<8x1xf32, #tpu.memory_space<vmem>>, vector<8x1xf32>
    %3 = vector.broadcast %2 : vector<8x1xf32> to vector<8x286xf32>
    %4 = arith.mulf %1, %3 : vector<8x286xf32>
    %c0_4 = arith.constant 0 : index
    %c0_5 = arith.constant 0 : index
    %5 = vector.load %arg3[%c0_4, %c0_5] : memref<8x1xf32, #tpu.memory_space<vmem>>, vector<8x1xf32>
    %6 = vector.broadcast %5 : vector<8x1xf32> to vector<8x286xf32>
    %7 = arith.addf %4, %6 : vector<8x286xf32>
    %cst = arith.constant 0.00999999977 : f32
    %8 = vector.broadcast %cst : f32 to vector<8x286xf32>
    %9 = arith.mulf %8, %7 : vector<8x286xf32>
    %10 = arith.maximumf %7, %9 : vector<8x286xf32>
    %c0_6 = arith.constant 0 : index
    %c0_7 = arith.constant 0 : index
    %11 = vector.load %arg4[%c0_6, %c0_7] : memref<286x324xf32, #tpu.memory_space<vmem>>, vector<286x324xf32>
    %cst_8 = arith.constant dense<0.000000e+00> : vector<8x324xf32>
    %12 = tpu.matmul %10, %11, %cst_8 {dimension_numbers = #tpu.dot_dimension_numbers<[1], [0], [0], [1], [0, 0, 1, 1], [], []>} : vector<8x286xf32>, vector<286x324xf32>, vector<8x324xf32> -> vector<8x324xf32>
    %cst_9 = arith.constant 0.000000e+00 : f32
    %13 = vector.broadcast %cst_9 : f32 to vector<8x286xf32>
    %c0_10 = arith.constant 0 : index
    %c0_11 = arith.constant 0 : index
    %c0_12 = arith.constant 0 : index
    %14 = vector.load %arg5[%c0_10, %c0_11, %c0_12] : memref<9x8x8xf32, #tpu.memory_space<vmem>>, vector<1x8x8xf32>
    %15 = vector.shape_cast %14 : vector<1x8x8xf32> to vector<8x8xf32>
    %16 = vector.extract_strided_slice %12 {offsets = [0, 0], sizes = [8, 286], strides = [1, 1]} : vector<8x324xf32> to vector<8x286xf32>
    %cst_13 = arith.constant dense<0.000000e+00> : vector<8x286xf32>
    %17 = tpu.matmul %15, %16, %cst_13 {dimension_numbers = #tpu.dot_dimension_numbers<[1], [0], [0], [1], [0, 0, 1, 1], [], []>} : vector<8x8xf32>, vector<8x286xf32>, vector<8x286xf32> -> vector<8x286xf32>
    %18 = arith.addf %13, %17 : vector<8x286xf32>
    %c1 = arith.constant 1 : index
    %c0_14 = arith.constant 0 : index
    %c0_15 = arith.constant 0 : index
    %19 = vector.load %arg5[%c1, %c0_14, %c0_15] : memref<9x8x8xf32, #tpu.memory_space<vmem>>, vector<1x8x8xf32>
    %20 = vector.shape_cast %19 : vector<1x8x8xf32> to vector<8x8xf32>
    %21 = vector.extract_strided_slice %12 {offsets = [0, 1], sizes = [8, 286], strides = [1, 1]} : vector<8x324xf32> to vector<8x286xf32>
    %cst_16 = arith.constant dense<0.000000e+00> : vector<8x286xf32>
    %22 = tpu.matmul %20, %21, %cst_16 {dimension_numbers = #tpu.dot_dimension_numbers<[1], [0], [0], [1], [0, 0, 1, 1], [], []>} : vector<8x8xf32>, vector<8x286xf32>, vector<8x286xf32> -> vector<8x286xf32>
    %23 = arith.addf %18, %22 : vector<8x286xf32>
    %c2 = arith.constant 2 : index
    %c0_17 = arith.constant 0 : index
    %c0_18 = arith.constant 0 : index
    %24 = vector.load %arg5[%c2, %c0_17, %c0_18] : memref<9x8x8xf32, #tpu.memory_space<vmem>>, vector<1x8x8xf32>
    %25 = vector.shape_cast %24 : vector<1x8x8xf32> to vector<8x8xf32>
    %26 = vector.extract_strided_slice %12 {offsets = [0, 2], sizes = [8, 286], strides = [1, 1]} : vector<8x324xf32> to vector<8x286xf32>
    %cst_19 = arith.constant dense<0.000000e+00> : vector<8x286xf32>
    %27 = tpu.matmul %25, %26, %cst_19 {dimension_numbers = #tpu.dot_dimension_numbers<[1], [0], [0], [1], [0, 0, 1, 1], [], []>} : vector<8x8xf32>, vector<8x286xf32>, vector<8x286xf32> -> vector<8x286xf32>
    %28 = arith.addf %23, %27 : vector<8x286xf32>
    %c3 = arith.constant 3 : index
    %c0_20 = arith.constant 0 : index
    %c0_21 = arith.constant 0 : index
    %29 = vector.load %arg5[%c3, %c0_20, %c0_21] : memref<9x8x8xf32, #tpu.memory_space<vmem>>, vector<1x8x8xf32>
    %30 = vector.shape_cast %29 : vector<1x8x8xf32> to vector<8x8xf32>
    %31 = vector.extract_strided_slice %12 {offsets = [0, 18], sizes = [8, 286], strides = [1, 1]} : vector<8x324xf32> to vector<8x286xf32>
    %cst_22 = arith.constant dense<0.000000e+00> : vector<8x286xf32>
    %32 = tpu.matmul %30, %31, %cst_22 {dimension_numbers = #tpu.dot_dimension_numbers<[1], [0], [0], [1], [0, 0, 1, 1], [], []>} : vector<8x8xf32>, vector<8x286xf32>, vector<8x286xf32> -> vector<8x286xf32>
    %33 = arith.addf %28, %32 : vector<8x286xf32>
    %c4 = arith.constant 4 : index
    %c0_23 = arith.constant 0 : index
    %c0_24 = arith.constant 0 : index
    %34 = vector.load %arg5[%c4, %c0_23, %c0_24] : memref<9x8x8xf32, #tpu.memory_space<vmem>>, vector<1x8x8xf32>
    %35 = vector.shape_cast %34 : vector<1x8x8xf32> to vector<8x8xf32>
    %36 = vector.extract_strided_slice %12 {offsets = [0, 19], sizes = [8, 286], strides = [1, 1]} : vector<8x324xf32> to vector<8x286xf32>
    %cst_25 = arith.constant dense<0.000000e+00> : vector<8x286xf32>
    %37 = tpu.matmul %35, %36, %cst_25 {dimension_numbers = #tpu.dot_dimension_numbers<[1], [0], [0], [1], [0, 0, 1, 1], [], []>} : vector<8x8xf32>, vector<8x286xf32>, vector<8x286xf32> -> vector<8x286xf32>
    %38 = arith.addf %33, %37 : vector<8x286xf32>
    %c5 = arith.constant 5 : index
    %c0_26 = arith.constant 0 : index
    %c0_27 = arith.constant 0 : index
    %39 = vector.load %arg5[%c5, %c0_26, %c0_27] : memref<9x8x8xf32, #tpu.memory_space<vmem>>, vector<1x8x8xf32>
    %40 = vector.shape_cast %39 : vector<1x8x8xf32> to vector<8x8xf32>
    %41 = vector.extract_strided_slice %12 {offsets = [0, 20], sizes = [8, 286], strides = [1, 1]} : vector<8x324xf32> to vector<8x286xf32>
    %cst_28 = arith.constant dense<0.000000e+00> : vector<8x286xf32>
    %42 = tpu.matmul %40, %41, %cst_28 {dimension_numbers = #tpu.dot_dimension_numbers<[1], [0], [0], [1], [0, 0, 1, 1], [], []>} : vector<8x8xf32>, vector<8x286xf32>, vector<8x286xf32> -> vector<8x286xf32>
    %43 = arith.addf %38, %42 : vector<8x286xf32>
    %c6 = arith.constant 6 : index
    %c0_29 = arith.constant 0 : index
    %c0_30 = arith.constant 0 : index
    %44 = vector.load %arg5[%c6, %c0_29, %c0_30] : memref<9x8x8xf32, #tpu.memory_space<vmem>>, vector<1x8x8xf32>
    %45 = vector.shape_cast %44 : vector<1x8x8xf32> to vector<8x8xf32>
    %46 = vector.extract_strided_slice %12 {offsets = [0, 36], sizes = [8, 286], strides = [1, 1]} : vector<8x324xf32> to vector<8x286xf32>
    %cst_31 = arith.constant dense<0.000000e+00> : vector<8x286xf32>
    %47 = tpu.matmul %45, %46, %cst_31 {dimension_numbers = #tpu.dot_dimension_numbers<[1], [0], [0], [1], [0, 0, 1, 1], [], []>} : vector<8x8xf32>, vector<8x286xf32>, vector<8x286xf32> -> vector<8x286xf32>
    %48 = arith.addf %43, %47 : vector<8x286xf32>
    %c7 = arith.constant 7 : index
    %c0_32 = arith.constant 0 : index
    %c0_33 = arith.constant 0 : index
    %49 = vector.load %arg5[%c7, %c0_32, %c0_33] : memref<9x8x8xf32, #tpu.memory_space<vmem>>, vector<1x8x8xf32>
    %50 = vector.shape_cast %49 : vector<1x8x8xf32> to vector<8x8xf32>
    %51 = vector.extract_strided_slice %12 {offsets = [0, 37], sizes = [8, 286], strides = [1, 1]} : vector<8x324xf32> to vector<8x286xf32>
    %cst_34 = arith.constant dense<0.000000e+00> : vector<8x286xf32>
    %52 = tpu.matmul %50, %51, %cst_34 {dimension_numbers = #tpu.dot_dimension_numbers<[1], [0], [0], [1], [0, 0, 1, 1], [], []>} : vector<8x8xf32>, vector<8x286xf32>, vector<8x286xf32> -> vector<8x286xf32>
    %53 = arith.addf %48, %52 : vector<8x286xf32>
    %c8 = arith.constant 8 : index
    %c0_35 = arith.constant 0 : index
    %c0_36 = arith.constant 0 : index
    %54 = vector.load %arg5[%c8, %c0_35, %c0_36] : memref<9x8x8xf32, #tpu.memory_space<vmem>>, vector<1x8x8xf32>
    %55 = vector.shape_cast %54 : vector<1x8x8xf32> to vector<8x8xf32>
    %56 = vector.extract_strided_slice %12 {offsets = [0, 38], sizes = [8, 286], strides = [1, 1]} : vector<8x324xf32> to vector<8x286xf32>
    %cst_37 = arith.constant dense<0.000000e+00> : vector<8x286xf32>
    %57 = tpu.matmul %55, %56, %cst_37 {dimension_numbers = #tpu.dot_dimension_numbers<[1], [0], [0], [1], [0, 0, 1, 1], [], []>} : vector<8x8xf32>, vector<8x286xf32>, vector<8x286xf32> -> vector<8x286xf32>
    %58 = arith.addf %53, %57 : vector<8x286xf32>
    %c0_38 = arith.constant 0 : index
    %c0_39 = arith.constant 0 : index
    %c0_40 = arith.constant 0 : index
    %59 = vector.load %arg7[%c0_38, %c0_39, %c0_40] : memref<1x8x286xf32, #tpu.memory_space<vmem>>, vector<1x8x286xf32>
    %60 = vector.shape_cast %59 : vector<1x8x286xf32> to vector<8x286xf32>
    %61 = vector.shape_cast %58 : vector<8x286xf32> to vector<1x8x286xf32>
    tpu.vector_store %arg7[%c0_38, %c0_39, %c0_40], %61 {strides = array<i32>} : memref<1x8x286xf32, #tpu.memory_space<vmem>>, vector<1x8x286xf32>,
    %c0_41 = arith.constant 0 : index
    %c0_42 = arith.constant 0 : index
    %62 = vector.load %arg6[%c0_41, %c0_42] : memref<1x286xf32, #tpu.memory_space<vmem>>, vector<1x286xf32>
    %63 = vector.broadcast %62 : vector<1x286xf32> to vector<8x286xf32>
    %64 = arith.mulf %58, %63 : vector<8x286xf32>
    %cst_43 = arith.constant dense<0.000000e+00> : vector<8xf32>
    %65 = vector.multi_reduction <add>, %64, %cst_43 [1] : vector<8x286xf32> to vector<8xf32>
    %66 = vector.shape_cast %65 : vector<8xf32> to vector<8x1xf32>
    %c0_44 = arith.constant 0 : index
    %c0_45 = arith.constant 0 : index
    %c0_46 = arith.constant 0 : index
    %67 = vector.load %arg8[%c0_44, %c0_45, %c0_46] : memref<1x8x1xf32, #tpu.memory_space<vmem>>, vector<1x8x1xf32>
    %68 = vector.shape_cast %67 : vector<1x8x1xf32> to vector<8x1xf32>
    %69 = vector.shape_cast %66 : vector<8x1xf32> to vector<1x8x1xf32>
    tpu.vector_store %arg8[%c0_44, %c0_45, %c0_46], %69 {strides = array<i32>} : memref<1x8x1xf32, #tpu.memory_space<vmem>>, vector<1x8x1xf32>,
    %70 = arith.mulf %64, %58 : vector<8x286xf32>
    %cst_47 = arith.constant dense<0.000000e+00> : vector<8xf32>
    %71 = vector.multi_reduction <add>, %70, %cst_47 [1] : vector<8x286xf32> to vector<8xf32>
    %72 = vector.shape_cast %71 : vector<8xf32> to vector<8x1xf32>
    %c0_48 = arith.constant 0 : index
    %c0_49 = arith.constant 0 : index
    %c0_50 = arith.constant 0 : index
    %73 = vector.load %arg9[%c0_48, %c0_49, %c0_50] : memref<1x8x1xf32, #tpu.memory_space<vmem>>, vector<1x8x1xf32>
    %74 = vector.shape_cast %73 : vector<1x8x1xf32> to vector<8x1xf32>
    %75 = vector.shape_cast %72 : vector<8x1xf32> to vector<1x8x1xf32>
    tpu.vector_store %arg9[%c0_48, %c0_49, %c0_50], %75 {strides = array<i32>} : memref<1x8x1xf32, #tpu.memory_space<vmem>>, vector<1x8x1xf32>,
    return
  }
  func.func @transform_0(%arg0: i32) -> (i32, i32, i32) {
    %c0_i32 = arith.constant 0 : i32
    %c0_i32_0 = arith.constant 0 : i32
    %c0_i32_1 = arith.constant 0 : i32
    return %arg0, %c0_i32, %c0_i32_0 : i32, i32, i32
  }
  func.func @transform_1(%arg0: i32) -> (i32, i32) {
    %c0_i32 = arith.constant 0 : i32
    %c0_i32_0 = arith.constant 0 : i32
    %c0_i32_1 = arith.constant 0 : i32
    return %c0_i32, %c0_i32_0 : i32, i32
  }
  func.func @transform_2(%arg0: i32) -> (i32, i32) {
    %c0_i32 = arith.constant 0 : i32
    %c0_i32_0 = arith.constant 0 : i32
    %c0_i32_1 = arith.constant 0 : i32
    return %c0_i32, %c0_i32_0 : i32, i32
  }
  func.func @transform_3(%arg0: i32) -> (i32, i32) {
    %c0_i32 = arith.constant 0 : i32
    %c0_i32_0 = arith.constant 0 : i32
    %c0_i32_1 = arith.constant 0 : i32
    return %c0_i32, %c0_i32_0 : i32, i32
  }
  func.func @transform_4(%arg0: i32) -> (i32, i32, i32) {
    %c0_i32 = arith.constant 0 : i32
    %c0_i32_0 = arith.constant 0 : i32
    %c0_i32_1 = arith.constant 0 : i32
    %c0_i32_2 = arith.constant 0 : i32
    return %c0_i32, %c0_i32_0, %c0_i32_1 : i32, i32, i32
  }
  func.func @transform_5(%arg0: i32) -> (i32, i32) {
    %c0_i32 = arith.constant 0 : i32
    %c0_i32_0 = arith.constant 0 : i32
    %c0_i32_1 = arith.constant 0 : i32
    return %c0_i32, %c0_i32_0 : i32, i32
  }
  func.func @transform_6(%arg0: i32) -> (i32, i32, i32) {
    %c0_i32 = arith.constant 0 : i32
    %c0_i32_0 = arith.constant 0 : i32
    %c0_i32_1 = arith.constant 0 : i32
    return %arg0, %c0_i32, %c0_i32_0 : i32, i32, i32
  }
  func.func @transform_7(%arg0: i32) -> (i32, i32, i32) {
    %c0_i32 = arith.constant 0 : i32
    %c0_i32_0 = arith.constant 0 : i32
    %c0_i32_1 = arith.constant 0 : i32
    return %arg0, %c0_i32, %c0_i32_0 : i32, i32, i32
  }
  func.func @transform_8(%arg0: i32) -> (i32, i32, i32) {
    %c0_i32 = arith.constant 0 : i32
    %c0_i32_0 = arith.constant 0 : i32
    %c0_i32_1 = arith.constant 0 : i32
    return %arg0, %c0_i32, %c0_i32_0 : i32, i32, i32
  }
}

</mosaic_0001>

<bundles_post_ra>
// kernel: expansion_forward.5
= control target key start
LH: loop header
LB: loop body
LE: loop exit
PB: predicated region body
PF: predicated region fallthrough
CT: control target
= control target key end

     0   :  { %s646_s15 = smov 0   ;;  %s898_s0 = inlined_call_operand.vmem [shape: f32[2,8,286], index: 0, kind: input, shape index: {}]   ;;  %s899_s1 = inlined_call_operand.vmem [shape: f32[8,1], index: 1, kind: input, shape index: {}]   ;;  %s900_s2 = inlined_call_operand.vmem [shape: f32[8,1], index: 2, kind: input, shape index: {}]   ;;  %s901_s3 = inlined_call_operand.vmem [shape: f32[286,256], index: 3, kind: input, shape index: {}]   ;;  %s902_s4 = inlined_call_operand.vmem [shape: f32[2,8,256], index: 4, kind: output, shape index: {}]  }
   0x1 LB: > { %s507_s16 = sadd.s32 4294967295, %s616_s15   ;;  %p511_p0 = scmp.ge.s32.totalorder %s616_s15, 1  ;;  %s616_s15 = sphi %s646_s15, %s14_s15  }
   0x2   : > { %p162_p1 = scmp.lt.s32.totalorder %s616_s15, 3 }
   0x4   : > { %p163_p2 = pnand %p511_p0, %p162_p1 }
   0x5   : > { %v201_v0 = vld [vmem:[%s899_s1] sm:$0xff] (!%p163_p2)  ;;  %v226_v1 = vld [vmem:[%s901_s3 + $0x8] sm:$0xff] (!%p163_p2)  ;;  %v618_v2 = vmov (!%p163_p2), 0   ;;  %v228_v4 = vld [vmem:[%s901_s3 + $0x18] sm:$0xff] (!%p163_p2)  ;;  %v619_v28 = vmov (!%p163_p2), 0.0   ;;  %vm301_vm0 = vcmask (!%p163_p2), 1045504  }
   0x6   : > { %166 = sbr.rel (%p163_p2) target bundleno = 362 (0x16a), region = 36  ;;  %609 = vset.pattern.permute.xlu0 (!%p163_p2), %v618_v2  ;;  %v210_v3 = vld [vmem:[%s900_s2] sm:$0xff] (!%p163_p2)  ;;  %v227_v6 = vld [vmem:[%s901_s3 + $0x10] sm:$0xff] (!%p163_p2)  ;;  %v521_v7 = vpack.c.bf16 (!%p163_p2), %v228_v4, %v226_v1  ;;  %v230_v9 = vld [vmem:[%s901_s3 + $0x28] sm:$0xff] (!%p163_p2)  ;;  %443 = vmatprep.mubr.f32.mxu0 (!%p163_p2), %v619_v28  ;;  %vm620_vm1 = vmmov (!%p163_p2), 1   ;;  %p188_p3 = scmp.lt.s32.totalorder (!%p163_p2), %s507_s16, 1 }
   0x7   : > { %v225_v5 = vld [vmem:[%s901_s3] sm:$0xff] (!%p163_p2)  ;;  %204 = vperm.xlu0 (!%p163_p2), %609, %v201_v0   ;;  %v232_v10 = vld [vmem:[%s901_s3 + $0x38] sm:$0xff] (!%p163_p2)  ;;  %v231_v13 = vld [vmem:[%s901_s3 + $0x30] sm:$0xff] (!%p163_p2)  ;;  %vm297_vm3 = vcmask (!%p163_p2), 244736  }
   0x8   : > { %v523_v8 = vpack.c.bf16 (!%p163_p2), %v227_v6, %v225_v5  ;;  %v229_v11 = vld [vmem:[%s901_s3 + $0x20] sm:$0xff] (!%p163_p2)  ;;  %v525_v12 = vpack.c.bf16 (!%p163_p2), %v232_v10, %v230_v9  ;;  %v234_v14 = vld [vmem:[%s901_s3 + $0x48] sm:$0xff] (!%p163_p2)  ;;  %v236_v15 = vld [vmem:[%s901_s3 + $0x58] sm:$0xff] (!%p163_p2)  ;;  %522 = vmatprep.subr.bf16.mxu1 (!%p163_p2), %v521_v7 }
   0x9   : > { %v527_v16 = vpack.c.bf16 (!%p163_p2), %v231_v13, %v229_v11  ;;  %v529_v17 = vpack.c.bf16 (!%p163_p2), %v236_v15, %v234_v14  ;;  %v233_v18 = vld [vmem:[%s901_s3 + $0x40] sm:$0xff] (!%p163_p2)  ;;  %v235_v19 = vld [vmem:[%s901_s3 + $0x50] sm:$0xff] (!%p163_p2)  ;;  %v238_v20 = vld [vmem:[%s901_s3 + $0x68] sm:$0xff] (!%p163_p2) }
   0xa   : > { %524 = vmatpush1.bf16.msra.mxu1 (!%p163_p2), %v523_v8  ;;  %v240_v21 = vld [vmem:[%s901_s3 + $0x78] sm:$0xff] (!%p163_p2)  ;;  %v531_v22 = vpack.c.bf16 (!%p163_p2), %v235_v19, %v233_v18  ;;  %v237_v24 = vld [vmem:[%s901_s3 + $0x60] sm:$0xff] (!%p163_p2)  ;;  %v239_v25 = vld [vmem:[%s901_s3 + $0x70] sm:$0xff] (!%p163_p2) }
   0xb   : > { %213 = vperm.xlu0 (!%p163_p2), %609, %v210_v3   ;;  %526 = vmatprep.subr.bf16.mxu1 (!%p163_p2), %v525_v12  ;;  %v533_v23 = vpack.c.bf16 (!%p163_p2), %v240_v21, %v238_v20  ;;  %v242_v26 = vld [vmem:[%s901_s3 + $0x88] sm:$0xff] (!%p163_p2)  ;;  %v244_v27 = vld [vmem:[%s901_s3 + $0x98] sm:$0xff] (!%p163_p2)  ;;  %v535_v29 = vpack.c.bf16 (!%p163_p2), %v239_v25, %v237_v24  ;;  %v241_v31 = vld [vmem:[%s901_s3 + $0x80] sm:$0xff] (!%p163_p2) }
   0xc   : > { %v537_v30 = vpack.c.bf16 (!%p163_p2), %v244_v27, %v242_v26  ;;  %v243_v32 = vld [vmem:[%s901_s3 + $0x90] sm:$0xff] (!%p163_p2)  ;;  %v246_v33 = vld [vmem:[%s901_s3 + $0xa8] sm:$0xff] (!%p163_p2)  ;;  %v248_v34 = vld [vmem:[%s901_s3 + $0xb8] sm:$0xff] (!%p163_p2) }
   0xd   : > { %v539_v35 = vpack.c.bf16 %v243_v32, %v241_v31  ;;  %v541_v36 = vpack.c.bf16 %v248_v34, %v246_v33  ;;  %v245_v37 = vld [vmem:[%s901_s3 + $0xa0] sm:$0xff]  ;;  %v247_v38 = vld [vmem:[%s901_s3 + $0xb0] sm:$0xff]  ;;  %v250_v39 = vld [vmem:[%s901_s3 + $0xc8] sm:$0xff]  ;;  %s906_s16 = smov (!%p188_p3, %s507_s16), 1 }
   0xe   : > { %528 = vmatpush1.bf16.msra.mxu1 %v527_v16  ;;  %v252_v40 = vld [vmem:[%s901_s3 + $0xd8] sm:$0xff]  ;;  %v290_v41 = vld [vmem:[%s901_s3 + $0x208] sm:$0xff]  ;;  %v543_v43 = vpack.c.bf16 %v247_v38, %v245_v37  ;;  %v249_v44 = vld [vmem:[%s901_s3 + $0xc0] sm:$0xff]  ;;  %s597_s21 = smul.u32 24, %s906_s16  ;;  %s520_s25 = sshll.u32 %s906_s16, 4 }
   0xf   : > { %530 = vmatprep.subr.bf16.mxu1 %v529_v17  ;;  %v292_v42 = vld [vmem:[%s901_s3 + $0x218] sm:$0xff]  ;;  %v251_v45 = vld [vmem:[%s901_s3 + $0xd0] sm:$0xff]  ;;  %v289_v47 = vld [vmem:[%s901_s3 + $0x200] sm:$0xff]  ;;  %v545_v48 = vpack.c.bf16 %v252_v40, %v250_v39  ;;  %s197_s28 = scalar_lea.vmem %s902_s4, %s520_s25 }
  0x10   : > { %v585_v46 = vpack.c.bf16 %v292_v42, %v290_v41  ;;  %v254_v49 = vld [vmem:[%s901_s3 + $0xe8] sm:$0xff]  ;;  %v256_v50 = vld [vmem:[%s901_s3 + $0xf8] sm:$0xff]  ;;  %v291_v51 = vld [vmem:[%s901_s3 + $0x210] sm:$0xff]  ;;  %v547_v58 = vpack.c.bf16 %v251_v45, %v249_v44  ;;  %s192_s24 = scalar_lea.vmem %s898_s0, %s597_s21 }
  0x11   : > { %v587_v52 = vpack.c.bf16 %v291_v51, %v289_v47  ;;  %v294_v53 = vld [vmem:[%s901_s3 + $0x228] sm:$0xff]  ;;  %v296_v54 = vld [vmem:[%s901_s3 + $0x238] sm:$0x3f]  ;;  %vm769_vm2 = vmpackc.low %vm301_vm0, %vm620_vm1  ;;  %v549_v60 = vpack.c.bf16 %v256_v50, %v254_v49 }
  0x12   : > { %532 = vmatpush1.bf16.msra.mxu1 %v531_v22  ;;  %586 = vmatprep.subr.bf16.mxu0 %v585_v46  ;;  %v589_v56 = vpack.c.bf16 %v296_v54, %v294_v53  ;;  %v293_v57 = vld [vmem:[%s901_s3 + $0x220] sm:$0xff]  ;;  %v295_v59 = vld [vmem:[%s901_s3 + $0x230] sm:$0x3f]  ;;  %v258_v0 = vld [vmem:[%s901_s3 + $0x108] sm:$0xff] }
  0x13   : > { %534 = vmatprep.subr.bf16.mxu1 %v533_v23  ;;  %588 = vmatpush1.bf16.msra.mxu0 %v587_v52  ;;  %v253_v61 = vld [vmem:[%s901_s3 + $0xe0] sm:$0xff]  ;;  %v255_v62 = vld [vmem:[%s901_s3 + $0xf0] sm:$0xff]  ;;  %v592_v63 = vpack.c.bf16 %v295_v59, %v293_v57  ;;  %v260_v1 = vld [vmem:[%s901_s3 + $0x118] sm:$0xff] }
  0x14   : > { %591 = vmatprep.subr.msk.bf16.mxu0 %vm769_vm2, %v589_v56  ;;  %v551_v2 = vpack.c.bf16 %v255_v62, %v253_v61  ;;  %v553_v3 = vpack.c.bf16 %v260_v1, %v258_v0  ;;  %v257_v4 = vld [vmem:[%s901_s3 + $0x100] sm:$0xff]  ;;  %v259_v5 = vld [vmem:[%s901_s3 + $0x110] sm:$0xff]  ;;  %v262_v6 = vld [vmem:[%s901_s3 + $0x128] sm:$0xff] }
  0x15   : > { %v264_v7 = vld [vmem:[%s901_s3 + $0x138] sm:$0xff]  ;;  %v555_v8 = vpack.c.bf16 %v259_v5, %v257_v4  ;;  %v261_v10 = vld [vmem:[%s901_s3 + $0x120] sm:$0xff]  ;;  %v263_v11 = vld [vmem:[%s901_s3 + $0x130] sm:$0xff] }
  0x16   : > { %536 = vmatpush1.bf16.msra.mxu1 %v535_v29  ;;  %v557_v9 = vpack.c.bf16 %v264_v7, %v262_v6  ;;  %v266_v12 = vld [vmem:[%s901_s3 + $0x148] sm:$0xff]  ;;  %v268_v13 = vld [vmem:[%s901_s3 + $0x158] sm:$0xff]  ;;  %v559_v14 = vpack.c.bf16 %v263_v11, %v261_v10  ;;  %v265_v16 = vld [vmem:[%s901_s3 + $0x140] sm:$0xff] }
  0x17   : > { %538 = vmatprep.subr.bf16.mxu1 %v537_v30  ;;  %594 = vmatpush1.bf16.msk.msra.mxu0 %vm769_vm2, %v592_v63  ;;  %v561_v15 = vpack.c.bf16 %v268_v13, %v266_v12  ;;  %v267_v17 = vld [vmem:[%s901_s3 + $0x150] sm:$0xff]  ;;  %v270_v18 = vld [vmem:[%s901_s3 + $0x168] sm:$0xff]  ;;  %v272_v19 = vld [vmem:[%s901_s3 + $0x178] sm:$0xff] }
  0x18   : > { %v563_v20 = vpack.c.bf16 %v267_v17, %v265_v16  ;;  %v565_v21 = vpack.c.bf16 %v272_v19, %v270_v18  ;;  %v269_v22 = vld [vmem:[%s901_s3 + $0x160] sm:$0xff]  ;;  %v271_v23 = vld [vmem:[%s901_s3 + $0x170] sm:$0xff]  ;;  %v274_v24 = vld [vmem:[%s901_s3 + $0x188] sm:$0xff] }
  0x19   : > { %v276_v25 = vld [vmem:[%s901_s3 + $0x198] sm:$0xff]  ;;  %v567_v26 = vpack.c.bf16 %v271_v23, %v269_v22  ;;  %v273_v28 = vld [vmem:[%s901_s3 + $0x180] sm:$0xff]  ;;  %v275_v29 = vld [vmem:[%s901_s3 + $0x190] sm:$0xff] }
  0x1a   : > { %540 = vmatpush1.bf16.msra.mxu1 %v539_v35  ;;  %v569_v27 = vpack.c.bf16 %v276_v25, %v274_v24  ;;  %v278_v30 = vld [vmem:[%s901_s3 + $0x1a8] sm:$0xff]  ;;  %v280_v31 = vld [vmem:[%s901_s3 + $0x1b8] sm:$0xff]  ;;  %v571_v32 = vpack.c.bf16 %v275_v29, %v273_v28  ;;  %v277_v34 = vld [vmem:[%s901_s3 + $0x1a0] sm:$0xff] }
  0x1b   : > { %542 = vmatprep.subr.bf16.mxu1 %v541_v36  ;;  %v573_v33 = vpack.c.bf16 %v280_v31, %v278_v30  ;;  %v279_v35 = vld [vmem:[%s901_s3 + $0x1b0] sm:$0xff]  ;;  %v282_v36 = vld [vmem:[%s901_s3 + $0x1c8] sm:$0xff]  ;;  %v284_v37 = vld [vmem:[%s901_s3 + $0x1d8] sm:$0xff] }
  0x1c   : > { %v575_v38 = vpack.c.bf16 %v279_v35, %v277_v34  ;;  %v577_v39 = vpack.c.bf16 %v284_v37, %v282_v36  ;;  %v281_v40 = vld [vmem:[%s901_s3 + $0x1c0] sm:$0xff]  ;;  %v283_v41 = vld [vmem:[%s901_s3 + $0x1d0] sm:$0xff]  ;;  %v286_v42 = vld [vmem:[%s901_s3 + $0x1e8] sm:$0xff] }
  0x1d   : > { %v579_v44 = vpack.c.bf16 %v283_v41, %v281_v40  ;;  %v285_v46 = vld [vmem:[%s901_s3 + $0x1e0] sm:$0xff]  ;;  %v287_v47 = vld [vmem:[%s901_s3 + $0x1f0] sm:$0xff]  ;;  %v199_v51 = vld [vmem:[%s192_s24 + $0x8] sm:$0xff] }
  0x1e   : > { %544 = vmatpush1.bf16.msra.mxu1 %v543_v43  ;;  %v288_v43 = vld [vmem:[%s901_s3 + $0x1f8] sm:$0xff]  ;;  %v198_v50 = vld [vmem:[%s192_s24] sm:$0xff]  ;;  %v200_v52 = vld [vmem:[%s192_s24 + $0x10] sm:$0xff] }
  0x1f   : > { %546 = vmatprep.subr.bf16.mxu1 %v545_v48  ;;  %v581_v45 = vpack.c.bf16 %v288_v43, %v286_v42  ;;  %v583_v48 = vpack.c.bf16 %v287_v47, %v285_v46 }
  0x22   : > { %548 = vmatpush1.bf16.msra.mxu1 %v547_v58 }
  0x23   : > { %550 = vmatprep.subr.bf16.mxu1 %v549_v60 }
  0x26   : > { %552 = vmatpush1.bf16.msra.mxu1 %v551_v2 }
  0x27   : > { %554 = vmatprep.subr.bf16.mxu1 %v553_v3 }
  0x2a   : > { %556 = vmatpush1.bf16.msra.mxu1 %v555_v8 }
  0x2b   : > { %558 = vmatprep.subr.bf16.mxu1 %v557_v9 }
  0x2e   : > { %560 = vmatpush1.bf16.msra.mxu1 %v559_v14 }
  0x2f   : > { %562 = vmatprep.subr.bf16.mxu1 %v561_v15 }
  0x32   : > { %564 = vmatpush1.bf16.msra.mxu1 %v563_v20 }
  0x33   : > { %566 = vmatprep.subr.bf16.mxu1 %v565_v21 }
  0x36   : > { %568 = vmatpush1.bf16.msra.mxu1 %v567_v26 }
  0x37   : > { %570 = vmatprep.subr.bf16.mxu1 %v569_v27 }
  0x3a   : > { %572 = vmatpush1.bf16.msra.mxu1 %v571_v32 }
  0x3b   : > { %574 = vmatprep.subr.bf16.mxu1 %v573_v33 }
  0x3e   : > { %576 = vmatpush1.bf16.msra.mxu1 %v575_v38 }
  0x3f   : > { %578 = vmatprep.subr.bf16.mxu1 %v577_v39 }
  0x42   : > { %580 = vmatpush1.bf16.msra.mxu1 %v579_v44 }
  0x43   : > { %582 = vmatprep.subr.bf16.mxu1 %v581_v45 }
  0x46   : > { %584 = vmatpush1.bf16.msra.mxu1 %v583_v48 }
  0x86   : > { %v205_v49 = vpop.permute.xlu0 %204 }
  0x87   : > { %v207_v53 = vmul.f32 %v205_v49, %v198_v50  ;;  %v208_v54 = vmul.f32 %v205_v49, %v199_v51  ;;  %v209_v55 = vmul.f32 %v205_v49, %v200_v52 }
  0x8a   : > { %v214_v56 = vpop.permute.xlu0 %213 }
  0x8b   : > { %v216_v57 = vadd.f32 %v214_v56, %v207_v53  ;;  %v217_v58 = vadd.f32 %v214_v56, %v208_v54  ;;  %v218_v59 = vadd.f32 %v214_v56, %v209_v55 }
  0x8d   : > { %v219_v60 = vmul.f32 0.01, %v216_v57  ;;  %v221_v61 = vmul.f32 0.01, %v218_v59  ;;  %v220_v62 = vmul.f32 0.01, %v217_v58 }
  0x8f   : > { %v222_v63 = vmax.f32 %v216_v57, %v219_v60  ;;  %v224_v0 = vmax.f32 %v218_v59, %v221_v61  ;;  %v223_v1 = vmax.f32 %v217_v58, %v220_v62 }
  0x91   : > { %372 = vmatprep.mubr.f32.mxu1 %v223_v1  ;;  %517 = vmatmul.mubr.msk.f32.vlgmr.msra.gmra.mrb[0].mxu0 %vm297_vm3, %v224_v0 }
  0x92   : > { %373 = vmatmul.mubr.f32.vlgmr.msra.gmra.mrb[0].mxu1 %v222_v63 }
 0x164   : > { %v445_v2 = vpop.f32.mrb[0].mxu0 }
 0x165   : > { %v374_v3 = vpop.f32.mrb[0].mxu1  ;;  %v447_v4 = vpop.f32.mrb[1].mxu0 }
 0x166   : > { %v446_v5 = vadd.f32 %v445_v2, %v374_v3  ;;  %v376_v6 = vpop.f32.mrb[1].mxu1 }
 0x167   : > { %v448_v7 = vadd.f32 %v447_v4, %v376_v6 }
 0x168   : > { %450 = vst [vmem:[%s197_s28] sm:$0xff] %v446_v5 }
 0x169   : > { %451 = vst [vmem:[%s197_s28 + $0x8] sm:$0xff] %v448_v7 }
 0x16a PF: > { %s14_s15 = sadd.s32 1, %s616_s15  }
 0x16b   : > { %p11_p4 = scmp.ge.s32.totalorder %s14_s15, 4  }
 0x16d   :  { %13 = sbr.rel (!%p11_p4) target bundleno = 1 (0x1), region = 66 }

// kernel: expansion_forward.4
= control target key start
LH: loop header
LB: loop body
LE: loop exit
PB: predicated region body
PF: predicated region fallthrough
CT: control target
= control target key end

     0   :  { %s2740_s27 = smov 0   ;;  %s3214_s0 = inlined_call_operand.vmem [shape: f32[2,8,286], index: 0, kind: input, shape index: {}]   ;;  %s3215_s1 = inlined_call_operand.vmem [shape: f32[8,1], index: 1, kind: input, shape index: {}]   ;;  %s3216_s2 = inlined_call_operand.vmem [shape: f32[8,1], index: 2, kind: input, shape index: {}]   ;;  %s3217_s3 = inlined_call_operand.vmem [shape: f32[286,324], index: 3, kind: input, shape index: {}]   ;;  %s3218_s4 = inlined_call_operand.vmem [shape: f32[9,8,8], index: 4, kind: input, shape index: {}]   ;;  %s3219_s5 = inlined_call_operand.vmem [shape: f32[1,286], index: 5, kind: input, shape index: {}]   ;;  %s3220_s6 = inlined_call_operand.vmem [shape: f32[2,8,286], index: 6, kind: output, shape index: {0}]   ;;  %s3221_s7 = inlined_call_operand.vmem [shape: f32[2,8,1], index: 7, kind: output, shape index: {1}]   ;;  %s3222_s8 = inlined_call_operand.vmem [shape: f32[2,8,1], index: 8, kind: output, shape index: {2}]  }
   0x1 LB: > { %s2348_s28 = sadd.s32 4294967295, %s2680_s27   ;;  %p2352_p0 = scmp.ge.s32.totalorder %s2680_s27, 1  ;;  %s2680_s27 = sphi %s2740_s27, %s19_s27  }
   0x2   : > { %p267_p1 = scmp.lt.s32.totalorder %s2680_s27, 3 }
   0x4   : > { %p268_p2 = pnand %p2352_p0, %p267_p1 }
   0x5   : > { %v330_v0 = vld [vmem:[%s3215_s1] sm:$0xff] (!%p268_p2)  ;;  %v355_v1 = vld [vmem:[%s3217_s3 + $0x8] sm:$0xff] (!%p268_p2)  ;;  %v2682_v2 = vmov (!%p268_p2), 0   ;;  %v357_v6 = vld [vmem:[%s3217_s3 + $0x18] sm:$0xff] (!%p268_p2)  ;;  %v2683_v28 = vmov (!%p268_p2), 0.0   ;;  %vm466_vm0 = vcmask (!%p268_p2), 1045504  }
   0x6   : > { %271 = sbr.rel (%p268_p2) target bundleno = 943 (0x3af), region = 44  ;;  %2673 = vset.pattern.permute.xlu0 (!%p268_p2), %v2682_v2  ;;  %v339_v3 = vld [vmem:[%s3216_s2] sm:$0xff] (!%p268_p2)  ;;  %v361_v9 = vld [vmem:[%s3217_s3 + $0x38] sm:$0xff] (!%p268_p2)  ;;  %v364_v10 = vld [vmem:[%s3217_s3 + $0x50] sm:$0xff] (!%p268_p2)  ;;  %611 = vmatprep.mubr.f32.mxu1 (!%p268_p2), %v2683_v28  ;;  %vm2684_vm1 = vmmov (!%p268_p2), 1   ;;  %p309_p3 = scmp.lt.s32.totalorder (!%p268_p2), %s2348_s28, 1 }
   0x7   : > { %v358_v4 = vld [vmem:[%s3217_s3 + $0x20] sm:$0xff] (!%p268_p2)  ;;  %333 = vperm.xlu0 (!%p268_p2), %2673, %v330_v0   ;;  %v360_v11 = vld [vmem:[%s3217_s3 + $0x30] sm:$0xff] (!%p268_p2)  ;;  %v2508_v12 = vpack.c.bf16 (!%p268_p2), %v364_v10, %v361_v9  ;;  %v363_v13 = vld [vmem:[%s3217_s3 + $0x48] sm:$0xff] (!%p268_p2)  ;;  %vm462_vm3 = vcmask (!%p268_p2), 244736   ;;  %vm2686_vm4 = vmmov (!%p268_p2), 0   ;;  %s2687_s14 = smov (!%p268_p2), 127  }
   0x8   : > { %v354_v5 = vld [vmem:[%s3217_s3] sm:$0xff] (!%p268_p2)  ;;  %v2504_v7 = vpack.c.bf16 (!%p268_p2), %v358_v4, %v355_v1  ;;  %v367_v14 = vld [vmem:[%s3217_s3 + $0x68] sm:$0xff] (!%p268_p2)  ;;  %v2510_v16 = vpack.c.bf16 (!%p268_p2), %v363_v13, %v360_v11  ;;  %v369_v19 = vld [vmem:[%s3217_s3 + $0x78] sm:$0xff] (!%p268_p2)  ;;  %s2688_s15 = smov (!%p268_p2), 126   ;;  %s2689_s16 = smov (!%p268_p2), 110   ;;  %vm770_vm5 = vcmask (!%p268_p2), 1039360  }
   0x9   : > { %v2506_v8 = vpack.c.bf16 (!%p268_p2), %v357_v6, %v354_v5  ;;  %v370_v15 = vld [vmem:[%s3217_s3 + $0x80] sm:$0xff] (!%p268_p2)  ;;  %v373_v20 = vld [vmem:[%s3217_s3 + $0x98] sm:$0xff] (!%p268_p2)  ;;  %v376_v21 = vld [vmem:[%s3217_s3 + $0xb0] sm:$0xff] (!%p268_p2)  ;;  %v2685_v6 = vmov (!%p268_p2), 0.0|0.0   ;;  %s2690_s17 = smov (!%p268_p2), 109   ;;  %s2691_s18 = smov (!%p268_p2), 108  }
   0xa   : > { %2505 = vmatprep.subr.bf16.mxu0 (!%p268_p2), %v2504_v7  ;;  %v2512_v17 = vpack.c.bf16 (!%p268_p2), %v370_v15, %v367_v14  ;;  %v366_v18 = vld [vmem:[%s3217_s3 + $0x60] sm:$0xff] (!%p268_p2)  ;;  %v2516_v23 = vpack.c.bf16 (!%p268_p2), %v376_v21, %v373_v20  ;;  %v372_v24 = vld [vmem:[%s3217_s3 + $0x90] sm:$0xff] (!%p268_p2)  ;;  %v375_v25 = vld [vmem:[%s3217_s3 + $0xa8] sm:$0xff] (!%p268_p2)  ;;  %s2692_s20 = smov (!%p268_p2), 92   ;;  %s2693_s21 = smov (!%p268_p2), 91   ;;  %vm776_vm6 = vcmask (!%p268_p2), 64512  }
   0xb   : > { %2507 = vmatpush1.bf16.msra.mxu0 (!%p268_p2), %v2506_v8  ;;  %342 = vperm.xlu0 (!%p268_p2), %2673, %v339_v3   ;;  %v2514_v22 = vpack.c.bf16 (!%p268_p2), %v369_v19, %v366_v18  ;;  %v379_v26 = vld [vmem:[%s3217_s3 + $0xc8] sm:$0xff] (!%p268_p2)  ;;  %v382_v27 = vld [vmem:[%s3217_s3 + $0xe0] sm:$0xff] (!%p268_p2)  ;;  %v2518_v29 = vpack.c.bf16 (!%p268_p2), %v375_v25, %v372_v24  ;;  %v381_v32 = vld [vmem:[%s3217_s3 + $0xd8] sm:$0xff] (!%p268_p2)  ;;  %vm1073_vm7 = vcmask (!%p268_p2), 1031168   ;;  %vm1234_vm8 = vcmask (!%p268_p2), 900096  }
   0xc   : > { %2509 = vmatprep.subr.bf16.mxu0 (!%p268_p2), %v2508_v12  ;;  %v2520_v30 = vpack.c.bf16 (!%p268_p2), %v382_v27, %v379_v26  ;;  %v378_v31 = vld [vmem:[%s3217_s3 + $0xc0] sm:$0xff] (!%p268_p2)  ;;  %v385_v33 = vld [vmem:[%s3217_s3 + $0xf8] sm:$0xff] (!%p268_p2)  ;;  %v388_v34 = vld [vmem:[%s3217_s3 + $0x110] sm:$0xff] (!%p268_p2)  ;;  %vm1395_vm9 = vcmask (!%p268_p2), 891904   ;;  %vm1556_vm10 = vcmask (!%p268_p2), 883712   ;;  %vm1717_vm11 = vcmask (!%p268_p2), 752640  }
   0xd   : > { %v2522_v35 = vpack.c.bf16 %v381_v32, %v378_v31  ;;  %v2524_v36 = vpack.c.bf16 %v388_v34, %v385_v33  ;;  %v384_v37 = vld [vmem:[%s3217_s3 + $0xf0] sm:$0xff]  ;;  %v387_v38 = vld [vmem:[%s3217_s3 + $0x108] sm:$0xff]  ;;  %v394_v40 = vld [vmem:[%s3217_s3 + $0x140] sm:$0xff]  ;;  %s3226_s28 = smov (!%p309_p3, %s2348_s28), 1  ;;  %vm1878_vm12 = vcmask 744448   ;;  %vm2039_vm13 = vcmask 736256  }
   0xe   : > { %v391_v39 = vld [vmem:[%s3217_s3 + $0x128] sm:$0xff]  ;;  %v454_v42 = vld [vmem:[%s3217_s3 + $0x320] sm:$0xff]  ;;  %v2526_v43 = vpack.c.bf16 %v387_v38, %v384_v37  ;;  %v393_v45 = vld [vmem:[%s3217_s3 + $0x138] sm:$0xff]  ;;  %s2651_s19 = smul.u32 24, %s3226_s28  ;;  %vm2220_vm14 = vcmask 7168  }
   0xf   : > { %2511 = vmatpush1.bf16.msra.mxu0 %v2510_v16  ;;  %v451_v41 = vld [vmem:[%s3217_s3 + $0x308] sm:$0xff]  ;;  %v390_v44 = vld [vmem:[%s3217_s3 + $0x120] sm:$0xff]  ;;  %v2528_v48 = vpack.c.bf16 %v394_v40, %v391_v39  ;;  %v397_v49 = vld [vmem:[%s3217_s3 + $0x158] sm:$0xff] }
  0x10   : > { %2513 = vmatprep.subr.bf16.mxu0 %v2512_v17  ;;  %v2568_v46 = vpack.c.bf16 %v454_v42, %v451_v41  ;;  %v450_v47 = vld [vmem:[%s3217_s3 + $0x300] sm:$0xff]  ;;  %v400_v50 = vld [vmem:[%s3217_s3 + $0x170] sm:$0xff]  ;;  %v453_v51 = vld [vmem:[%s3217_s3 + $0x318] sm:$0xff]  ;;  %v2530_v58 = vpack.c.bf16 %v393_v45, %v390_v44  ;;  %s313_s22 = scalar_lea.vmem %s3214_s0, %s2651_s19  ;;  %s318_s26 = scalar_lea.vmem %s3220_s6, %s2651_s19 }
  0x11   : > { %v2570_v52 = vpack.c.bf16 %v453_v51, %v450_v47  ;;  %v457_v53 = vld [vmem:[%s3217_s3 + $0x338] sm:$0xff]  ;;  %v460_v54 = vld [vmem:[%s3217_s3 + $0x350] sm:$0x3f]  ;;  %vm2864_vm2 = vmpackc.low %vm466_vm0, %vm2684_vm1  ;;  %v2532_v60 = vpack.c.bf16 %v400_v50, %v397_v49  ;;  %s2355_s19 = sshll.u32 %s3226_s28, 3 }
  0x12   : > { %2569 = vmatprep.subr.bf16.mxu1 %v2568_v46  ;;  %v2572_v56 = vpack.c.bf16 %v460_v54, %v457_v53  ;;  %v456_v57 = vld [vmem:[%s3217_s3 + $0x330] sm:$0xff]  ;;  %v459_v59 = vld [vmem:[%s3217_s3 + $0x348] sm:$0x3f]  ;;  %v406_v1 = vld [vmem:[%s3217_s3 + $0x1a0] sm:$0xff]  ;;  %s322_s9 = scalar_lea.vmem %s3221_s7, %s2355_s19  ;;  %s326_s12 = scalar_lea.vmem %s3222_s8, %s2355_s19 }
  0x13   : > { %2515 = vmatpush1.bf16.msra.mxu0 %v2514_v22  ;;  %2571 = vmatpush1.bf16.msra.mxu1 %v2570_v52  ;;  %v396_v61 = vld [vmem:[%s3217_s3 + $0x150] sm:$0xff]  ;;  %v399_v62 = vld [vmem:[%s3217_s3 + $0x168] sm:$0xff]  ;;  %v2575_v63 = vpack.c.bf16 %v459_v59, %v456_v57  ;;  %v402_v4 = vld [vmem:[%s3217_s3 + $0x180] sm:$0xff] }
  0x14   : > { %2517 = vmatprep.subr.bf16.mxu0 %v2516_v23  ;;  %2574 = vmatprep.subr.msk.bf16.mxu1 %vm2864_vm2, %v2572_v56  ;;  %v403_v0 = vld [vmem:[%s3217_s3 + $0x188] sm:$0xff]  ;;  %v2534_v2 = vpack.c.bf16 %v399_v62, %v396_v61  ;;  %v405_v5 = vld [vmem:[%s3217_s3 + $0x198] sm:$0xff]  ;;  %v412_v8 = vld [vmem:[%s3217_s3 + $0x1d0] sm:$0xff] }
  0x15   : > { %v2536_v3 = vpack.c.bf16 %v406_v1, %v403_v0  ;;  %v409_v7 = vld [vmem:[%s3217_s3 + $0x1b8] sm:$0xff]  ;;  %v2538_v9 = vpack.c.bf16 %v405_v5, %v402_v4  ;;  %v408_v11 = vld [vmem:[%s3217_s3 + $0x1b0] sm:$0xff]  ;;  %v411_v12 = vld [vmem:[%s3217_s3 + $0x1c8] sm:$0xff] }
  0x16   : > { %v2540_v10 = vpack.c.bf16 %v412_v8, %v409_v7  ;;  %v415_v13 = vld [vmem:[%s3217_s3 + $0x1e8] sm:$0xff]  ;;  %v418_v14 = vld [vmem:[%s3217_s3 + $0x200] sm:$0xff]  ;;  %v2542_v15 = vpack.c.bf16 %v411_v12, %v408_v11  ;;  %v417_v18 = vld [vmem:[%s3217_s3 + $0x1f8] sm:$0xff] }
  0x17   : > { %2519 = vmatpush1.bf16.msra.mxu0 %v2518_v29  ;;  %2577 = vmatpush1.bf16.msk.msra.mxu1 %vm2864_vm2, %v2575_v63  ;;  %v2544_v16 = vpack.c.bf16 %v418_v14, %v415_v13  ;;  %v414_v17 = vld [vmem:[%s3217_s3 + $0x1e0] sm:$0xff]  ;;  %v421_v19 = vld [vmem:[%s3217_s3 + $0x218] sm:$0xff]  ;;  %v424_v20 = vld [vmem:[%s3217_s3 + $0x230] sm:$0xff] }
  0x18   : > { %2521 = vmatprep.subr.bf16.mxu0 %v2520_v30  ;;  %2610 = vmatprep.subr.bf16.mxu1 %v2685_v6  ;;  %v2546_v21 = vpack.c.bf16 %v417_v18, %v414_v17  ;;  %v2548_v22 = vpack.c.bf16 %v424_v20, %v421_v19  ;;  %v420_v23 = vld [vmem:[%s3217_s3 + $0x210] sm:$0xff]  ;;  %v423_v24 = vld [vmem:[%s3217_s3 + $0x228] sm:$0xff]  ;;  %v430_v26 = vld [vmem:[%s3217_s3 + $0x260] sm:$0xff] }
  0x19   : > { %v427_v25 = vld [vmem:[%s3217_s3 + $0x248] sm:$0xff]  ;;  %v2550_v27 = vpack.c.bf16 %v423_v24, %v420_v23  ;;  %v426_v30 = vld [vmem:[%s3217_s3 + $0x240] sm:$0xff]  ;;  %v429_v31 = vld [vmem:[%s3217_s3 + $0x258] sm:$0xff] }
  0x1a   : > { %v2552_v29 = vpack.c.bf16 %v430_v26, %v427_v25  ;;  %v433_v32 = vld [vmem:[%s3217_s3 + $0x278] sm:$0xff]  ;;  %v436_v33 = vld [vmem:[%s3217_s3 + $0x290] sm:$0xff]  ;;  %v2554_v34 = vpack.c.bf16 %v429_v31, %v426_v30  ;;  %v435_v37 = vld [vmem:[%s3217_s3 + $0x288] sm:$0xff] }
  0x1b   : > { %2523 = vmatpush1.bf16.msra.mxu0 %v2522_v35  ;;  %v2556_v35 = vpack.c.bf16 %v436_v33, %v433_v32  ;;  %v439_v38 = vld [vmem:[%s3217_s3 + $0x2a8] sm:$0xff]  ;;  %v442_v39 = vld [vmem:[%s3217_s3 + $0x2c0] sm:$0xff]  ;;  %v445_v44 = vld [vmem:[%s3217_s3 + $0x2d8] sm:$0xff] }
  0x1c   : > { %2525 = vmatprep.subr.bf16.mxu0 %v2524_v36  ;;  %v432_v36 = vld [vmem:[%s3217_s3 + $0x270] sm:$0xff]  ;;  %v2560_v41 = vpack.c.bf16 %v442_v39, %v439_v38  ;;  %v438_v42 = vld [vmem:[%s3217_s3 + $0x2a0] sm:$0xff]  ;;  %v447_v49 = vld [vmem:[%s3217_s3 + $0x2e8] sm:$0xff] }
  0x1d   : > { %v2558_v40 = vpack.c.bf16 %v435_v37, %v432_v36  ;;  %v448_v45 = vld [vmem:[%s3217_s3 + $0x2f0] sm:$0xff]  ;;  %v407_v51 = vld [vmem:[%s3217_s3 + $0x1a8] sm:$0xff]  ;;  %v327_v56 = vld [vmem:[%s313_s22] sm:$0xff] }
  0x1e   : > { %v2564_v47 = vpack.c.bf16 %v448_v45, %v445_v44  ;;  %v404_v50 = vld [vmem:[%s3217_s3 + $0x190] sm:$0xff]  ;;  %v328_v57 = vld [vmem:[%s313_s22 + $0x8] sm:$0xff]  ;;  %v410_v7 = vld [vmem:[%s3217_s3 + $0x1c0] sm:$0xff] }
  0x1f   : > { %2527 = vmatpush1.bf16.msra.mxu0 %v2526_v43  ;;  %v441_v43 = vld [vmem:[%s3217_s3 + $0x2b8] sm:$0xff]  ;;  %v2578_v53 = vpack.c.bf16 %v407_v51, %v404_v50  ;;  %v356_v4 = vld [vmem:[%s3217_s3 + $0x10] sm:$0xff]  ;;  %v359_v5 = vld [vmem:[%s3217_s3 + $0x28] sm:$0xff] }
  0x20   : > { %2529 = vmatprep.subr.bf16.mxu0 %v2528_v48  ;;  %v2562_v46 = vpack.c.bf16 %v441_v43, %v438_v42  ;;  %v444_v48 = vld [vmem:[%s3217_s3 + $0x2d0] sm:$0xff]  ;;  %v413_v8 = vld [vmem:[%s3217_s3 + $0x1d8] sm:$0xff]  ;;  %v458_v17 = vld [vmem:[%s3217_s3 + $0x340] sm:$0xff] }
  0x21   : > { %v2566_v52 = vpack.c.bf16 %v447_v49, %v444_v48  ;;  %v461_v18 = vld [vmem:[%s3217_s3 + $0x358] sm:$0x3f]  ;;  %v2582_v19 = vpack.c.bf16 %v413_v8, %v410_v7  ;;  %v362_v20 = vld [vmem:[%s3217_s3 + $0x40] sm:$0xff]  ;;  %v419_v23 = vld [vmem:[%s3217_s3 + $0x208] sm:$0xff] }
  0x22   : > { %v2614_v24 = vpack.c.bf16 %v461_v18, %v458_v17  ;;  %v422_v30 = vld [vmem:[%s3217_s3 + $0x220] sm:$0xff]  ;;  %v431_v55 = vld [vmem:[%s3217_s3 + $0x268] sm:$0xff]  ;;  %v380_v38 = vld [vmem:[%s3217_s3 + $0xd0] sm:$0xff] }
  0x23   : > { %2531 = vmatpush1.bf16.msra.mxu0 %v2530_v58  ;;  %v329_v58 = vld [vmem:[%s313_s22 + $0x10] sm:$0xff]  ;;  %v374_v33 = vld [vmem:[%s3217_s3 + $0xa0] sm:$0xff]  ;;  %v383_v39 = vld [vmem:[%s3217_s3 + $0xe8] sm:$0xff]  ;;  %s2694_s22 = smov 90  }
  0x24   : > { %2533 = vmatprep.subr.bf16.mxu0 %v2532_v60  ;;  %v2596_v42 = vpack.c.bf16 %v383_v39, %v380_v38  ;;  %v386_v44 = vld [vmem:[%s3217_s3 + $0x100] sm:$0xff]  ;;  %v389_v45 = vld [vmem:[%s3217_s3 + $0x118] sm:$0xff]  ;;  %v392_v50 = vld [vmem:[%s3217_s3 + $0x130] sm:$0xff] }
  0x25   : > { %v2600_v48 = vpack.c.bf16 %v389_v45, %v386_v44  ;;  %v395_v51 = vld [vmem:[%s3217_s3 + $0x148] sm:$0xff]  ;;  %v758_v18 = vld [vmem:[%s3218_s4] sm:$0xff] }
  0x27   : > { %2535 = vmatpush1.bf16.msra.mxu0 %v2534_v2  ;;  %v452_v2 = vld [vmem:[%s3217_s3 + $0x310] sm:$0xff] }
  0x28   : > { %2537 = vmatprep.subr.bf16.mxu0 %v2536_v3  ;;  %v455_v3 = vld [vmem:[%s3217_s3 + $0x328] sm:$0xff] }
  0x29   : > { %v2611_v12 = vpack.c.bf16 %v455_v3, %v452_v2 }
  0x2b   : > { %2539 = vmatpush1.bf16.msra.mxu0 %v2538_v9 }
  0x2c   : > { %2541 = vmatprep.subr.bf16.mxu0 %v2540_v10 }
  0x2f   : > { %2543 = vmatpush1.bf16.msra.mxu0 %v2542_v15 }
  0x30   : > { %2545 = vmatprep.subr.bf16.mxu0 %v2544_v16  ;;  %v2580_v16 = vpack.c.bf16 %v359_v5, %v356_v4 }
  0x33   : > { %2547 = vmatpush1.bf16.msra.mxu0 %v2546_v21  ;;  %v365_v21 = vld [vmem:[%s3217_s3 + $0x58] sm:$0xff] }
  0x34   : > { %2549 = vmatprep.subr.bf16.mxu0 %v2548_v22  ;;  %v416_v22 = vld [vmem:[%s3217_s3 + $0x1f0] sm:$0xff]  ;;  %v2584_v25 = vpack.c.bf16 %v365_v21, %v362_v20 }
  0x35   : > { %v2586_v26 = vpack.c.bf16 %v419_v23, %v416_v22 }
  0x37   : > { %2551 = vmatpush1.bf16.msra.mxu0 %v2550_v27  ;;  %v368_v27 = vld [vmem:[%s3217_s3 + $0x70] sm:$0xff] }
  0x38   : > { %2553 = vmatprep.subr.bf16.mxu0 %v2552_v29  ;;  %v371_v29 = vld [vmem:[%s3217_s3 + $0x88] sm:$0xff] }
  0x39   : > { %v2588_v31 = vpack.c.bf16 %v371_v29, %v368_v27 }
  0x3b   : > { %2555 = vmatpush1.bf16.msra.mxu0 %v2554_v34  ;;  %v377_v34 = vld [vmem:[%s3217_s3 + $0xb8] sm:$0xff] }
  0x3c   : > { %2557 = vmatprep.subr.bf16.mxu0 %v2556_v35  ;;  %v428_v35 = vld [vmem:[%s3217_s3 + $0x250] sm:$0xff]  ;;  %v2592_v36 = vpack.c.bf16 %v377_v34, %v374_v33 }
  0x3d   : > { %v2594_v37 = vpack.c.bf16 %v431_v55, %v428_v35  ;;  %v2373_v35 = vld [vmem:[%s3218_s4 + $0x20] sm:$0xff] }
  0x3f   : > { %2559 = vmatpush1.bf16.msra.mxu0 %v2558_v40  ;;  %v434_v40 = vld [vmem:[%s3217_s3 + $0x280] sm:$0xff] }
  0x40   : > { %2561 = vmatprep.subr.bf16.mxu0 %v2560_v41  ;;  %v437_v41 = vld [vmem:[%s3217_s3 + $0x298] sm:$0xff] }
  0x41   : > { %v2598_v43 = vpack.c.bf16 %v437_v41, %v434_v40  ;;  %v2376_v40 = vld [vmem:[%s3218_s4 + $0x28] sm:$0xff] }
  0x43   : > { %2563 = vmatpush1.bf16.msra.mxu0 %v2562_v46  ;;  %v440_v46 = vld [vmem:[%s3217_s3 + $0x2b0] sm:$0xff] }
  0x44   : > { %2565 = vmatprep.subr.bf16.mxu0 %v2564_v47  ;;  %v443_v47 = vld [vmem:[%s3217_s3 + $0x2c8] sm:$0xff] }
  0x45   : > { %v2602_v49 = vpack.c.bf16 %v443_v47, %v440_v46  ;;  %v2379_v46 = vld [vmem:[%s3218_s4 + $0x30] sm:$0xff] }
  0x47   : > { %2567 = vmatpush1.bf16.msra.mxu0 %v2566_v52  ;;  %v446_v52 = vld [vmem:[%s3217_s3 + $0x2e0] sm:$0xff] }
  0x48   : > { %2579 = vmatprep.subr.bf16.mxu0 %v2578_v53  ;;  %v449_v53 = vld [vmem:[%s3217_s3 + $0x2f8] sm:$0xff] }
  0x86   : > { %v334_v54 = vpop.permute.xlu0 %333 }
  0x87   : > { %v336_v59 = vmul.f32 %v334_v54, %v327_v56  ;;  %v337_v60 = vmul.f32 %v334_v54, %v328_v57  ;;  %v338_v61 = vmul.f32 %v334_v54, %v329_v58  ;;  %v2604_v54 = vpack.c.bf16 %v395_v51, %v392_v50  ;;  %v398_v57 = vld [vmem:[%s3217_s3 + $0x160] sm:$0xff]  ;;  %v401_v58 = vld [vmem:[%s3217_s3 + $0x178] sm:$0xff] }
  0x88   : > { %v2606_v56 = vpack.c.bf16 %v449_v53, %v446_v52  ;;  %v2382_v51 = vld [vmem:[%s3218_s4 + $0x38] sm:$0xff] }
  0x8a   : > { %v343_v62 = vpop.permute.xlu0 %342 }
  0x8b   : > { %v345_v63 = vadd.f32 %v343_v62, %v336_v59  ;;  %v347_v0 = vadd.f32 %v343_v62, %v338_v61  ;;  %v346_v1 = vadd.f32 %v343_v62, %v337_v60  ;;  %v2608_v59 = vpack.c.bf16 %v401_v58, %v398_v57  ;;  %v2385_v57 = vld [vmem:[%s3218_s4 + $0x40] sm:$0xff] }
  0x8c   : > { %v2197_v58 = vlaneseq }
  0x8d   : > { %v348_v9 = vmul.f32 0.01, %v345_v63  ;;  %v350_v10 = vmul.f32 0.01, %v347_v0  ;;  %v349_v11 = vmul.f32 0.01, %v346_v1 }
  0x8f   : > { %v353_v13 = vmax.f32 %v347_v0, %v350_v10  ;;  %v352_v14 = vmax.f32 %v346_v1, %v349_v11  ;;  %v3017_v15 = vmax.f32 %v345_v63, %v348_v9 }
  0x91   : > { %540 = vmatprep.mubr.f32.mxu0 %v352_v14  ;;  %2359 = vmatmul.mubr.msk.f32.vlgmr.msra.gmra.mrb[0].mxu1 %vm462_vm3, %v353_v13 }
  0x92   : > { %2612 = vmatpush3.bf16.msra.mxu1 %v2611_v12  ;;  %541 = vmatmul.mubr.f32.vlgmr.msra.gmra.mrb[0].mxu0 %v3017_v15 }
  0x93   : > { %2581 = vmatpush3.bf16.msra.mxu0 %v2580_v16  ;;  %682 = vmatprep.mubr.f32.mxu0 %v352_v14 }
  0x94   : > { %2613 = vmatprep.subr.bf16.mxu1 %v2685_v6  ;;  %2583 = vmatprep.subr.bf16.mxu0 %v2582_v19  ;;  %v425_v6 = vld [vmem:[%s3217_s3 + $0x238] sm:$0xff] }
  0x95   : > { %2456 = vmatprep.mubr.msk.f32.mxu1 %vm2686_vm4, %v2683_v28  ;;  %v2590_v32 = vpack.c.bf16 %v425_v6, %v422_v30  ;;  %v2370_v6 = vld [vmem:[%s3218_s4 + $0x18] sm:$0xff] }
  0x96   : > { %2616 = vmatpush3.bf16.msk.msra.mxu1 %vm2864_vm2, %v2614_v24  ;;  %v2367_v24 = vld [vmem:[%s3218_s4 + $0x10] sm:$0xff] }
  0x97   : > { %2585 = vmatpush3.bf16.msra.mxu0 %v2584_v25 }
  0x98   : > { %2587 = vmatprep.subr.bf16.mxu0 %v2586_v26 }
  0x99   : > { %2457 = vmatmul.mubr.msk.f32.vlgmr.msra.gmra.mrb[2].mxu1 %vm462_vm3, %v353_v13  ;;  %v2362_v13 = vld [vmem:[%s3218_s4 + $0x8] sm:$0xff] }
  0x9a   : > { %844 = vmatprep.mubr.f32.mxu1 %v2683_v28 }
  0x9b   : > { %2589 = vmatpush3.bf16.msra.mxu0 %v2588_v31 }
  0x9c   : > { %2591 = vmatprep.subr.bf16.mxu0 %v2590_v32 }
  0x9f   : > { %2593 = vmatpush3.bf16.msra.mxu0 %v2592_v36 }
  0xa0   : > { %2595 = vmatprep.subr.bf16.mxu0 %v2594_v37 }
  0xa3   : > { %2597 = vmatpush3.bf16.msra.mxu0 %v2596_v42 }
  0xa4   : > { %2599 = vmatprep.subr.bf16.mxu0 %v2598_v43 }
  0xa7   : > { %2601 = vmatpush3.bf16.msra.mxu0 %v2600_v48 }
  0xa8   : > { %2603 = vmatprep.subr.bf16.mxu0 %v2602_v49 }
  0xab   : > { %2605 = vmatpush3.bf16.msra.mxu0 %v2604_v54 }
  0xac   : > { %2607 = vmatprep.subr.bf16.mxu0 %v2606_v56 }
  0xaf   : > { %2609 = vmatpush3.bf16.msra.mxu0 %v2608_v59  ;;  %v2198_v59 = vshrl.u32 %v2197_v58, 7 }
  0xb2   : > { %683 = vmatmul.mubr.f32.vlgmr.msra.gmra.mrb[2].mxu0 %v3017_v15 }
 0x164   : > { %v613_v60 = vpop.f32.mrb[0].mxu1 }
 0x165   : > { %v542_v61 = vpop.f32.mrb[0].mxu0  ;;  %v615_v62 = vpop.f32.mrb[1].mxu1 }
 0x166   : > { %v614_v63 = vadd.f32 %v613_v60, %v542_v61  ;;  %v544_v0 = vpop.f32.mrb[1].mxu0  ;;  %v2199_v60 = vsub.s32 0, %v2198_v59  ;;  %v2195_v61 = vld [vmem:[%s3219_s5] sm:$0x7] }
 0x167   : > { %v616_v1 = vadd.f32 %v615_v62, %v544_v0  ;;  %v2203_v62 = vsub.s32 1, %v2198_v59  ;;  %v2207_v0 = vsub.s32 2, %v2198_v59 }
 0x168   : > { %764 = vrot.lane.b32.xlu0 %v614_v63, %s2687_s14 }
 0x169   : > { %766 = vrot.lane.b32.xlu1 %v616_v1, %s2687_s14 }
 0x16c   : > { %v754_v2 = vpop.f32.mrb[2].mxu1 }
 0x16d   : > { %v2458_v3 = vpop.f32.mrb[3].mxu1 }
 0x185   : > { %v2422_v4 = vpop.f32.mrb[2].mxu0 }
 0x186   : > { %v2423_v5 = vpop.f32.mrb[3].mxu0 }
 0x187   : > { %v2424_v7 = vadd.f32 %v2423_v5, %v2422_v4  ;;  %v2208_v4 = vrot.slane %v2195_v61, %v2207_v0 }
 0x189   : > { %v755_v8 = vadd.f32 %v2424_v7, %v754_v2 }
 0x18b   : > { %1071 = vrot.lane.b32.xlu0 %v755_v8, %s2688_s15  ;;  %768 = vrot.lane.b32.xlu1 %v755_v8, %s2687_s14 }
 0x18f   : > { %1230 = vrot.lane.b32.xlu0 %v616_v1, %s2689_s16  ;;  %1069 = vrot.lane.b32.xlu1 %v616_v1, %s2688_s15 }
 0x193   : > { %1228 = vrot.lane.b32.xlu0 %v614_v63, %s2689_s16  ;;  %1067 = vrot.lane.b32.xlu1 %v614_v63, %s2688_s15 }
 0x197   : > { %1393 = vrot.lane.b32.xlu0 %v755_v8, %s2690_s17  ;;  %1232 = vrot.lane.b32.xlu1 %v755_v8, %s2689_s16 }
 0x19b   : > { %1552 = vrot.lane.b32.xlu0 %v616_v1, %s2691_s18  ;;  %1391 = vrot.lane.b32.xlu1 %v616_v1, %s2690_s17 }
 0x19f   : > { %1550 = vrot.lane.b32.xlu0 %v614_v63, %s2691_s18  ;;  %1389 = vrot.lane.b32.xlu1 %v614_v63, %s2690_s17 }
 0x1a3   : > { %1715 = vrot.lane.b32.xlu0 %v755_v8, %s2692_s20  ;;  %1554 = vrot.lane.b32.xlu1 %v755_v8, %s2691_s18 }
 0x1a7   : > { %1874 = vrot.lane.b32.xlu0 %v616_v1, %s2693_s21  ;;  %1713 = vrot.lane.b32.xlu1 %v616_v1, %s2692_s20 }
 0x1ab   : > { %1872 = vrot.lane.b32.xlu0 %v614_v63, %s2693_s21  ;;  %1711 = vrot.lane.b32.xlu1 %v614_v63, %s2692_s20 }
 0x1af   : > { %2037 = vrot.lane.b32.xlu0 %v755_v8, %s2694_s22  ;;  %1876 = vrot.lane.b32.xlu1 %v755_v8, %s2693_s21 }
 0x1b3   : > { %2035 = vrot.lane.b32.xlu1 %v616_v1, %s2694_s22 }
 0x1b7   : > { %2033 = vrot.lane.b32.xlu1 %v614_v63, %s2694_s22 }
 0x1da   : > { %v765_v10 = vpop.permute.xlu0 %764 }
 0x1db   : > { %v767_v9 = vpop.permute.xlu1 %766 }
 0x1dc   : > { %v771_v14 = vsel %vm770_vm5, %v765_v10, %v767_v9 }
 0x1fd   : > { %v769_v11 = vpop.permute.xlu1 %768  ;;  %v1072_v16 = vpop.permute.xlu0 %1071 }
 0x1fe   : > { %v772_v12 = vsel %vm770_vm5, %v767_v9, %v769_v11 }
 0x1ff   : > { %780 = vmatprep.subr.mxu1 %v772_v12 }
 0x200   : > { %781 = vmatpush1.msra.mxu1 %v771_v14 }
 0x201   : > { %2363 = vmatmul.mubr.msk.f32.vlgmr.msra.gmra.mrb[4].mxu1 %vm776_vm6, %v2362_v13  ;;  %2459 = vmatprep.subr.mxu1 %v2683_v28  ;;  %v1070_v15 = vpop.permute.xlu1 %1069  ;;  %v1231_v19 = vpop.permute.xlu0 %1230 }
 0x202   : > { %2460 = vmatpush3.msra.mxu1 %v769_v11  ;;  %2461 = vmatprep.mubr.msk.f32.mxu1 %vm2686_vm4, %v2683_v28  ;;  %v1075_v21 = vsel %vm1073_vm7, %v1070_v15, %v1072_v16 }
 0x203   : > { %924 = vmatprep.subr.mxu1 %v616_v1  ;;  %v2204_v1 = vrot.slane %v2195_v61, %v2203_v62 }
 0x205   : > { %2462 = vmatmul.mubr.msk.f32.vlgmr.msra.gmra.mrb[6].mxu1 %vm776_vm6, %v2362_v13  ;;  %v1068_v17 = vpop.permute.xlu1 %1067  ;;  %v1229_v23 = vpop.permute.xlu0 %1228 }
 0x206   : > { %925 = vmatpush1.msra.mxu1 %v614_v63  ;;  %988 = vmatprep.mubr.f32.mxu1 %v2683_v28  ;;  %v1074_v22 = vsel %vm1073_vm7, %v1068_v17, %v1070_v15  ;;  %v1235_v29 = vsel %vm1234_vm8, %v1229_v23, %v1231_v19  ;;  %v2200_v63 = vrot.slane %v2195_v61, %v2199_v60 }
 0x207   : > { %2464 = vmatprep.subr.mxu1 %v2683_v28 }
 0x209   : > { %2365 = vmatmul.mubr.msk.f32.vlgmr.msra.gmra.mrb[4].mxu1 %vm776_vm6, %v758_v18  ;;  %v1233_v20 = vpop.permute.xlu1 %1232  ;;  %v1394_v27 = vpop.permute.xlu0 %1393 }
 0x20a   : > { %2465 = vmatpush3.msra.mxu1 %v755_v8  ;;  %2466 = vmatprep.mubr.msk.f32.mxu1 %vm2686_vm4, %v2683_v28  ;;  %v1236_v26 = vsel %vm1234_vm8, %v1231_v19, %v1233_v20 }
 0x20b   : > { %1082 = vmatprep.subr.mxu1 %v1075_v21 }
 0x20d   : > { %2467 = vmatmul.mubr.msk.f32.vlgmr.msra.gmra.mrb[6].mxu1 %vm776_vm6, %v758_v18  ;;  %v1392_v25 = vpop.permute.xlu1 %1391  ;;  %v1553_v31 = vpop.permute.xlu0 %1552 }
 0x20e   : > { %1083 = vmatpush1.msra.mxu1 %v1074_v22  ;;  %1146 = vmatprep.mubr.f32.mxu1 %v2683_v28  ;;  %v1397_v32 = vsel %vm1395_vm9, %v1392_v25, %v1394_v27 }
 0x20f   : > { %2469 = vmatprep.subr.mxu1 %v2683_v28 }
 0x211   : > { %2368 = vmatmul.mubr.msk.f32.vlgmr.msra.gmra.mrb[4].mxu1 %vm776_vm6, %v2367_v24  ;;  %v1390_v30 = vpop.permute.xlu1 %1389  ;;  %v1551_v55 = vpop.permute.xlu0 %1550 }
 0x212   : > { %2470 = vmatpush3.msra.mxu1 %v1072_v16  ;;  %2471 = vmatprep.mubr.msk.f32.mxu1 %vm2686_vm4, %v2683_v28  ;;  %v1396_v34 = vsel %vm1395_vm9, %v1390_v30, %v1392_v25  ;;  %v1557_v38 = vsel %vm1556_vm10, %v1551_v55, %v1553_v31 }
 0x213   : > { %1243 = vmatprep.subr.mxu1 %v1236_v26 }
 0x215   : > { %2472 = vmatmul.mubr.msk.f32.vlgmr.msra.gmra.mrb[6].mxu1 %vm776_vm6, %v2367_v24  ;;  %v1555_v33 = vpop.permute.xlu1 %1554  ;;  %v1716_v39 = vpop.permute.xlu0 %1715 }
 0x216   : > { %1244 = vmatpush1.msra.mxu1 %v1235_v29  ;;  %1307 = vmatprep.mubr.f32.mxu1 %v2683_v28  ;;  %v1558_v37 = vsel %vm1556_vm10, %v1553_v31, %v1555_v33 }
 0x217   : > { %2474 = vmatprep.subr.mxu1 %v2683_v28 }
 0x219   : > { %2371 = vmatmul.mubr.msk.f32.vlgmr.msra.gmra.mrb[4].mxu1 %vm776_vm6, %v2370_v6  ;;  %v1714_v36 = vpop.permute.xlu1 %1713  ;;  %v1875_v43 = vpop.permute.xlu0 %1874 }
 0x21a   : > { %2475 = vmatpush3.msra.mxu1 %v1233_v20  ;;  %2476 = vmatprep.mubr.msk.f32.mxu1 %vm2686_vm4, %v2683_v28  ;;  %v1719_v42 = vsel %vm1717_vm11, %v1714_v36, %v1716_v39 }
 0x21b   : > { %1404 = vmatprep.subr.mxu1 %v1397_v32 }
 0x21d   : > { %2477 = vmatmul.mubr.msk.f32.vlgmr.msra.gmra.mrb[6].mxu1 %vm776_vm6, %v2370_v6  ;;  %v1712_v41 = vpop.permute.xlu1 %1711  ;;  %v1873_v47 = vpop.permute.xlu0 %1872 }
 0x21e   : > { %1405 = vmatpush1.msra.mxu1 %v1396_v34  ;;  %1468 = vmatprep.mubr.f32.mxu1 %v2683_v28  ;;  %v1718_v44 = vsel %vm1717_vm11, %v1712_v41, %v1714_v36  ;;  %v1879_v50 = vsel %vm1878_vm12, %v1873_v47, %v1875_v43 }
 0x21f   : > { %2479 = vmatprep.subr.mxu1 %v2683_v28 }
 0x221   : > { %2374 = vmatmul.mubr.msk.f32.vlgmr.msra.gmra.mrb[4].mxu1 %vm776_vm6, %v2373_v35  ;;  %v1877_v45 = vpop.permute.xlu1 %1876  ;;  %v2038_v52 = vpop.permute.xlu0 %2037 }
 0x222   : > { %2480 = vmatpush3.msra.mxu1 %v1394_v27  ;;  %2481 = vmatprep.mubr.msk.f32.mxu1 %vm2686_vm4, %v2683_v28  ;;  %v1880_v48 = vsel %vm1878_vm12, %v1875_v43, %v1877_v45 }
 0x223   : > { %1565 = vmatprep.subr.mxu1 %v1558_v37 }
 0x225   : > { %2482 = vmatmul.mubr.msk.f32.vlgmr.msra.gmra.mrb[6].mxu1 %vm776_vm6, %v2373_v35  ;;  %v2036_v49 = vpop.permute.xlu1 %2035 }
 0x226   : > { %1566 = vmatpush1.msra.mxu1 %v1557_v38  ;;  %1629 = vmatprep.mubr.f32.mxu1 %v2683_v28  ;;  %v2041_v54 = vsel %vm2039_vm13, %v2036_v49, %v2038_v52 }
 0x227   : > { %2484 = vmatprep.subr.mxu1 %v2683_v28 }
 0x229   : > { %2377 = vmatmul.mubr.msk.f32.vlgmr.msra.gmra.mrb[4].mxu1 %vm776_vm6, %v2376_v40  ;;  %v2034_v53 = vpop.permute.xlu1 %2033 }
 0x22a   : > { %2485 = vmatpush3.msra.mxu1 %v1555_v33  ;;  %2486 = vmatprep.mubr.msk.f32.mxu1 %vm2686_vm4, %v2683_v28  ;;  %v2040_v56 = vsel %vm2039_vm13, %v2034_v53, %v2036_v49 }
 0x22b   : > { %1726 = vmatprep.subr.mxu1 %v1719_v42 }
 0x22d   : > { %2487 = vmatmul.mubr.msk.f32.vlgmr.msra.gmra.mrb[6].mxu1 %vm776_vm6, %v2376_v40 }
 0x22e   : > { %1727 = vmatpush1.msra.mxu1 %v1718_v44  ;;  %1790 = vmatprep.mubr.f32.mxu1 %v2683_v28 }
 0x22f   : > { %2489 = vmatprep.subr.mxu1 %v2683_v28 }
 0x231   : > { %2380 = vmatmul.mubr.msk.f32.vlgmr.msra.gmra.mrb[4].mxu1 %vm776_vm6, %v2379_v46 }
 0x232   : > { %2490 = vmatpush3.msra.mxu1 %v1716_v39  ;;  %2491 = vmatprep.mubr.msk.f32.mxu1 %vm2686_vm4, %v2683_v28 }
 0x233   : > { %1887 = vmatprep.subr.mxu1 %v1880_v48 }
 0x235   : > { %2492 = vmatmul.mubr.msk.f32.vlgmr.msra.gmra.mrb[6].mxu1 %vm776_vm6, %v2379_v46 }
 0x236   : > { %1888 = vmatpush1.msra.mxu1 %v1879_v50  ;;  %1951 = vmatprep.mubr.f32.mxu1 %v2683_v28 }
 0x237   : > { %2494 = vmatprep.subr.mxu1 %v2683_v28 }
 0x239   : > { %2383 = vmatmul.mubr.msk.f32.vlgmr.msra.gmra.mrb[4].mxu1 %vm776_vm6, %v2382_v51 }
 0x23a   : > { %2495 = vmatpush3.msra.mxu1 %v1877_v45  ;;  %2496 = vmatprep.mubr.msk.f32.mxu1 %vm2686_vm4, %v2683_v28 }
 0x23b   : > { %2048 = vmatprep.subr.mxu1 %v2041_v54 }
 0x23d   : > { %2497 = vmatmul.mubr.msk.f32.vlgmr.msra.gmra.mrb[6].mxu1 %vm776_vm6, %v2382_v51 }
 0x23e   : > { %2049 = vmatpush1.msra.mxu1 %v2040_v56  ;;  %2112 = vmatprep.mubr.f32.mxu1 %v2683_v28 }
 0x23f   : > { %2499 = vmatprep.subr.mxu1 %v2683_v28 }
 0x241   : > { %2386 = vmatmul.mubr.msk.f32.vlgmr.msra.gmra.mrb[4].mxu1 %vm776_vm6, %v2385_v57 }
 0x242   : > { %2500 = vmatpush3.msra.mxu1 %v2038_v52  ;;  %2501 = vmatprep.mubr.msk.f32.mxu1 %vm2686_vm4, %v2683_v28 }
 0x245   : > { %2502 = vmatmul.mubr.msk.f32.vlgmr.msra.gmra.mrb[6].mxu1 %vm776_vm6, %v2385_v57 }
 0x314   : > { %v2114_v2 = vpop.f32.mrb[4].mxu1 }
 0x315   : > { %2192 = vst [vmem:[%s318_s26] sm:$0xff] %v2114_v2  ;;  %v2212_v28 = vmul.f32 %v2200_v63, %v2114_v2  ;;  %v2116_v3 = vpop.f32.mrb[5].mxu1 }
 0x316   : > { %2193 = vst [vmem:[%s318_s26 + $0x8] sm:$0xff] %v2116_v3  ;;  %v2213_v5 = vmul.f32 %v2204_v1, %v2116_v3 }
 0x317   : > { %v2222_v7 = vmul.f32 %v2212_v28, %v2114_v2 }
 0x318   : > { %v2223_v8 = vmul.f32 %v2213_v5, %v2116_v3  ;;  %v2185_v9 = vpop.f32.mrb[6].mxu1  ;;  %v2215_v10 = vadd.f32 %v2213_v5, %v2212_v28 }
 0x319   : > { %2194 = vst.msk [vmem:[%s318_s26 + $0x10] sm:$0xff] %vm462_vm3, %v2185_v9  ;;  %v2214_v11 = vmul.f32 %v2208_v4, %v2185_v9  ;;  %v2503_v12 = vpop.f32.mrb[7].mxu1 }
 0x31a   : > { %v2225_v13 = vadd.f32 %v2223_v8, %v2222_v7 }
 0x31b   : > { %v2224_v14 = vmul.f32 %v2214_v11, %v2185_v9  ;;  %v2216_v15 = vsel %vm462_vm3, %v2214_v11, 0.0 }
 0x31c   : > { %v2217_v16 = vadd.f32 %v2216_v15, %v2215_v10 }
 0x31d   : > { %v2226_v17 = vsel %vm462_vm3, %v2224_v14, 0.0 }
 0x31e   : > { %2218 = vadd.xlane.f32.xlu0 %v2217_v16  ;;  %v2227_v18 = vadd.f32 %v2226_v17, %v2225_v13 }
 0x320   : > { %2228 = vadd.xlane.f32.xlu1 %v2227_v18 }
 0x3ab   : > { %v2219_v19 = vpop.xlane.xlu0 %2218 }
 0x3ac   : > { %2221 = vst.msk [vmem:[%s322_s9] sm:$0xff] %vm2220_vm14, %v2219_v19 }
 0x3ad   : > { %v2229_v20 = vpop.xlane.xlu1 %2228 }
 0x3ae   : > { %2230 = vst.msk [vmem:[%s326_s12] sm:$0xff] %vm2220_vm14, %v2229_v20 }
 0x3af PF: > { %s19_s27 = sadd.s32 1, %s2680_s27  }
 0x3b0   : > { %p16_p4 = scmp.ge.s32.totalorder %s19_s27, 4  }
 0x3b2   :  { %18 = sbr.rel (!%p16_p4) target bundleno = 1 (0x1), region = 106 }

// kernel: expansion_forward.3
= control target key start
LH: loop header
LB: loop body
LE: loop exit
PB: predicated region body
PF: predicated region fallthrough
CT: control target
= control target key end

     0   :  { %16 = vsyncpa [#allocation3], 0  ;;  %s3928_s0 = inlined_call_operand.vmem [shape: f32[2,4,64], index: 0, kind: input, shape index: {}]   ;;  %s3929_s1 = inlined_call_operand.vmem [shape: f32[2,2,256], index: 1, kind: input, shape index: {}]   ;;  %s3930_s2 = inlined_call_operand.vmem [shape: f32[4,2,4], index: 2, kind: input, shape index: {}]   ;;  %s3931_s3 = inlined_call_operand.vmem [shape: f32[2,1], index: 3, kind: input, shape index: {}]   ;;  %s3932_s4 = inlined_call_operand.hbm [shape: f32[4,64,256], index: 4, kind: input, shape index: {}]   ;;  %s3933_s5 = inlined_call_operand.hbm [shape: f32[256,324], index: 5, kind: input, shape index: {}]   ;;  %s3934_s6 = inlined_call_operand.vmem [shape: f32[9,8,4], index: 6, kind: input, shape index: {}]   ;;  %s3935_s7 = inlined_call_operand.vmem [shape: f32[1,286], index: 7, kind: input, shape index: {}]   ;;  %s3936_s8 = inlined_call_operand.vmem [shape: f32[2,8,286], index: 8, kind: output, shape index: {0}]   ;;  %s3937_s9 = inlined_call_operand.vmem [shape: f32[2,8,1], index: 9, kind: output, shape index: {1}]   ;;  %s3938_s10 = inlined_call_operand.vmem [shape: f32[2,8,1], index: 10, kind: output, shape index: {2}]  }
   0x1   :  { %17 = vsyncpa [#allocation5], 0  ;;  %s3621_s13 = smov 0  }
   0x2 LB: > { %s3549_s14 = smov [#allocation2]   ;;  %s3627_s16 = sadd.s32 4294967295, %s3547_s13   ;;  %s3547_s13 = sphi %s3621_s13, %s23_s13  }
   0x3   : > { %s302_s15 = sshll.u32 %s3549_s14, 4  ;;  %p3023_p0 = scmp.ge.s32.totalorder %s3547_s13, 1  ;;  %s303_s15 = int_to_ptr.vmem [resolvable:$true] %s302_s15 }
   0x4   : > { %p284_p1 = scmp.lt.s32.totalorder %s3547_s13, 3  ;;  %p3939_p3 = scmp.eq.s32.totalorder %s3627_s16, 0 }
   0x5   : > { %s3550_s18 = smov [#allocation4]   ;;  %s3477_s23 = scalar_lea.hbm %s3932_s4, 8192 }
   0x6   : > { %p3631_p2 = pnand %p3023_p0, %p284_p1  ;;  %s315_s19 = sshll.u32 %s3550_s18, 4  ;;  %s3644_s19 = int_to_ptr.vmem [resolvable:$true] %s315_s19 }
   0x7   : > { %p3478_p6 = scmp.ne.s32.totalorder %s3932_s4, %s3477_s23  ;;  %p3484_p10 = scmp.lt.u32.totalorder %s3477_s23, %s3932_s4 }
   0x8   : > { %s3941_s17 = scalar_select %p3631_p2, 1, 0 }
   0x9   : > { %p3440_p4 = pneg %p3631_p2 }
   0xb   : > { %p3640_p5 = pnand %p3939_p3, %p3440_p4 }
   0xd   : > { %p3479_p7 = pneg %p3640_p5 }
   0xf   : > { %p3480_p8 = pnand %p3479_p7, %p3478_p6 }
  0x11   : > { %p3481_p9 = pneg %p3480_p8 }
  0x13   : > { %p3486_p11 = pnand %p3484_p10, %p3481_p9 }
  0x15   : > { %3489 = shalt.err (!%p3486_p11)
}
  0x16   : > { %s3490_s28 = scalar_lea.vmem %s303_s15, 8192  ;;  %p3498_p1 = scmp.lt.s32.totalorder %s303_s15, %s303_s15 }
  0x17   : > { %p3491_p12 = scmp.ne.s32.totalorder %s303_s15, %s3490_s28  ;;  %p3499_p4 = scmp.lt.s32.totalorder %s3490_s28, %s3490_s28 }
  0x19   : > { %p3493_p13 = pnand %p3491_p12, %p3479_p7  ;;  %p3500_p3 = por %p3499_p4, %p3498_p1 }
  0x1b   : > { %p3494_p0 = pneg %p3493_p13 }
  0x1d   : > { %p3501_p2 = pnand %p3500_p3, %p3494_p0 }
  0x1f   : > { %3504 = shalt.err (!%p3501_p2)
}
  0x20   : > { %s3551_s29 = smov 256   ;;  %s3552_s30 = smov 16  }
  0x21   : > { %3443 = dma.hbm_to_vmem [thread:$0]  (!%p3640_p5), %s3932_s4, 8192, %s303_s15, [#allocation3], %s3551_s29, %s3551_s29, %s3552_s30  }
  0x22   : > { %s3505_s21 = scalar_lea.hbm %s3933_s5, 12288 }
  0x23   : > { %p3506_p6 = scmp.ne.s32.totalorder %s3933_s5, %s3505_s21  ;;  %p3512_p8 = scmp.lt.u32.totalorder %s3505_s21, %s3933_s5 }
  0x25   : > { %p3508_p2 = pnand %p3506_p6, %p3479_p7 }
  0x27   : > { %p3509_p3 = pneg %p3508_p2 }
  0x29   : > { %p3514_p9 = pnand %p3512_p8, %p3509_p3 }
  0x2b   : > { %3517 = shalt.err (!%p3514_p9)
}
  0x2c   : > { %s3518_s15 = scalar_lea.vmem %s3644_s19, 12288  ;;  %p3526_p13 = scmp.lt.s32.totalorder %s3644_s19, %s3644_s19 }
  0x2d   : > { %p3519_p10 = scmp.ne.s32.totalorder %s3644_s19, %s3518_s15  ;;  %p3527_p0 = scmp.lt.s32.totalorder %s3518_s15, %s3518_s15 }
  0x2f   : > { %p3521_p11 = pnand %p3519_p10, %p3479_p7  ;;  %p3528_p1 = por %p3527_p0, %p3526_p13 }
  0x31   : > { %p3522_p12 = pneg %p3521_p11 }
  0x33   : > { %p3529_p4 = pnand %p3528_p1, %p3522_p12 }
  0x35   : > { %3532 = shalt.err (!%p3529_p4)
}
  0x36   : > { %s3553_s26 = smov 384   ;;  %s3554_s27 = smov 24  }
  0x37   : > { %3446 = dma.hbm_to_vmem [thread:$0]  (!%p3640_p5), %s3933_s5, 12288, %s3644_s19, [#allocation5], %s3553_s26, %s3553_s26, %s3554_s27  }
  0x38   : > { %p3943_p6 = scmp.ne.s32.totalorder %s3941_s17, 0 }
  0x39   : > { %p3944_p7 = scmp.eq.s32.totalorder (!%p3943_p6), %s3627_s16, 0 }
  0x3a   : > { %352 = sbr.rel (%p3943_p6) target bundleno = 1513 (0x5e9), region = 52 }
  0x41   : > { %3538 = dma.done.wait (%p3944_p7), [#allocation3], 8192   ;;  %p3945_p2 = pmov %p3944_p7 }
  0x43   : > { %3540 = vsyncadd (%p3945_p2), [#allocation3], 4294959104  ;;  %p3946_p3 = pmov %p3945_p2 }
  0x44   : > { %p3947_p8 = pmov %p3945_p2 }
  0x45   : > { %3542 = dma.done.wait (%p3946_p3), [#allocation5], 12288  }
  0x46   : > { %3544 = vsyncadd (%p3947_p8), [#allocation5], 4294955008  ;;  %p406_p9 = scmp.lt.s32.totalorder %s3627_s16, 1  ;;  %v3555_v0 = vmov 0.0   ;;  %vm3556_vm0 = vmmov 0   ;;  %vm435_vm1 = vcmask 1043456  }
  0x47   : > { %3169 = vmatprep.subr.mxu0 %v3555_v0  ;;  %3171 = vmatprep.mubr.msk.f32.mxu0 %vm3556_vm0, %v3555_v0  ;;  %vm431_vm2 = vcmask 31744   ;;  %v430_v2 = vld [vmem:[%s3930_s2] sm:$0x3]  ;;  %v602_v3 = vld [vmem:[#allocation2 + $0x88] sm:$0xff]  ;;  %v604_v4 = vld [vmem:[#allocation2 + $0x98] sm:$0xff]  ;;  %vm617_vm3 = vcmask 523264  }
  0x48   : > { %s3949_s16 = smov (!%p406_p9, %s3627_s16), 1  ;;  %3184 = vmatprep.subr.mxu1 %v3555_v0  ;;  %3186 = vmatprep.mubr.msk.f32.mxu1 %vm3556_vm0, %v3555_v0  ;;  %v601_v5 = vld [vmem:[#allocation2 + $0x80] sm:$0xff]  ;;  %v3234_v6 = vpack.c.bf16 %v604_v4, %v602_v3  ;;  %v603_v7 = vld [vmem:[#allocation2 + $0x90] sm:$0xff]  ;;  %v606_v8 = vld [vmem:[#allocation2 + $0xa8] sm:$0xff]  ;;  %vm1127_vm4 = vcmask 1041408   ;;  %s3558_s29 = smov 126  }
  0x49   : > { %s3030_s17 = sshll.u32 %s3949_s16, 2  ;;  %v608_v9 = vld [vmem:[#allocation2 + $0xb8] sm:$0xff]  ;;  %v3038_v10 = vld [vmem:[%s3930_s2 + $0x2] sm:$0x3]  ;;  %v3236_v11 = vpack.c.bf16 %v603_v7, %v601_v5  ;;  %v607_v14 = vld [vmem:[#allocation2 + $0xb0] sm:$0xff]  ;;  %s3560_s19 = smov 109  }
  0x4a   : > { %s409_s30 = scalar_lea.vmem %s3928_s0, %s3030_s17  ;;  %v3238_v12 = vpack.c.bf16 %v608_v9, %v606_v8  ;;  %v605_v13 = vld [vmem:[#allocation2 + $0xa0] sm:$0xff]  ;;  %v610_v15 = vld [vmem:[#allocation2 + $0xc8] sm:$0xff]  ;;  %v612_v16 = vld [vmem:[#allocation2 + $0xd8] sm:$0xff]  ;;  %s414_s28 = scalar_lea.vmem %s3929_s1, %s3030_s17  ;;  %vm1690_vm5 = vcmask 1031168   ;;  %vm1854_vm6 = vcmask 900096   ;;  %vm2018_vm7 = vcmask 891904  }
  0x4b   : > { %v3719_v1 = vld [vmem:[%s409_s30] sm:$0xf]  ;;  %v3240_v17 = vpack.c.bf16 %v607_v14, %v605_v13  ;;  %v3242_v18 = vpack.c.bf16 %v612_v16, %v610_v15  ;;  %v611_v20 = vld [vmem:[#allocation2 + $0xd0] sm:$0xff]  ;;  %v614_v22 = vld [vmem:[#allocation2 + $0xe8] sm:$0xff]  ;;  %s3559_s17 = smov 110   ;;  %s3561_s20 = smov 108  }
  0x4c   : > { %3170 = vmatpush3.msk.msra.mxu0 %vm435_vm1, %v3719_v1  ;;  %3185 = vmatpush3.msk.msra.mxu1 %vm435_vm1, %v3719_v1  ;;  %v609_v19 = vld [vmem:[#allocation2 + $0xc0] sm:$0xff]  ;;  %v616_v23 = vld [vmem:[#allocation2 + $0xf8] sm:$0xff]  ;;  %v615_v26 = vld [vmem:[#allocation2 + $0xf0] sm:$0xff]  ;;  %s3562_s30 = smov 92   ;;  %s3563_s11 = smov 127   ;;  %vm2182_vm8 = vcmask 883712  }
  0x4d   : > { %3172 = vmatmul.mubr.msk.f32.vlgmr.msra.gmra.mrb[0].mxu0 %vm431_vm2, %v430_v2  ;;  %3174 = vmatprep.subr.mxu0 %v3555_v0  ;;  %v3244_v21 = vpack.c.bf16 %v611_v20, %v609_v19  ;;  %v3246_v24 = vpack.c.bf16 %v616_v23, %v614_v22  ;;  %v613_v25 = vld [vmem:[#allocation2 + $0xe0] sm:$0xff]  ;;  %v510_v28 = vld [vmem:[#allocation2 + $0x8] sm:$0xff]  ;;  %v512_v29 = vld [vmem:[#allocation2 + $0x18] sm:$0xff]  ;;  %s3564_s12 = smov 91   ;;  %s3565_s14 = smov 90   ;;  %vm2346_vm9 = vcmask 752640  }
  0x4e   : > { %3175 = vmatpush3.msk.msra.mxu0 %vm435_vm1, %v3719_v1  ;;  %3176 = vmatprep.mubr.msk.f32.mxu0 %vm3556_vm0, %v3555_v0  ;;  %v3248_v27 = vpack.c.bf16 %v615_v26, %v613_v25  ;;  %v3250_v30 = vpack.c.bf16 %v512_v29, %v510_v28  ;;  %v3047_v31 = vld [vmem:[%s3930_s2 + $0x6] sm:$0x3]  ;;  %v511_v33 = vld [vmem:[#allocation2 + $0x10] sm:$0xff]  ;;  %v514_v35 = vld [vmem:[#allocation2 + $0x28] sm:$0xff]  ;;  %vm1379_vm10 = vcmask 1039360   ;;  %vm2510_vm11 = vcmask 744448  }
  0x4f   : > { %3235 = vmatprep.subr.bf16.mxu0 %v3234_v6  ;;  %3187 = vmatmul.mubr.msk.f32.vlgmr.msra.gmra.mrb[0].mxu1 %vm431_vm2, %v3047_v31  ;;  %v509_v32 = vld [vmem:[#allocation2] sm:$0xff]  ;;  %v516_v36 = vld [vmem:[#allocation2 + $0x38] sm:$0xff]  ;;  %v515_v41 = vld [vmem:[#allocation2 + $0x30] sm:$0xff]  ;;  %vm2674_vm12 = vcmask 736256   ;;  %s3431_s18 = smul.u32 24, %s3949_s16  ;;  %vm2832_vm13 = vcmask 244736  }
  0x50   : > { %v3252_v38 = vpack.c.bf16 %v511_v33, %v509_v32  ;;  %v3254_v39 = vpack.c.bf16 %v516_v36, %v514_v35  ;;  %v513_v40 = vld [vmem:[#allocation2 + $0x20] sm:$0xff]  ;;  %v518_v43 = vld [vmem:[#allocation2 + $0x48] sm:$0xff]  ;;  %v520_v44 = vld [vmem:[#allocation2 + $0x58] sm:$0xff]  ;;  %s3034_s15 = sshll.u32 %s3949_s16, 3  ;;  %vm2859_vm14 = vcmask 7168  }
  0x51   : > { %3177 = vmatmul.mubr.msk.f32.vlgmr.msra.gmra.mrb[2].mxu0 %vm431_vm2, %v3038_v10  ;;  %v3256_v46 = vpack.c.bf16 %v515_v41, %v513_v40  ;;  %v3258_v47 = vpack.c.bf16 %v520_v44, %v518_v43  ;;  %v517_v48 = vld [vmem:[#allocation2 + $0x40] sm:$0xff]  ;;  %v519_v49 = vld [vmem:[#allocation2 + $0x50] sm:$0xff]  ;;  %v522_v50 = vld [vmem:[#allocation2 + $0x68] sm:$0xff]  ;;  %s419_s25 = scalar_lea.vmem %s3936_s8, %s3431_s18 }
  0x52   : > { %3237 = vmatpush1.bf16.msra.mxu0 %v3236_v11  ;;  %685 = vmatprep.mubr.f32.mxu0 %v3555_v0  ;;  %v524_v51 = vld [vmem:[#allocation2 + $0x78] sm:$0xff]  ;;  %v3260_v52 = vpack.c.bf16 %v519_v49, %v517_v48  ;;  %v521_v54 = vld [vmem:[#allocation2 + $0x60] sm:$0xff]  ;;  %v523_v55 = vld [vmem:[#allocation2 + $0x70] sm:$0xff] }
  0x53   : > { %3239 = vmatprep.subr.bf16.mxu0 %v3238_v12  ;;  %v3262_v53 = vpack.c.bf16 %v524_v51, %v522_v50  ;;  %v3264_v56 = vpack.c.bf16 %v523_v55, %v521_v54  ;;  %v843_v57 = vld [vmem:[#allocation2 + $0x108] sm:$0xff]  ;;  %v845_v58 = vld [vmem:[#allocation2 + $0x118] sm:$0xff]  ;;  %v842_v60 = vld [vmem:[#allocation2 + $0x100] sm:$0xff] }
  0x54   : > { %v3266_v59 = vpack.c.bf16 %v845_v58, %v843_v57  ;;  %v844_v61 = vld [vmem:[#allocation2 + $0x110] sm:$0xff]  ;;  %v847_v62 = vld [vmem:[#allocation2 + $0x128] sm:$0xff]  ;;  %v849_v63 = vld [vmem:[#allocation2 + $0x138] sm:$0xff] }
  0x55   : > { %v3043_v2 = vld [vmem:[%s3930_s2 + $0x4] sm:$0x3]  ;;  %v3268_v3 = vpack.c.bf16 %v844_v61, %v842_v60  ;;  %v3270_v4 = vpack.c.bf16 %v849_v63, %v847_v62  ;;  %v848_v6 = vld [vmem:[#allocation2 + $0x130] sm:$0xff]  ;;  %v851_v7 = vld [vmem:[#allocation2 + $0x148] sm:$0xff] }
  0x56   : > { %3241 = vmatpush1.bf16.msra.mxu0 %v3240_v17  ;;  %v846_v5 = vld [vmem:[#allocation2 + $0x120] sm:$0xff]  ;;  %v853_v8 = vld [vmem:[#allocation2 + $0x158] sm:$0xff]  ;;  %v852_v11 = vld [vmem:[#allocation2 + $0x150] sm:$0xff] }
  0x57   : > { %3243 = vmatprep.subr.bf16.mxu0 %v3242_v18  ;;  %v3272_v9 = vpack.c.bf16 %v848_v6, %v846_v5  ;;  %v850_v10 = vld [vmem:[#allocation2 + $0x140] sm:$0xff]  ;;  %v855_v12 = vld [vmem:[#allocation2 + $0x168] sm:$0xff]  ;;  %v857_v13 = vld [vmem:[#allocation2 + $0x178] sm:$0xff] }
  0x58   : > { %v3276_v14 = vpack.c.bf16 %v852_v11, %v850_v10  ;;  %v3278_v15 = vpack.c.bf16 %v857_v13, %v855_v12  ;;  %v854_v16 = vld [vmem:[#allocation2 + $0x160] sm:$0xff]  ;;  %v856_v17 = vld [vmem:[#allocation2 + $0x170] sm:$0xff]  ;;  %v1011_v19 = vld [vmem:[#allocation2 + $0x188] sm:$0xff] }
  0x59   : > { %v3280_v18 = vpack.c.bf16 %v856_v17, %v854_v16  ;;  %v1013_v20 = vld [vmem:[#allocation2 + $0x198] sm:$0xff]  ;;  %v1131_v25 = vld [vmem:[#allocation4 + $0x8] sm:$0xff]  ;;  %v1134_v26 = vld [vmem:[#allocation4 + $0x20] sm:$0xff] }
  0x5a   : > { %3245 = vmatpush1.bf16.msra.mxu0 %v3244_v21  ;;  %v3282_v21 = vpack.c.bf16 %v1013_v20, %v1011_v19  ;;  %v3298_v28 = vpack.c.bf16 %v1134_v26, %v1131_v25  ;;  %v1130_v29 = vld [vmem:[#allocation4] sm:$0xff]  ;;  %v1137_v31 = vld [vmem:[#allocation4 + $0x38] sm:$0xff]  ;;  %v1140_v33 = vld [vmem:[#allocation4 + $0x50] sm:$0xff] }
  0x5b   : > { %3247 = vmatprep.subr.bf16.mxu0 %v3246_v24  ;;  %v1102_v24 = vld [vmem:[%s3931_s3] sm:$0x3]  ;;  %v1139_v35 = vld [vmem:[#allocation4 + $0x48] sm:$0xff]  ;;  %v3302_v36 = vpack.c.bf16 %v1140_v33, %v1137_v31  ;;  %v1149_v43 = vld [vmem:[#allocation4 + $0x98] sm:$0xff] }
  0x5c   : > { %3299 = vmatprep.subr.bf16.mxu1 %v3298_v28  ;;  %v1142_v41 = vld [vmem:[#allocation4 + $0x60] sm:$0xff]  ;;  %v1152_v44 = vld [vmem:[#allocation4 + $0xb0] sm:$0xff]  ;;  %v1151_v48 = vld [vmem:[#allocation4 + $0xa8] sm:$0xff] }
  0x5d   : > { %v1155_v49 = vld [vmem:[#allocation4 + $0xc8] sm:$0xff]  ;;  %v1158_v50 = vld [vmem:[#allocation4 + $0xe0] sm:$0xff]  ;;  %v1157_v54 = vld [vmem:[#allocation4 + $0xd8] sm:$0xff] }
  0x5e   : > { %3249 = vmatpush1.bf16.msra.mxu0 %v3248_v27  ;;  %v3557_v27 = vmov 0   ;;  %v1161_v55 = vld [vmem:[#allocation4 + $0xf8] sm:$0xff]  ;;  %v1163_v60 = vld [vmem:[#allocation4 + $0x108] sm:$0xff]  ;;  %v1170_v62 = vld [vmem:[#allocation4 + $0x140] sm:$0xff] }
  0x5f   : > { %3251 = vmatprep.subr.bf16.mxu0 %v3250_v30  ;;  %3476 = vset.pattern.permute.xlu0 %v3557_v27  ;;  %v1133_v30 = vld [vmem:[#allocation4 + $0x18] sm:$0xff]  ;;  %v1167_v61 = vld [vmem:[#allocation4 + $0x128] sm:$0xff]  ;;  %v1176_v6 = vld [vmem:[#allocation4 + $0x170] sm:$0xff] }
  0x60   : > { %1105 = vperm.xlu0 %3476, %v1102_v24   ;;  %v3300_v32 = vpack.c.bf16 %v1133_v30, %v1130_v29  ;;  %v1173_v5 = vld [vmem:[#allocation4 + $0x158] sm:$0xff]  ;;  %v1179_v10 = vld [vmem:[#allocation4 + $0x188] sm:$0xff]  ;;  %v1182_v11 = vld [vmem:[#allocation4 + $0x1a0] sm:$0xff] }
  0x61   : > { %v3330_v13 = vpack.c.bf16 %v1182_v11, %v1179_v10  ;;  %v1185_v16 = vld [vmem:[#allocation4 + $0x1b8] sm:$0xff]  ;;  %v1188_v17 = vld [vmem:[#allocation4 + $0x1d0] sm:$0xff]  ;;  %v1194_v24 = vld [vmem:[#allocation4 + $0x200] sm:$0xff] }
  0x62   : > { %3301 = vmatpush1.bf16.msra.mxu1 %v3300_v32  ;;  %v3334_v19 = vpack.c.bf16 %v1188_v17, %v1185_v16  ;;  %v1184_v20 = vld [vmem:[#allocation4 + $0x1b0] sm:$0xff]  ;;  %v1190_v27 = vld [vmem:[#allocation4 + $0x1e0] sm:$0xff]  ;;  %v1193_v28 = vld [vmem:[#allocation4 + $0x1f8] sm:$0xff] }
  0x63   : > { %3303 = vmatprep.subr.bf16.mxu1 %v3302_v36  ;;  %v1197_v29 = vld [vmem:[#allocation4 + $0x218] sm:$0xff]  ;;  %v1200_v30 = vld [vmem:[#allocation4 + $0x230] sm:$0xff]  ;;  %v3340_v31 = vpack.c.bf16 %v1193_v28, %v1190_v27  ;;  %v1206_v36 = vld [vmem:[#allocation4 + $0x260] sm:$0xff] }
  0x64   : > { %v3342_v32 = vpack.c.bf16 %v1200_v30, %v1197_v29  ;;  %v1196_v33 = vld [vmem:[#allocation4 + $0x210] sm:$0xff]  ;;  %v1138_v17 = vld [vmem:[#allocation4 + $0x40] sm:$0xff]  ;;  %v1201_v27 = vld [vmem:[#allocation4 + $0x238] sm:$0xff] }
  0x65   : > { %v1132_v11 = vld [vmem:[#allocation4 + $0x10] sm:$0xff]  ;;  %v1150_v30 = vld [vmem:[#allocation4 + $0xa0] sm:$0xff] }
 0x120   : > { %v505_v34 = vpop.f32.mrb[0].mxu0 }
 0x121   : > { %v3173_v37 = vpop.f32.mrb[1].mxu0 }
 0x122   : > { %v3756_v22 = vpop.f32.mrb[0].mxu1  ;;  %v1143_v37 = vld [vmem:[#allocation4 + $0x68] sm:$0xff] }
 0x123   : > { %v3188_v23 = vpop.f32.mrb[1].mxu1 }
 0x124   : > { %v596_v42 = vpop.f32.mrb[2].mxu0  ;;  %v1191_v23 = vld [vmem:[#allocation4 + $0x1e8] sm:$0xff] }
 0x125   : > { %v3178_v45 = vpop.f32.mrb[3].mxu0  ;;  %3041 = vmatmul.mubr.msk.f32.vlgmr.msra.gmra.mrb[4].mxu0 %vm617_vm3, %v596_v42  ;;  %v1145_v42 = vld [vmem:[#allocation4 + $0x78] sm:$0xff]  ;;  %v3338_v26 = vpack.c.bf16 %v1194_v24, %v1191_v23  ;;  %v1144_v24 = vld [vmem:[#allocation4 + $0x70] sm:$0xff] }
 0x126   : > { %3253 = vmatpush1.bf16.msra.mxu0 %v3252_v38  ;;  %759 = vmatprep.mubr.f32.mxu0 %v3555_v0  ;;  %v1146_v38 = vld [vmem:[#allocation4 + $0x80] sm:$0xff]  ;;  %v3308_v45 = vpack.c.bf16 %v1145_v42, %v1142_v41  ;;  %v1209_v41 = vld [vmem:[#allocation4 + $0x278] sm:$0xff]  ;;  %v1212_v42 = vld [vmem:[#allocation4 + $0x290] sm:$0xff] }
 0x127   : > { %3255 = vmatprep.subr.bf16.mxu0 %v3254_v39  ;;  %v3306_v40 = vpack.c.bf16 %v1146_v38, %v1143_v37 }
 0x12a   : > { %3257 = vmatpush1.bf16.msra.mxu0 %v3256_v46  ;;  %v3310_v46 = vpack.c.bf16 %v1152_v44, %v1149_v43  ;;  %v3350_v44 = vpack.c.bf16 %v1212_v42, %v1209_v41  ;;  %v1162_v41 = vld [vmem:[#allocation4 + $0x100] sm:$0xff]  ;;  %v1165_v42 = vld [vmem:[#allocation4 + $0x118] sm:$0xff] }
 0x12b   : > { %3259 = vmatprep.subr.bf16.mxu0 %v3258_v47  ;;  %v1148_v47 = vld [vmem:[#allocation4 + $0x90] sm:$0xff] }
 0x12c   : > { %v3312_v51 = vpack.c.bf16 %v1151_v48, %v1148_v47  ;;  %v1010_v48 = vld [vmem:[#allocation2 + $0x180] sm:$0xff] }
 0x12e   : > { %3261 = vmatpush1.bf16.msra.mxu0 %v3260_v52  ;;  %v3314_v52 = vpack.c.bf16 %v1158_v50, %v1155_v49  ;;  %v1012_v49 = vld [vmem:[#allocation2 + $0x190] sm:$0xff]  ;;  %v1015_v50 = vld [vmem:[#allocation2 + $0x1a8] sm:$0xff] }
 0x12f   : > { %3263 = vmatprep.subr.bf16.mxu0 %v3262_v53  ;;  %v1154_v53 = vld [vmem:[#allocation4 + $0xc0] sm:$0xff] }
 0x130   : > { %v3316_v57 = vpack.c.bf16 %v1157_v54, %v1154_v53  ;;  %v1014_v54 = vld [vmem:[#allocation2 + $0x1a0] sm:$0xff] }
 0x132   : > { %3265 = vmatpush1.bf16.msra.mxu0 %v3264_v56  ;;  %v1164_v56 = vld [vmem:[#allocation4 + $0x110] sm:$0xff] }
 0x133   : > { %3179 = vmatprep.subr.mxu0 %v3555_v0  ;;  %v3318_v58 = vpack.c.bf16 %v1164_v56, %v1161_v55  ;;  %v1016_v55 = vld [vmem:[#allocation2 + $0x1b0] sm:$0xff] }
 0x135   : > { %3042 = vmatmul.mubr.msk.f32.vlgmr.msra.gmra.mrb[4].mxu0 %vm617_vm3, %v505_v34  ;;  %v1136_v34 = vld [vmem:[#allocation4 + $0x30] sm:$0xff] }
 0x136   : > { %3180 = vmatpush3.msk.msra.mxu0 %vm435_vm1, %v3719_v1  ;;  %3181 = vmatprep.mubr.msk.f32.mxu0 %vm3556_vm0, %v3555_v0  ;;  %v3274_v1 = vpack.c.bf16 %v853_v8, %v851_v7  ;;  %v3304_v39 = vpack.c.bf16 %v1139_v35, %v1136_v34  ;;  %v3326_v8 = vpack.c.bf16 %v1176_v6, %v1173_v5  ;;  %v1199_v34 = vld [vmem:[#allocation4 + $0x228] sm:$0xff]  ;;  %v1022_v6 = vld [vmem:[#allocation2 + $0x1e0] sm:$0xff] }
 0x137   : > { %3267 = vmatprep.subr.bf16.mxu0 %v3266_v59  ;;  %v1160_v59 = vld [vmem:[#allocation4 + $0xf0] sm:$0xff]  ;;  %v1203_v35 = vld [vmem:[#allocation4 + $0x248] sm:$0xff]  ;;  %v3344_v37 = vpack.c.bf16 %v1199_v34, %v1196_v33 }
 0x138   : > { %3305 = vmatpush1.bf16.msra.mxu1 %v3304_v39  ;;  %v3320_v63 = vpack.c.bf16 %v1163_v60, %v1160_v59  ;;  %v3346_v38 = vpack.c.bf16 %v1206_v36, %v1203_v35  ;;  %v1202_v39 = vld [vmem:[#allocation4 + $0x240] sm:$0xff]  ;;  %v3288_v60 = vpack.c.bf16 %v1016_v55, %v1014_v54  ;;  %v1207_v33 = vld [vmem:[#allocation4 + $0x268] sm:$0xff]  ;;  %v1156_v35 = vld [vmem:[#allocation4 + $0xd0] sm:$0xff] }
 0x139   : > { %3182 = vmatmul.mubr.msk.f32.vlgmr.msra.gmra.mrb[6].mxu0 %vm431_vm2, %v3043_v2  ;;  %3307 = vmatprep.subr.bf16.mxu1 %v3306_v40  ;;  %v3322_v2 = vpack.c.bf16 %v1170_v62, %v1167_v61  ;;  %v1205_v40 = vld [vmem:[#allocation4 + $0x258] sm:$0xff]  ;;  %v1018_v62 = vld [vmem:[#allocation2 + $0x1c0] sm:$0xff]  ;;  %v1159_v36 = vld [vmem:[#allocation4 + $0xe8] sm:$0xff] }
 0x13a   : > { %3269 = vmatpush1.bf16.msra.mxu0 %v3268_v3  ;;  %925 = vmatprep.mubr.f32.mxu0 %v3555_v0  ;;  %v1166_v3 = vld [vmem:[#allocation4 + $0x120] sm:$0xff]  ;;  %v3348_v43 = vpack.c.bf16 %v1205_v40, %v1202_v39  ;;  %v3380_v39 = vpack.c.bf16 %v1159_v36, %v1156_v35  ;;  %v1171_v54 = vld [vmem:[#allocation4 + $0x148] sm:$0xff] }
 0x13b   : > { %3271 = vmatprep.subr.bf16.mxu0 %v3270_v4  ;;  %v1169_v4 = vld [vmem:[#allocation4 + $0x138] sm:$0xff] }
 0x13c   : > { %3309 = vmatpush1.bf16.msra.mxu1 %v3308_v45  ;;  %v3324_v7 = vpack.c.bf16 %v1169_v4, %v1166_v3  ;;  %v1208_v45 = vld [vmem:[#allocation4 + $0x270] sm:$0xff]  ;;  %v1025_v3 = vld [vmem:[#allocation2 + $0x1f8] sm:$0xff] }
 0x13d   : > { %3311 = vmatprep.subr.bf16.mxu1 %v3310_v46  ;;  %v1211_v46 = vld [vmem:[#allocation4 + $0x288] sm:$0xff] }
 0x13e   : > { %3273 = vmatpush1.bf16.msra.mxu0 %v3272_v9  ;;  %v1172_v9 = vld [vmem:[#allocation4 + $0x150] sm:$0xff]  ;;  %v3352_v47 = vpack.c.bf16 %v1211_v46, %v1208_v45  ;;  %v1218_v45 = vld [vmem:[#allocation4 + $0x2c0] sm:$0xff] }
 0x13f   : > { %3275 = vmatprep.subr.bf16.mxu0 %v3274_v1  ;;  %v1175_v1 = vld [vmem:[#allocation4 + $0x168] sm:$0xff]  ;;  %v1216_v46 = vld [vmem:[#allocation4 + $0x2b0] sm:$0xff] }
 0x140   : > { %3313 = vmatpush1.bf16.msra.mxu1 %v3312_v51  ;;  %v3328_v12 = vpack.c.bf16 %v1175_v1, %v1172_v9  ;;  %v1017_v51 = vld [vmem:[#allocation2 + $0x1b8] sm:$0xff]  ;;  %v1183_v9 = vld [vmem:[#allocation4 + $0x1a8] sm:$0xff] }
 0x141   : > { %3315 = vmatprep.subr.bf16.mxu1 %v3314_v52  ;;  %v3284_v52 = vpack.c.bf16 %v1012_v49, %v1010_v48  ;;  %v3286_v53 = vpack.c.bf16 %v1017_v51, %v1015_v50  ;;  %v1219_v48 = vld [vmem:[#allocation4 + $0x2c8] sm:$0xff]  ;;  %v1214_v49 = vld [vmem:[#allocation4 + $0x2a0] sm:$0xff]  ;;  %v1217_v50 = vld [vmem:[#allocation4 + $0x2b8] sm:$0xff] }
 0x142   : > { %3277 = vmatpush1.bf16.msra.mxu0 %v3276_v14  ;;  %v1178_v14 = vld [vmem:[#allocation4 + $0x180] sm:$0xff]  ;;  %v3386_v51 = vpack.c.bf16 %v1219_v48, %v1216_v46  ;;  %v3081_v48 = vld [vmem:[%s3934_s6 + $0x28] sm:$0xff] }
 0x143   : > { %3279 = vmatprep.subr.bf16.mxu0 %v3278_v15  ;;  %v1181_v15 = vld [vmem:[#allocation4 + $0x198] sm:$0xff] }
 0x144   : > { %3317 = vmatpush1.bf16.msra.mxu1 %v3316_v57  ;;  %v1019_v57 = vld [vmem:[#allocation2 + $0x1c8] sm:$0xff] }
 0x145   : > { %3319 = vmatprep.subr.bf16.mxu1 %v3318_v58  ;;  %v1021_v58 = vld [vmem:[#allocation2 + $0x1d8] sm:$0xff] }
 0x146   : > { %3281 = vmatpush1.bf16.msra.mxu0 %v3280_v18  ;;  %v3332_v18 = vpack.c.bf16 %v1181_v15, %v1178_v14  ;;  %v3290_v61 = vpack.c.bf16 %v1021_v58, %v1019_v57  ;;  %v1189_v14 = vld [vmem:[#allocation4 + $0x1d8] sm:$0xff]  ;;  %v1224_v57 = vld [vmem:[#allocation4 + $0x2f0] sm:$0xff]  ;;  %v1222_v58 = vld [vmem:[#allocation4 + $0x2e0] sm:$0xff] }
 0x147   : > { %3283 = vmatprep.subr.bf16.mxu0 %v3282_v21  ;;  %v1187_v21 = vld [vmem:[#allocation4 + $0x1c8] sm:$0xff] }
 0x148   : > { %3321 = vmatpush1.bf16.msra.mxu1 %v3320_v63  ;;  %v3336_v25 = vpack.c.bf16 %v1187_v21, %v1184_v20  ;;  %v1020_v63 = vld [vmem:[#allocation2 + $0x1d0] sm:$0xff]  ;;  %v1195_v20 = vld [vmem:[#allocation4 + $0x208] sm:$0xff] }
 0x149   : > { %3323 = vmatprep.subr.bf16.mxu1 %v3322_v2  ;;  %v1023_v2 = vld [vmem:[#allocation2 + $0x1e8] sm:$0xff]  ;;  %v3292_v4 = vpack.c.bf16 %v1020_v63, %v1018_v62 }
 0x14a   : > { %v3294_v5 = vpack.c.bf16 %v1025_v3, %v1023_v2  ;;  %v1223_v62 = vld [vmem:[#allocation4 + $0x2e8] sm:$0xff]  ;;  %v1174_v3 = vld [vmem:[#allocation4 + $0x160] sm:$0xff] }
 0x14c   : > { %3325 = vmatpush1.bf16.msra.mxu1 %v3324_v7  ;;  %v1024_v7 = vld [vmem:[#allocation2 + $0x1f0] sm:$0xff] }
 0x14d   : > { %3327 = vmatprep.subr.bf16.mxu1 %v3326_v8  ;;  %v1180_v8 = vld [vmem:[#allocation4 + $0x190] sm:$0xff]  ;;  %v3296_v1 = vpack.c.bf16 %v1024_v7, %v1022_v6  ;;  %v1106_v6 = vpop.permute.xlu0 %1105  ;;  %v3051_v7 = vld.sshfl [vmem:[%s414_s28] sm:$0x33 pattern:$0x76325410]  ;;  %s423_s28 = scalar_lea.vmem %s3937_s9, %s3034_s15 }
 0x14e   : > { %v3362_v10 = vpack.c.bf16 %v1183_v9, %v1180_v8 }
 0x150   : > { %3329 = vmatpush1.bf16.msra.mxu1 %v3328_v12  ;;  %v1135_v12 = vld [vmem:[#allocation4 + $0x28] sm:$0xff] }
 0x151   : > { %3331 = vmatprep.subr.bf16.mxu1 %v3330_v13  ;;  %v1186_v13 = vld [vmem:[#allocation4 + $0x1c0] sm:$0xff]  ;;  %v3364_v15 = vpack.c.bf16 %v1135_v12, %v1132_v11  ;;  %v1118_v11 = vcombine.high %v3051_v7, %v3051_v7 }
 0x152   : > { %v3366_v16 = vpack.c.bf16 %v1189_v14, %v1186_v13 }
 0x154   : > { %3333 = vmatpush1.bf16.msra.mxu1 %v3332_v18  ;;  %v1141_v18 = vld [vmem:[#allocation4 + $0x58] sm:$0xff] }
 0x155   : > { %3335 = vmatprep.subr.bf16.mxu1 %v3334_v19  ;;  %v1192_v19 = vld [vmem:[#allocation4 + $0x1f0] sm:$0xff]  ;;  %v3368_v21 = vpack.c.bf16 %v1141_v18, %v1138_v17 }
 0x156   : > { %v3370_v23 = vpack.c.bf16 %v1195_v20, %v1192_v19 }
 0x158   : > { %3337 = vmatpush1.bf16.msra.mxu1 %v3336_v25  ;;  %v1147_v25 = vld [vmem:[#allocation4 + $0x88] sm:$0xff] }
 0x159   : > { %3339 = vmatprep.subr.bf16.mxu1 %v3338_v26  ;;  %v1198_v26 = vld [vmem:[#allocation4 + $0x220] sm:$0xff]  ;;  %v3372_v28 = vpack.c.bf16 %v1147_v25, %v1144_v24 }
 0x15a   : > { %v3374_v29 = vpack.c.bf16 %v1201_v27, %v1198_v26  ;;  %v3063_v27 = vld [vmem:[%s3934_s6 + $0x10] sm:$0xff] }
 0x15c   : > { %3341 = vmatpush1.bf16.msra.mxu1 %v3340_v31  ;;  %v1153_v31 = vld [vmem:[#allocation4 + $0xb8] sm:$0xff] }
 0x15d   : > { %3343 = vmatprep.subr.bf16.mxu1 %v3342_v32  ;;  %v1204_v32 = vld [vmem:[#allocation4 + $0x250] sm:$0xff]  ;;  %v3376_v34 = vpack.c.bf16 %v1153_v31, %v1150_v30 }
 0x160   : > { %3345 = vmatpush1.bf16.msra.mxu1 %v3344_v37  ;;  %v1210_v37 = vld [vmem:[#allocation4 + $0x280] sm:$0xff] }
 0x161   : > { %3347 = vmatprep.subr.bf16.mxu1 %v3346_v38  ;;  %v1213_v38 = vld [vmem:[#allocation4 + $0x298] sm:$0xff] }
 0x162   : > { %v3382_v40 = vpack.c.bf16 %v1213_v38, %v1210_v37 }
 0x164   : > { %3349 = vmatpush1.bf16.msra.mxu1 %v3348_v43  ;;  %v3384_v43 = vpack.c.bf16 %v1165_v42, %v1162_v41  ;;  %v3075_v41 = vld [vmem:[%s3934_s6 + $0x20] sm:$0xff] }
 0x165   : > { %3351 = vmatprep.subr.bf16.mxu1 %v3350_v44  ;;  %v1215_v44 = vld [vmem:[#allocation4 + $0x2a8] sm:$0xff] }
 0x168   : > { %3353 = vmatpush1.bf16.msra.mxu1 %v3352_v47  ;;  %v3354_v47 = vpack.c.bf16 %v1218_v45, %v1215_v44 }
 0x16a   : > { %3355 = vmatprep.subr.bf16.mxu1 %v3354_v47 }
 0x20c   : > { %v837_v56 = vpop.f32.mrb[6].mxu0 }
 0x20d   : > { %v3183_v59 = vpop.f32.mrb[7].mxu0  ;;  %3046 = vmatmul.mubr.msk.f32.vlgmr.msra.gmra.mrb[4].mxu0 %vm617_vm3, %v837_v56  ;;  %v1221_v56 = vld [vmem:[#allocation4 + $0x2d8] sm:$0xff] }
 0x20e   : > { %3285 = vmatpush1.bf16.msra.mxu0 %v3284_v52  ;;  %1093 = vmatprep.mubr.f32.mxu0 %v3555_v0  ;;  %v3356_v52 = vpack.c.bf16 %v1217_v50, %v1214_v49  ;;  %v3358_v59 = vpack.c.bf16 %v1224_v57, %v1221_v56 }
 0x20f   : > { %3287 = vmatprep.subr.bf16.mxu0 %v3286_v53  ;;  %v1168_v53 = vld [vmem:[#allocation4 + $0x130] sm:$0xff] }
 0x210   : > { %v3388_v55 = vpack.c.bf16 %v1171_v54, %v1168_v53  ;;  %3357 = vmatpush1.bf16.msra.mxu1 %v3356_v52  ;;  %v3052_v54 = vld [vmem:[%s3934_s6 + $0x8] sm:$0xff] }
 0x211   : > { %3359 = vmatprep.subr.bf16.mxu1 %v3358_v59 }
 0x212   : > { %3289 = vmatpush1.bf16.msra.mxu0 %v3288_v60  ;;  %v1225_v60 = vld [vmem:[#allocation4 + $0x2f8] sm:$0xff] }
 0x213   : > { %3291 = vmatprep.subr.bf16.mxu0 %v3290_v61  ;;  %v1220_v61 = vld [vmem:[#allocation4 + $0x2d0] sm:$0xff]  ;;  %v3390_v63 = vpack.c.bf16 %v1225_v60, %v1222_v58 }
 0x214   : > { %v3360_v2 = vpack.c.bf16 %v1223_v62, %v1220_v61  ;;  %v3087_v58 = vld [vmem:[%s3934_s6 + $0x30] sm:$0xff]  ;;  %v1367_v62 = vld [vmem:[%s3934_s6] sm:$0xff] }
 0x216   : > { %3293 = vmatpush1.bf16.msra.mxu0 %v3292_v4  ;;  %v1177_v4 = vld [vmem:[#allocation4 + $0x178] sm:$0xff]  ;;  %3361 = vmatpush1.bf16.msra.mxu1 %v3360_v2 }
 0x217   : > { %3295 = vmatprep.subr.bf16.mxu0 %v3294_v5  ;;  %v3392_v5 = vpack.c.bf16 %v1177_v4, %v1174_v3  ;;  %v3093_v2 = vld [vmem:[%s3934_s6 + $0x38] sm:$0xff] }
 0x21a   : > { %3297 = vmatpush1.bf16.msra.mxu0 %v3296_v1 }
 0x21b   : > { %3363 = vmatprep.subr.bf16.mxu0 %v3362_v10 }
 0x21d   : > { %3050 = vmatmul.mubr.msk.f32.vlgmr.msra.gmra.mrb[4].mxu0 %vm617_vm3, %v3756_v22  ;;  %v3378_v22 = vpack.c.bf16 %v1207_v33, %v1204_v32 }
 0x21e   : > { %3365 = vmatpush3.bf16.msra.mxu0 %v3364_v15 }
 0x21f   : > { %3367 = vmatprep.subr.bf16.mxu0 %v3366_v16 }
 0x222   : > { %3369 = vmatpush3.bf16.msra.mxu0 %v3368_v21 }
 0x223   : > { %3371 = vmatprep.subr.bf16.mxu0 %v3370_v23 }
 0x226   : > { %3373 = vmatpush3.bf16.msra.mxu0 %v3372_v28 }
 0x227   : > { %3375 = vmatprep.subr.bf16.mxu0 %v3374_v29 }
 0x22a   : > { %3377 = vmatpush3.bf16.msra.mxu0 %v3376_v34 }
 0x22b   : > { %3379 = vmatprep.subr.bf16.mxu0 %v3378_v22  ;;  %v3069_v22 = vld [vmem:[%s3934_s6 + $0x18] sm:$0xff] }
 0x22e   : > { %3381 = vmatpush3.bf16.msra.mxu0 %v3380_v39 }
 0x22f   : > { %3383 = vmatprep.subr.bf16.mxu0 %v3382_v40 }
 0x232   : > { %3385 = vmatpush3.bf16.msra.mxu0 %v3384_v43 }
 0x233   : > { %3387 = vmatprep.subr.bf16.mxu0 %v3386_v51 }
 0x236   : > { %3389 = vmatpush3.bf16.msra.mxu0 %v3388_v55 }
 0x237   : > { %3391 = vmatprep.subr.bf16.mxu0 %v3390_v63 }
 0x23a   : > { %3393 = vmatpush3.bf16.msra.mxu0 %v3392_v5 }
 0x2f0   : > { %v1095_v8 = vpop.f32.mrb[4].mxu0 }
 0x2f1   : > { %v1108_v9 = vadd.f32 %v1106_v6, %v1095_v8  ;;  %v1097_v1 = vpop.f32.mrb[5].mxu0  ;;  %v2836_v8 = vlaneseq }
 0x2f2   : > { %v1109_v10 = vadd.f32 %v1106_v6, %v1097_v1 }
 0x2f3   : > { %v1123_v12 = vrot.slane %v1108_v9, 6 }
 0x2f4   : > { %v1124_v13 = vrot.slane %v1109_v10, 6  ;;  %v2837_v10 = vshrl.u32 %v2836_v8, 7 }
 0x2f5   : > { %v1128_v14 = vsel %vm1127_vm4, %v3051_v7, %v1123_v12  ;;  %v3099_v7 = vld [vmem:[%s3934_s6 + $0x40] sm:$0xff] }
 0x2f6   : > { %v1129_v15 = vsel %vm1127_vm4, %v1118_v11, %v1124_v13  ;;  %v2838_v13 = vsub.s32 0, %v2837_v10 }
 0x2f7   : > { %1290 = vmatprep.mubr.f32.mxu1 %v1129_v15  ;;  %1361 = vmatprep.mubr.f32.mxu0 %v1129_v15  ;;  %v2842_v15 = vsub.s32 1, %v2837_v10 }
 0x2f8   : > { %1291 = vmatmul.mubr.f32.vlgmr.msra.gmra.mrb[2].mxu1 %v1128_v14  ;;  %1362 = vmatmul.mubr.f32.vlgmr.msra.gmra.mrb[8].mxu0 %v1128_v14  ;;  %v2834_v14 = vld [vmem:[%s3935_s7] sm:$0x7] }
 0x2f9   : > { %1766 = vmatprep.mubr.f32.mxu1 %v3555_v0  ;;  %1455 = vmatprep.mubr.f32.mxu0 %v3555_v0 }
 0x3cb   : > { %v3772_v16 = vpop.f32.mrb[2].mxu1  ;;  %v3148_v17 = vpop.f32.mrb[8].mxu0 }
 0x3cc   : > { %v3774_v18 = vpop.f32.mrb[3].mxu1  ;;  %v3149_v19 = vpop.f32.mrb[9].mxu0 }
 0x3cd   : > { %v3776_v20 = vadd.f32 %v3149_v19, %v3148_v17  ;;  %1686 = vrot.lane.b32.xlu0 %v3774_v18, %s3558_s29  ;;  %v2846_v17 = vsub.s32 2, %v2837_v10 }
 0x3cf   : > { %1688 = vrot.lane.b32.xlu1 %v3776_v20, %s3558_s29 }
 0x3d1   : > { %1850 = vrot.lane.b32.xlu0 %v3774_v18, %s3559_s17 }
 0x3d3   : > { %1684 = vrot.lane.b32.xlu1 %v3772_v16, %s3558_s29 }
 0x3d5   : > { %1848 = vrot.lane.b32.xlu0 %v3772_v16, %s3559_s17 }
 0x3d7   : > { %1852 = vrot.lane.b32.xlu1 %v3776_v20, %s3559_s17 }
 0x3d9   : > { %2016 = vrot.lane.b32.xlu0 %v3776_v20, %s3560_s19 }
 0x3db   : > { %2014 = vrot.lane.b32.xlu1 %v3774_v18, %s3560_s19 }
 0x3dd   : > { %2178 = vrot.lane.b32.xlu0 %v3774_v18, %s3561_s20 }
 0x3df   : > { %2012 = vrot.lane.b32.xlu1 %v3772_v16, %s3560_s19  ;;  %s427_s19 = scalar_lea.vmem %s3938_s10, %s3034_s15 }
 0x3e1   : > { %2176 = vrot.lane.b32.xlu0 %v3772_v16, %s3561_s20 }
 0x3e3   : > { %2180 = vrot.lane.b32.xlu1 %v3776_v20, %s3561_s20 }
 0x3e5   : > { %2344 = vrot.lane.b32.xlu0 %v3776_v20, %s3562_s30 }
 0x3e7   : > { %2342 = vrot.lane.b32.xlu1 %v3774_v18, %s3562_s30 }
 0x3e9   : > { %1375 = vrot.lane.b32.xlu0 %v3774_v18, %s3563_s11 }
 0x3eb   : > { %2340 = vrot.lane.b32.xlu1 %v3772_v16, %s3562_s30 }
 0x3ed   : > { %2506 = vrot.lane.b32.xlu0 %v3774_v18, %s3564_s12 }
 0x3ef   : > { %1377 = vrot.lane.b32.xlu1 %v3776_v20, %s3563_s11 }
 0x3f1   : > { %1373 = vrot.lane.b32.xlu0 %v3772_v16, %s3563_s11 }
 0x3f3   : > { %2508 = vrot.lane.b32.xlu1 %v3776_v20, %s3564_s12 }
 0x3f5   : > { %2670 = vrot.lane.b32.xlu0 %v3774_v18, %s3565_s14 }
 0x3f7   : > { %2504 = vrot.lane.b32.xlu1 %v3772_v16, %s3564_s12 }
 0x3f9   : > { %2668 = vrot.lane.b32.xlu0 %v3772_v16, %s3565_s14 }
 0x3fb   : > { %2672 = vrot.lane.b32.xlu1 %v3776_v20, %s3565_s14 }
 0x43f   : > { %v1687_v21 = vpop.permute.xlu0 %1686 }
 0x441   : > { %v1689_v23 = vpop.permute.xlu1 %1688 }
 0x442   : > { %v1692_v24 = vsel %vm1690_vm5, %v1687_v21, %v1689_v23 }
 0x443   : > { %3064 = vmatprep.subr.msk.mxu1 %vm435_vm1, %v1692_v24  ;;  %v1851_v25 = vpop.permute.xlu0 %1850  ;;  %v2847_v24 = vrot.slane %v2834_v14, %v2846_v17 }
 0x445   : > { %v1685_v26 = vpop.permute.xlu1 %1684 }
 0x446   : > { %v1691_v28 = vsel %vm1690_vm5, %v1685_v26, %v1687_v21 }
 0x447   : > { %3065 = vmatpush1.msk.msra.mxu1 %vm435_vm1, %v1691_v28  ;;  %v1849_v29 = vpop.permute.xlu0 %1848 }
 0x448   : > { %3066 = vmatmul.mubr.msk.f32.vlgmr.msra.gmra.mrb[4].mxu1 %vm431_vm2, %v3063_v27  ;;  %3199 = vmatprep.subr.mxu1 %v3555_v0  ;;  %v1855_v33 = vsel %vm1854_vm6, %v1849_v29, %v1851_v25 }
 0x449   : > { %v1853_v30 = vpop.permute.xlu1 %1852  ;;  %3200 = vmatpush3.msk.msra.mxu1 %vm435_vm1, %v1689_v23  ;;  %3201 = vmatprep.mubr.msk.f32.mxu1 %vm3556_vm0, %v3555_v0 }
 0x44a   : > { %v1856_v31 = vsel %vm1854_vm6, %v1851_v25, %v1853_v30 }
 0x44b   : > { %3070 = vmatprep.subr.msk.mxu1 %vm435_vm1, %v1856_v31  ;;  %v2017_v32 = vpop.permute.xlu0 %2016 }
 0x44c   : > { %3202 = vmatmul.mubr.msk.f32.vlgmr.msra.gmra.mrb[6].mxu1 %vm431_vm2, %v3063_v27 }
 0x44d   : > { %3071 = vmatpush1.msk.msra.mxu1 %vm435_vm1, %v1855_v33  ;;  %v2015_v34 = vpop.permute.xlu1 %2014  ;;  %1930 = vmatprep.mubr.f32.mxu1 %v3555_v0 }
 0x44e   : > { %3204 = vmatprep.subr.mxu1 %v3555_v0  ;;  %v2020_v36 = vsel %vm2018_vm7, %v2015_v34, %v2017_v32 }
 0x44f   : > { %v2179_v35 = vpop.permute.xlu0 %2178 }
 0x450   : > { %3072 = vmatmul.mubr.msk.f32.vlgmr.msra.gmra.mrb[4].mxu1 %vm431_vm2, %v3069_v22 }
 0x451   : > { %3205 = vmatpush3.msk.msra.mxu1 %vm435_vm1, %v1853_v30  ;;  %v2013_v37 = vpop.permute.xlu1 %2012  ;;  %3206 = vmatprep.mubr.msk.f32.mxu1 %vm3556_vm0, %v3555_v0 }
 0x452   : > { %v2019_v38 = vsel %vm2018_vm7, %v2013_v37, %v2015_v34  ;;  %3076 = vmatprep.subr.msk.mxu1 %vm435_vm1, %v2020_v36 }
 0x453   : > { %v2177_v39 = vpop.permute.xlu0 %2176 }
 0x454   : > { %3207 = vmatmul.mubr.msk.f32.vlgmr.msra.gmra.mrb[6].mxu1 %vm431_vm2, %v3069_v22  ;;  %v2183_v46 = vsel %vm2182_vm8, %v2177_v39, %v2179_v35 }
 0x455   : > { %3077 = vmatpush1.msk.msra.mxu1 %vm435_vm1, %v2019_v38  ;;  %v2181_v40 = vpop.permute.xlu1 %2180  ;;  %2094 = vmatprep.mubr.f32.mxu1 %v3555_v0 }
 0x456   : > { %3209 = vmatprep.subr.mxu1 %v3555_v0  ;;  %v2184_v43 = vsel %vm2182_vm8, %v2179_v35, %v2181_v40 }
 0x457   : > { %v2345_v42 = vpop.permute.xlu0 %2344 }
 0x458   : > { %3078 = vmatmul.mubr.msk.f32.vlgmr.msra.gmra.mrb[4].mxu1 %vm431_vm2, %v3075_v41 }
 0x459   : > { %3210 = vmatpush3.msk.msra.mxu1 %vm435_vm1, %v2017_v32  ;;  %v2343_v44 = vpop.permute.xlu1 %2342  ;;  %3211 = vmatprep.mubr.msk.f32.mxu1 %vm3556_vm0, %v3555_v0 }
 0x45a   : > { %3082 = vmatprep.subr.msk.mxu1 %vm435_vm1, %v2184_v43  ;;  %v2348_v50 = vsel %vm2346_vm9, %v2343_v44, %v2345_v42 }
 0x45b   : > { %v1376_v45 = vpop.permute.xlu0 %1375 }
 0x45c   : > { %3212 = vmatmul.mubr.msk.f32.vlgmr.msra.gmra.mrb[6].mxu1 %vm431_vm2, %v3075_v41 }
 0x45d   : > { %3083 = vmatpush1.msk.msra.mxu1 %vm435_vm1, %v2183_v46  ;;  %v2341_v47 = vpop.permute.xlu1 %2340  ;;  %2258 = vmatprep.mubr.f32.mxu1 %v3555_v0 }
 0x45e   : > { %3214 = vmatprep.subr.mxu1 %v3555_v0  ;;  %v2347_v55 = vsel %vm2346_vm9, %v2341_v47, %v2343_v44 }
 0x45f   : > { %v2507_v49 = vpop.permute.xlu0 %2506 }
 0x460   : > { %3084 = vmatmul.mubr.msk.f32.vlgmr.msra.gmra.mrb[4].mxu1 %vm431_vm2, %v3081_v48 }
 0x461   : > { %3215 = vmatpush3.msk.msra.mxu1 %vm435_vm1, %v2181_v40  ;;  %v1378_v51 = vpop.permute.xlu1 %1377  ;;  %3216 = vmatprep.mubr.msk.f32.mxu1 %vm3556_vm0, %v3555_v0 }
 0x462   : > { %v1381_v52 = vsel %vm1379_vm10, %v1376_v45, %v1378_v51  ;;  %3088 = vmatprep.subr.msk.mxu1 %vm435_vm1, %v2348_v50 }
 0x463   : > { %3053 = vmatprep.subr.msk.mxu0 %vm435_vm1, %v1381_v52  ;;  %v1374_v53 = vpop.permute.xlu0 %1373 }
 0x464   : > { %v1380_v56 = vsel %vm1379_vm10, %v1374_v53, %v1376_v45  ;;  %3217 = vmatmul.mubr.msk.f32.vlgmr.msra.gmra.mrb[6].mxu1 %vm431_vm2, %v3081_v48 }
 0x465   : > { %3089 = vmatpush1.msk.msra.mxu1 %vm435_vm1, %v2347_v55  ;;  %v2509_v57 = vpop.permute.xlu1 %2508  ;;  %3054 = vmatpush1.msk.msra.mxu0 %vm435_vm1, %v1380_v56 }
 0x466   : > { %3055 = vmatmul.mubr.msk.f32.vlgmr.msra.gmra.mrb[10].mxu0 %vm431_vm2, %v3052_v54  ;;  %3189 = vmatprep.subr.mxu0 %v3555_v0  ;;  %v2512_v60 = vsel %vm2510_vm11, %v2507_v49, %v2509_v57 }
 0x467   : > { %3190 = vmatpush3.msk.msra.mxu0 %vm435_vm1, %v1378_v51  ;;  %2422 = vmatprep.mubr.f32.mxu1 %v3555_v0  ;;  %v2671_v63 = vpop.permute.xlu0 %2670 }
 0x468   : > { %3219 = vmatprep.subr.mxu1 %v3555_v0  ;;  %3058 = vmatprep.subr.msk.mxu0 %vm435_vm1, %v3774_v18  ;;  %v2843_v18 = vrot.slane %v2834_v14, %v2842_v15 }
 0x469   : > { %3090 = vmatmul.mubr.msk.f32.vlgmr.msra.gmra.mrb[4].mxu1 %vm431_vm2, %v3087_v58  ;;  %v2505_v59 = vpop.permute.xlu1 %2504  ;;  %3191 = vmatprep.mubr.msk.f32.mxu0 %vm3556_vm0, %v3555_v0 }
 0x46a   : > { %3220 = vmatpush3.msk.msra.mxu1 %vm435_vm1, %v2345_v42  ;;  %3192 = vmatmul.mubr.msk.f32.vlgmr.msra.gmra.mrb[12].mxu0 %vm431_vm2, %v3052_v54  ;;  %v2511_v61 = vsel %vm2510_vm11, %v2505_v59, %v2507_v49 }
 0x46b   : > { %3094 = vmatprep.subr.msk.mxu1 %vm435_vm1, %v2512_v60  ;;  %3059 = vmatpush1.msk.msra.mxu0 %vm435_vm1, %v3772_v16  ;;  %v2669_v4 = vpop.permute.xlu0 %2668  ;;  %v2839_v16 = vrot.slane %v2834_v14, %v2838_v13 }
 0x46c   : > { %3221 = vmatprep.mubr.msk.f32.mxu1 %vm3556_vm0, %v3555_v0  ;;  %1605 = vmatprep.mubr.f32.mxu0 %v3555_v0  ;;  %v2675_v6 = vsel %vm2674_vm12, %v2669_v4, %v2671_v63 }
 0x46d   : > { %3222 = vmatmul.mubr.msk.f32.vlgmr.msra.gmra.mrb[6].mxu1 %vm431_vm2, %v3087_v58  ;;  %3194 = vmatprep.subr.mxu0 %v3555_v0  ;;  %v2673_v3 = vpop.permute.xlu1 %2672 }
 0x46e   : > { %3095 = vmatpush1.msk.msra.mxu1 %vm435_vm1, %v2511_v61  ;;  %3060 = vmatmul.mubr.msk.f32.vlgmr.msra.gmra.mrb[10].mxu0 %vm431_vm2, %v1367_v62  ;;  %v2676_v5 = vsel %vm2674_vm12, %v2671_v63, %v2673_v3 }
 0x46f   : > { %3195 = vmatpush3.msk.msra.mxu0 %vm435_vm1, %v3776_v20  ;;  %2586 = vmatprep.mubr.f32.mxu1 %v3555_v0 }
 0x470   : > { %3224 = vmatprep.subr.mxu1 %v3555_v0  ;;  %3196 = vmatprep.mubr.msk.f32.mxu0 %vm3556_vm0, %v3555_v0 }
 0x471   : > { %3096 = vmatmul.mubr.msk.f32.vlgmr.msra.gmra.mrb[4].mxu1 %vm431_vm2, %v3093_v2 }
 0x472   : > { %3225 = vmatpush3.msk.msra.mxu1 %vm435_vm1, %v2509_v57  ;;  %3226 = vmatprep.mubr.msk.f32.mxu1 %vm3556_vm0, %v3555_v0 }
 0x473   : > { %3100 = vmatprep.subr.msk.mxu1 %vm435_vm1, %v2676_v5  ;;  %3197 = vmatmul.mubr.msk.f32.vlgmr.msra.gmra.mrb[12].mxu0 %vm431_vm2, %v1367_v62 }
 0x475   : > { %3227 = vmatmul.mubr.msk.f32.vlgmr.msra.gmra.mrb[6].mxu1 %vm431_vm2, %v3093_v2 }
 0x476   : > { %3101 = vmatpush1.msk.msra.mxu1 %vm435_vm1, %v2675_v6  ;;  %2750 = vmatprep.mubr.f32.mxu1 %v3555_v0 }
 0x477   : > { %3229 = vmatprep.subr.mxu1 %v3555_v0 }
 0x479   : > { %3102 = vmatmul.mubr.msk.f32.vlgmr.msra.gmra.mrb[4].mxu1 %vm431_vm2, %v3099_v7 }
 0x47a   : > { %3230 = vmatpush3.msk.msra.mxu1 %vm435_vm1, %v2673_v3  ;;  %3231 = vmatprep.mubr.msk.f32.mxu1 %vm3556_vm0, %v3555_v0 }
 0x47d   : > { %3232 = vmatmul.mubr.msk.f32.vlgmr.msra.gmra.mrb[6].mxu1 %vm431_vm2, %v3099_v7 }
 0x541   : > { %v1607_v9 = vpop.f32.mrb[10].mxu0 }
 0x542   : > { %v1609_v1 = vpop.f32.mrb[11].mxu0 }
 0x546   : > { %v1678_v11 = vpop.f32.mrb[12].mxu0 }
 0x547   : > { %v3198_v12 = vpop.f32.mrb[13].mxu0 }
 0x54c   : > { %v2752_v0 = vpop.f32.mrb[4].mxu1 }
 0x54d   : > { %v3394_v19 = vadd.f32 %v2752_v0, %v1607_v9  ;;  %v2754_v20 = vpop.f32.mrb[5].mxu1 }
 0x54e   : > { %v3395_v21 = vadd.f32 %v2754_v20, %v1609_v1 }
 0x54f   : > { %2830 = vst [vmem:[%s419_s25] sm:$0xff] %v3394_v19  ;;  %v2851_v23 = vmul.f32 %v3394_v19, %v2839_v16 }
 0x550   : > { %2831 = vst [vmem:[%s419_s25 + $0x8] sm:$0xff] %v3395_v21  ;;  %v2852_v25 = vmul.f32 %v3395_v21, %v2843_v18  ;;  %v2823_v26 = vpop.f32.mrb[6].mxu1 }
 0x551   : > { %v2861_v27 = vmul.f32 %v3394_v19, %v2851_v23  ;;  %v3396_v28 = vadd.f32 %v2823_v26, %v1678_v11  ;;  %v3233_v29 = vpop.f32.mrb[7].mxu1 }
 0x552   : > { %v2862_v30 = vmul.f32 %v3395_v21, %v2852_v25  ;;  %v2854_v31 = vadd.f32 %v2852_v25, %v2851_v23 }
 0x553   : > { %v2853_v32 = vmul.f32 %v3396_v28, %v2847_v24  ;;  %2833 = vst.msk [vmem:[%s419_s25 + $0x10] sm:$0xff] %vm2832_vm13, %v3396_v28 }
 0x554   : > { %v2864_v33 = vadd.f32 %v2862_v30, %v2861_v27 }
 0x555   : > { %v2855_v34 = vsel %vm2832_vm13, %v2853_v32, 0.0  ;;  %v2863_v22 = vmul.f32 %v3396_v28, %v2853_v32 }
 0x556   : > { %v2856_v35 = vadd.f32 %v2855_v34, %v2854_v31 }
 0x557   : > { %v2865_v36 = vsel %vm2832_vm13, %v2863_v22, 0.0 }
 0x558   : > { %2857 = vadd.xlane.f32.xlu1 %v2856_v35  ;;  %v2866_v37 = vadd.f32 %v2865_v36, %v2864_v33 }
 0x55a   : > { %2867 = vadd.xlane.f32.xlu0 %v2866_v37 }
 0x5e5   : > { %v2858_v38 = vpop.xlane.xlu1 %2857 }
 0x5e6   : > { %2860 = vst.msk [vmem:[%s423_s28] sm:$0xff] %vm2859_vm14, %v2858_v38 }
 0x5e7   : > { %v2868_v39 = vpop.xlane.xlu0 %2867 }
 0x5e8   : > { %2869 = vst.msk [vmem:[%s427_s19] sm:$0xff] %vm2859_vm14, %v2868_v39 }
 0x5e9 PF: > { %s23_s13 = sadd.s32 1, %s3547_s13  }
 0x5ea   : > { %p20_p5 = scmp.ge.s32.totalorder %s23_s13, 4  }
 0x5ec   :  { %22 = sbr.rel (!%p20_p5) target bundleno = 2 (0x2), region = 132 }
 0x5f3   :  { %2919 = vsyncpa [#allocation3], 1 }
 0x5f4   :  { %2921 = vsyncpa [#allocation3 + $0x1], 1 }
 0x5f5   :  { %2922 = vsyncpa [#allocation5], 1 }

</bundles_post_ra>
